<compile_context>
chip_gen: v6e
topology: v6e:2x2x1
jax: 0.10.0
libtpu: 0.0.40
codegen_flags: <defaults>
</compile_context>

<pallas_src>
import jax
import jax.numpy as jnp
from jax.experimental import pallas as pl
from jax.experimental.pallas import tpu as pltpu


LEAKY_SLOPE = 0.01  # PyTorch nn.LeakyReLU default negative_slope
LANE = 128
SUBLANE = 8


def _leaky_relu(x):
    return jnp.where(x >= 0, x, LEAKY_SLOPE * x)


def _round_up(n, m):
    return ((n + m - 1) // m) * m


def _device_kind():
    try:
        return jax.devices()[0].device_kind.lower()
    except Exception:
        return ""


def _pick_batch_tile(B):
    """256-row batch tile on all generations (M streams through the MXU in
    8-row pushes regardless of the 128x128 vs 256x256 array size).  Kept a
    multiple of 16 so the kernel can split it into two row halves.  On v7x,
    guarantee >= 2 grid steps whenever there is enough work so both
    TensorCores participate."""
    tile = min(256, _round_up(max(B, 1), 16))
    kind = _device_kind()
    if ("v7" in kind) or ("7x" in kind):
        if pl.cdiv(B, tile) < 2 and tile >= 32:
            tile = _round_up(tile // 2, 16)
    return tile


def _vmem_limit_bytes(budget):
    """Clamp the requested VMEM budget to the real per-core capacity
    (64 MiB on v7x, 128 MiB on v5e/v6e), leaving headroom for Mosaic scratch."""
    cap = None
    try:
        cap = int(pltpu.get_tpu_info().vmem_capacity_bytes)
    except Exception:
        cap = None
    if cap is None:
        cap = (64 << 20) if ("v7" in _device_kind()) else (128 << 20)
    ceiling = max(cap - (12 << 20), 16 << 20)
    return int(min(max(budget, 32 << 20), ceiling))


def ae3hl_kernel(x_ref,
                 w1_ref, b1_ref, w2_ref, b2_ref, w3_ref, b3_ref,
                 w4_ref, b4_ref, w5_ref, b5_ref, w6_ref, b6_ref,
                 o_ref):
    layers = ((w1_ref, b1_ref, jnp.tanh),
              (w2_ref, b2_ref, jnp.tanh),
              (w3_ref, b3_ref, _leaky_relu),
              (w4_ref, b4_ref, jnp.tanh),
              (w5_ref, b5_ref, jnp.tanh),
              (w6_ref, b6_ref, _leaky_relu))

    def layer(h, w_ref, b_ref, act):
        # bf16 operands on the MXU, f32 accumulation; bias + activation in f32.
        y = jnp.dot(h.astype(jnp.bfloat16), w_ref[...],
                    preferred_element_type=jnp.float32) + b_ref[...]
        return act(y)

    rows = x_ref.shape[0]
    if rows % 16 == 0:
        # Two independent row-half chains: the scheduler overlaps one half's
        # MXU pushes with the other half's bias/activation/cast VPU+EUP work,
        # hiding MRF drain / EUP FIFO latency of these tiny matmuls.
        half = rows // 2
        h0 = x_ref[:half, :]
        h1 = x_ref[half:, :]
        for (w_ref, b_ref, act) in layers:
            h0 = layer(h0, w_ref, b_ref, act)
            h1 = layer(h1, w_ref, b_ref, act)
        o_ref[:half, :] = h0.astype(o_ref.dtype)
        o_ref[half:, :] = h1.astype(o_ref.dtype)
    else:
        h = x_ref[...]
        for (w_ref, b_ref, act) in layers:
            h = layer(h, w_ref, b_ref, act)
        o_ref[...] = h.astype(o_ref.dtype)


def prepare_params(params):
    """One-time parameter prep (keep OFF the per-call hot path).

    Zero-pads every weight (in, out) -> (round_up(in,128), round_up(out,128))
    and bias (1, out) -> (1, round_up(out,128)); casts weights to bf16 (MXU
    operands), keeps biases f32.  Padded rows/cols are zero, and
    tanh(0) = leaky_relu(0) = 0, so results on the valid slice are identical.
    Returns (flat, pads) with flat = [W1, b1, ..., W6, b6]."""
    flat, pads = [], []
    for (w, b) in params:
        din, dout = w.shape
        pdin, pdout = _round_up(din, LANE), _round_up(dout, LANE)
        pads.append((pdin, pdout))
        if (pdin, pdout) != (din, dout):
            w = jnp.zeros((pdin, pdout), jnp.float32).at[:din, :dout].set(w)
        b = jnp.asarray(b, jnp.float32).reshape(1, -1)
        if b.shape[1] != pdout:
            b = jnp.zeros((1, pdout), jnp.float32).at[:, :dout].set(b)
        flat.append(w.astype(jnp.bfloat16))   # MXU operands
        flat.append(b)                        # bias added in f32
    return flat, pads


def ae3hl_forward(x, prepared, *, batch_tile=None):
    """x: (B, input_size) float32.  prepared = prepare_params(params)."""
    flat, pads = prepared
    B, input_size = x.shape
    f_pad = pads[0][0]                 # padded input/output feature dim
    assert f_pad == _round_up(input_size, LANE)
    assert pads[-1][1] == f_pad

    if batch_tile is None:
        batch_tile = _pick_batch_tile(B)
    assert batch_tile % SUBLANE == 0, "batch_tile must be a multiple of 8"

    # Hot-path HBM traffic is just x + params + out: x stays f32 (bf16 cast
    # happens inside the kernel); ragged batches rely on Pallas boundary
    # blocks (masked last-tile stores), not a zero-padded copy.  Only an
    # unaligned feature dim still needs a one-off column pad of x, because
    # boundary-read garbage could be NaN and 0 * NaN = NaN would contaminate
    # valid rows through layer 1.
    x_in = x
    if f_pad != input_size:
        x_in = jnp.zeros((B, f_pad), x.dtype).at[:, :input_size].set(x)

    grid = pl.cdiv(B, batch_tile)

    param_bytes = sum(int(a.size) * a.dtype.itemsize for a in flat)
    io_block_bytes = batch_tile * f_pad * 4
    budget = (2 * io_block_bytes                       # f32 x tile, double-buffered
              + 2 * io_block_bytes                     # f32 out tile, double-buffered
              + 2 * param_bytes                        # params (worst-case buffering)
              + 8 * batch_tile * max(p for _, p in pads) * 4   # live intermediates
              + (4 << 20))                             # headroom
    vmem_limit = _vmem_limit_bytes(budget)

    rows = grid * batch_tile
    flops = 2 * rows * sum(pi * po for pi, po in pads)
    tanh_cols = pads[0][1] + pads[1][1] + pads[3][1] + pads[4][1]
    cost = pl.CostEstimate(
        flops=int(flops),
        transcendentals=int(rows * tanh_cols),
        bytes_accessed=int(x_in.size) * x_in.dtype.itemsize
        + param_bytes + B * input_size * 4,
    )

    def run(param_mode):
        def param_spec(arr):
            # Constant block index -> parameter is VMEM-resident, DMA'd once.
            if param_mode is None:
                return pl.BlockSpec(arr.shape, lambda i: (0, 0))
            return pl.BlockSpec(arr.shape, lambda i: (0, 0),
                                pipeline_mode=param_mode)

        in_specs = [pl.BlockSpec((batch_tile, f_pad), lambda i: (i, 0))]
        in_specs += [param_spec(a) for a in flat]
        out_spec = pl.BlockSpec((batch_tile, f_pad), lambda i: (i, 0))

        return pl.pallas_call(
            ae3hl_kernel,
            out_shape=jax.ShapeDtypeStruct((B, input_size), jnp.float32),
            grid_spec=pltpu.PrefetchScalarGridSpec(
                num_scalar_prefetch=0,
                grid=(grid,),
                in_specs=in_specs,
                out_specs=out_spec,
            ),
            compiler_params=pltpu.CompilerParams(
                dimension_semantics=("parallel",),
                vmem_limit_bytes=vmem_limit,
            ),
            cost_estimate=cost,
        )(x_in, *flat)

    try:
        # Constant-index params don't need a second pipeline buffer.
        return run(pl.Buffered(1))
    except Exception:
        # Fallback: default double buffering (params are tiny at these sizes).
        return run(None)


def init_params(key, input_size, hl1, hl2, hl3):
    """Deterministic init matching nn.Linear's uniform(-1/sqrt(fan_in), 1/sqrt(fan_in))."""
    dims = [(input_size, hl1), (hl1, hl2), (hl2, hl3),
            (hl3, hl2), (hl2, hl1), (hl1, input_size)]
    params = []
    for (fan_in, fan_out) in dims:
        key, kw, kb = jax.random.split(key, 3)
        bound = 1.0 / jnp.sqrt(jnp.float32(fan_in))
        w = jax.random.uniform(kw, (fan_in, fan_out), jnp.float32, -bound, bound)
        b = jax.random.uniform(kb, (1, fan_out), jnp.float32, -bound, bound)
        params.append((w, b))
    return params


def ae3hl_reference(x, params, *, matmul_dtype=jnp.float32):
    """Pure-JAX reference.  matmul_dtype=bfloat16 mirrors the kernel's MXU numerics."""
    acts = [jnp.tanh, jnp.tanh, _leaky_relu, jnp.tanh, jnp.tanh, _leaky_relu]
    h = x.astype(jnp.float32)
    for (w, b), act in zip(params, acts):
        y = jnp.dot(h.astype(matmul_dtype), w.astype(matmul_dtype),
                    preferred_element_type=jnp.float32,
                    precision=jax.lax.Precision.HIGHEST)
        h = act(y + b)
    return h


if __name__ == "__main__":
    # batch=500 exercises the ragged last-tile (masked boundary stores) with
    # 2 grid steps at tile 256; input_size=128 hits the fully aligned,
    # zero-copy wrapper fast path.
    batch, input_size, hl1, hl2, hl3 = 500, 128, 64, 32, 16

    key = jax.random.PRNGKey(0)
    key, kx = jax.random.split(key)
    x = jax.random.normal(kx, (batch, input_size), jnp.float32)

    params = init_params(key, input_size, hl1, hl2, hl3)
    prepared = prepare_params(params)          # one-time, off the hot path

    out = jax.block_until_ready(ae3hl_forward(x, prepared))
    assert out.shape == (batch, input_size)
    assert out.dtype == jnp.float32

    # Primary check: reference with bf16 matmul operands (same MXU numerics).
    ref_bf16 = ae3hl_reference(x, params, matmul_dtype=jnp.bfloat16)
    assert jnp.allclose(out, ref_bf16, atol=2e-2, rtol=2e-2), \
        "mismatch vs bf16-matmul JAX reference"

    # Sanity check: full-f32 reference (loose tolerance for bf16 operand quantization).
    ref_f32 = ae3hl_reference(x, params, matmul_dtype=jnp.float32)
    assert jnp.allclose(out, ref_f32, atol=1e-1, rtol=1e-1), \
        "mismatch vs f32 JAX reference"

    print("KERNEL_OK")
</pallas_src>

<mosaic_0001>
module attributes {stable_mosaic.version = 11 : i64} {
  func.func @ae3hl_kernel(%arg0: i32, %arg1: memref<256x128xf32, #tpu.memory_space<vmem>>, %arg2: memref<128x128xbf16, #tpu.memory_space<vmem>>, %arg3: memref<1x128xf32, #tpu.memory_space<vmem>>, %arg4: memref<128x128xbf16, #tpu.memory_space<vmem>>, %arg5: memref<1x128xf32, #tpu.memory_space<vmem>>, %arg6: memref<128x128xbf16, #tpu.memory_space<vmem>>, %arg7: memref<1x128xf32, #tpu.memory_space<vmem>>, %arg8: memref<128x128xbf16, #tpu.memory_space<vmem>>, %arg9: memref<1x128xf32, #tpu.memory_space<vmem>>, %arg10: memref<128x128xbf16, #tpu.memory_space<vmem>>, %arg11: memref<1x128xf32, #tpu.memory_space<vmem>>, %arg12: memref<128x128xbf16, #tpu.memory_space<vmem>>, %arg13: memref<1x128xf32, #tpu.memory_space<vmem>>, %arg14: memref<256x128xf32, #tpu.memory_space<vmem>>) attributes {dimension_semantics = [#tpu.dimension_semantics<parallel>], iteration_bounds = array<i64: 2>, scalar_prefetch = 0 : i64, scratch_operands = 0 : i64, tpu.core_type = #tpu.core_type<tc>, window_params = [{transform_indices = @transform_0, window_bounds = array<i64: 256, 128>}, {pipeline_mode = #tpu.pipeline_mode<synchronous>, transform_indices = @transform_1, window_bounds = array<i64: 128, 128>}, {pipeline_mode = #tpu.pipeline_mode<synchronous>, transform_indices = @transform_2, window_bounds = array<i64: 1, 128>}, {pipeline_mode = #tpu.pipeline_mode<synchronous>, transform_indices = @transform_3, window_bounds = array<i64: 128, 128>}, {pipeline_mode = #tpu.pipeline_mode<synchronous>, transform_indices = @transform_4, window_bounds = array<i64: 1, 128>}, {pipeline_mode = #tpu.pipeline_mode<synchronous>, transform_indices = @transform_5, window_bounds = array<i64: 128, 128>}, {pipeline_mode = #tpu.pipeline_mode<synchronous>, transform_indices = @transform_6, window_bounds = array<i64: 1, 128>}, {pipeline_mode = #tpu.pipeline_mode<synchronous>, transform_indices = @transform_7, window_bounds = array<i64: 128, 128>}, {pipeline_mode = #tpu.pipeline_mode<synchronous>, transform_indices = @transform_8, window_bounds = array<i64: 1, 128>}, {pipeline_mode = #tpu.pipeline_mode<synchronous>, transform_indices = @transform_9, window_bounds = array<i64: 128, 128>}, {pipeline_mode = #tpu.pipeline_mode<synchronous>, transform_indices = @transform_10, window_bounds = array<i64: 1, 128>}, {pipeline_mode = #tpu.pipeline_mode<synchronous>, transform_indices = @transform_11, window_bounds = array<i64: 128, 128>}, {pipeline_mode = #tpu.pipeline_mode<synchronous>, transform_indices = @transform_12, window_bounds = array<i64: 1, 128>}, {transform_indices = @transform_13, window_bounds = array<i64: 256, 128>}]} {
    %c0 = arith.constant 0 : index
    %c0_0 = arith.constant 0 : index
    %0 = vector.load %arg1[%c0, %c0_0] : memref<256x128xf32, #tpu.memory_space<vmem>>, vector<128x128xf32>
    %c128 = arith.constant 128 : index
    %c0_1 = arith.constant 0 : index
    %1 = vector.load %arg1[%c128, %c0_1] : memref<256x128xf32, #tpu.memory_space<vmem>>, vector<128x128xf32>
    %2 = arith.truncf %0 : vector<128x128xf32> to vector<128x128xbf16>
    %c0_2 = arith.constant 0 : index
    %c0_3 = arith.constant 0 : index
    %3 = vector.load %arg2[%c0_2, %c0_3] : memref<128x128xbf16, #tpu.memory_space<vmem>>, vector<128x128xbf16>
    %cst = arith.constant dense<0.000000e+00> : vector<128x128xf32>
    %4 = tpu.matmul %2, %3, %cst {dimension_numbers = #tpu.dot_dimension_numbers<[1], [0], [0], [1], [0, 0, 1, 1], [], []>} : vector<128x128xbf16>, vector<128x128xbf16>, vector<128x128xf32> -> vector<128x128xf32>
    %c0_4 = arith.constant 0 : index
    %c0_5 = arith.constant 0 : index
    %5 = vector.load %arg3[%c0_4, %c0_5] : memref<1x128xf32, #tpu.memory_space<vmem>>, vector<1x128xf32>
    %6 = vector.broadcast %5 : vector<1x128xf32> to vector<128x128xf32>
    %7 = arith.addf %4, %6 : vector<128x128xf32>
    %8 = math.tanh %7 : vector<128x128xf32>
    %9 = arith.truncf %1 : vector<128x128xf32> to vector<128x128xbf16>
    %c0_6 = arith.constant 0 : index
    %c0_7 = arith.constant 0 : index
    %10 = vector.load %arg2[%c0_6, %c0_7] : memref<128x128xbf16, #tpu.memory_space<vmem>>, vector<128x128xbf16>
    %cst_8 = arith.constant dense<0.000000e+00> : vector<128x128xf32>
    %11 = tpu.matmul %9, %10, %cst_8 {dimension_numbers = #tpu.dot_dimension_numbers<[1], [0], [0], [1], [0, 0, 1, 1], [], []>} : vector<128x128xbf16>, vector<128x128xbf16>, vector<128x128xf32> -> vector<128x128xf32>
    %c0_9 = arith.constant 0 : index
    %c0_10 = arith.constant 0 : index
    %12 = vector.load %arg3[%c0_9, %c0_10] : memref<1x128xf32, #tpu.memory_space<vmem>>, vector<1x128xf32>
    %13 = vector.broadcast %12 : vector<1x128xf32> to vector<128x128xf32>
    %14 = arith.addf %11, %13 : vector<128x128xf32>
    %15 = math.tanh %14 : vector<128x128xf32>
    %16 = arith.truncf %8 : vector<128x128xf32> to vector<128x128xbf16>
    %c0_11 = arith.constant 0 : index
    %c0_12 = arith.constant 0 : index
    %17 = vector.load %arg4[%c0_11, %c0_12] : memref<128x128xbf16, #tpu.memory_space<vmem>>, vector<128x128xbf16>
    %cst_13 = arith.constant dense<0.000000e+00> : vector<128x128xf32>
    %18 = tpu.matmul %16, %17, %cst_13 {dimension_numbers = #tpu.dot_dimension_numbers<[1], [0], [0], [1], [0, 0, 1, 1], [], []>} : vector<128x128xbf16>, vector<128x128xbf16>, vector<128x128xf32> -> vector<128x128xf32>
    %c0_14 = arith.constant 0 : index
    %c0_15 = arith.constant 0 : index
    %19 = vector.load %arg5[%c0_14, %c0_15] : memref<1x128xf32, #tpu.memory_space<vmem>>, vector<1x128xf32>
    %20 = vector.broadcast %19 : vector<1x128xf32> to vector<128x128xf32>
    %21 = arith.addf %18, %20 : vector<128x128xf32>
    %22 = math.tanh %21 : vector<128x128xf32>
    %23 = arith.truncf %15 : vector<128x128xf32> to vector<128x128xbf16>
    %c0_16 = arith.constant 0 : index
    %c0_17 = arith.constant 0 : index
    %24 = vector.load %arg4[%c0_16, %c0_17] : memref<128x128xbf16, #tpu.memory_space<vmem>>, vector<128x128xbf16>
    %cst_18 = arith.constant dense<0.000000e+00> : vector<128x128xf32>
    %25 = tpu.matmul %23, %24, %cst_18 {dimension_numbers = #tpu.dot_dimension_numbers<[1], [0], [0], [1], [0, 0, 1, 1], [], []>} : vector<128x128xbf16>, vector<128x128xbf16>, vector<128x128xf32> -> vector<128x128xf32>
    %c0_19 = arith.constant 0 : index
    %c0_20 = arith.constant 0 : index
    %26 = vector.load %arg5[%c0_19, %c0_20] : memref<1x128xf32, #tpu.memory_space<vmem>>, vector<1x128xf32>
    %27 = vector.broadcast %26 : vector<1x128xf32> to vector<128x128xf32>
    %28 = arith.addf %25, %27 : vector<128x128xf32>
    %29 = math.tanh %28 : vector<128x128xf32>
    %30 = arith.truncf %22 : vector<128x128xf32> to vector<128x128xbf16>
    %c0_21 = arith.constant 0 : index
    %c0_22 = arith.constant 0 : index
    %31 = vector.load %arg6[%c0_21, %c0_22] : memref<128x128xbf16, #tpu.memory_space<vmem>>, vector<128x128xbf16>
    %cst_23 = arith.constant dense<0.000000e+00> : vector<128x128xf32>
    %32 = tpu.matmul %30, %31, %cst_23 {dimension_numbers = #tpu.dot_dimension_numbers<[1], [0], [0], [1], [0, 0, 1, 1], [], []>} : vector<128x128xbf16>, vector<128x128xbf16>, vector<128x128xf32> -> vector<128x128xf32>
    %c0_24 = arith.constant 0 : index
    %c0_25 = arith.constant 0 : index
    %33 = vector.load %arg7[%c0_24, %c0_25] : memref<1x128xf32, #tpu.memory_space<vmem>>, vector<1x128xf32>
    %34 = vector.broadcast %33 : vector<1x128xf32> to vector<128x128xf32>
    %35 = arith.addf %32, %34 : vector<128x128xf32>
    %cst_26 = arith.constant 0.000000e+00 : f32
    %36 = vector.broadcast %cst_26 : f32 to vector<128x128xf32>
    %37 = arith.cmpf oge, %35, %36 : vector<128x128xf32>
    %cst_27 = arith.constant 0.00999999977 : f32
    %38 = vector.broadcast %cst_27 : f32 to vector<128x128xf32>
    %39 = arith.mulf %38, %35 : vector<128x128xf32>
    %40 = arith.select %37, %35, %39 : vector<128x128xi1>, vector<128x128xf32>
    %41 = arith.truncf %29 : vector<128x128xf32> to vector<128x128xbf16>
    %c0_28 = arith.constant 0 : index
    %c0_29 = arith.constant 0 : index
    %42 = vector.load %arg6[%c0_28, %c0_29] : memref<128x128xbf16, #tpu.memory_space<vmem>>, vector<128x128xbf16>
    %cst_30 = arith.constant dense<0.000000e+00> : vector<128x128xf32>
    %43 = tpu.matmul %41, %42, %cst_30 {dimension_numbers = #tpu.dot_dimension_numbers<[1], [0], [0], [1], [0, 0, 1, 1], [], []>} : vector<128x128xbf16>, vector<128x128xbf16>, vector<128x128xf32> -> vector<128x128xf32>
    %c0_31 = arith.constant 0 : index
    %c0_32 = arith.constant 0 : index
    %44 = vector.load %arg7[%c0_31, %c0_32] : memref<1x128xf32, #tpu.memory_space<vmem>>, vector<1x128xf32>
    %45 = vector.broadcast %44 : vector<1x128xf32> to vector<128x128xf32>
    %46 = arith.addf %43, %45 : vector<128x128xf32>
    %cst_33 = arith.constant 0.000000e+00 : f32
    %47 = vector.broadcast %cst_33 : f32 to vector<128x128xf32>
    %48 = arith.cmpf oge, %46, %47 : vector<128x128xf32>
    %cst_34 = arith.constant 0.00999999977 : f32
    %49 = vector.broadcast %cst_34 : f32 to vector<128x128xf32>
    %50 = arith.mulf %49, %46 : vector<128x128xf32>
    %51 = arith.select %48, %46, %50 : vector<128x128xi1>, vector<128x128xf32>
    %52 = arith.truncf %40 : vector<128x128xf32> to vector<128x128xbf16>
    %c0_35 = arith.constant 0 : index
    %c0_36 = arith.constant 0 : index
    %53 = vector.load %arg8[%c0_35, %c0_36] : memref<128x128xbf16, #tpu.memory_space<vmem>>, vector<128x128xbf16>
    %cst_37 = arith.constant dense<0.000000e+00> : vector<128x128xf32>
    %54 = tpu.matmul %52, %53, %cst_37 {dimension_numbers = #tpu.dot_dimension_numbers<[1], [0], [0], [1], [0, 0, 1, 1], [], []>} : vector<128x128xbf16>, vector<128x128xbf16>, vector<128x128xf32> -> vector<128x128xf32>
    %c0_38 = arith.constant 0 : index
    %c0_39 = arith.constant 0 : index
    %55 = vector.load %arg9[%c0_38, %c0_39] : memref<1x128xf32, #tpu.memory_space<vmem>>, vector<1x128xf32>
    %56 = vector.broadcast %55 : vector<1x128xf32> to vector<128x128xf32>
    %57 = arith.addf %54, %56 : vector<128x128xf32>
    %58 = math.tanh %57 : vector<128x128xf32>
    %59 = arith.truncf %51 : vector<128x128xf32> to vector<128x128xbf16>
    %c0_40 = arith.constant 0 : index
    %c0_41 = arith.constant 0 : index
    %60 = vector.load %arg8[%c0_40, %c0_41] : memref<128x128xbf16, #tpu.memory_space<vmem>>, vector<128x128xbf16>
    %cst_42 = arith.constant dense<0.000000e+00> : vector<128x128xf32>
    %61 = tpu.matmul %59, %60, %cst_42 {dimension_numbers = #tpu.dot_dimension_numbers<[1], [0], [0], [1], [0, 0, 1, 1], [], []>} : vector<128x128xbf16>, vector<128x128xbf16>, vector<128x128xf32> -> vector<128x128xf32>
    %c0_43 = arith.constant 0 : index
    %c0_44 = arith.constant 0 : index
    %62 = vector.load %arg9[%c0_43, %c0_44] : memref<1x128xf32, #tpu.memory_space<vmem>>, vector<1x128xf32>
    %63 = vector.broadcast %62 : vector<1x128xf32> to vector<128x128xf32>
    %64 = arith.addf %61, %63 : vector<128x128xf32>
    %65 = math.tanh %64 : vector<128x128xf32>
    %66 = arith.truncf %58 : vector<128x128xf32> to vector<128x128xbf16>
    %c0_45 = arith.constant 0 : index
    %c0_46 = arith.constant 0 : index
    %67 = vector.load %arg10[%c0_45, %c0_46] : memref<128x128xbf16, #tpu.memory_space<vmem>>, vector<128x128xbf16>
    %cst_47 = arith.constant dense<0.000000e+00> : vector<128x128xf32>
    %68 = tpu.matmul %66, %67, %cst_47 {dimension_numbers = #tpu.dot_dimension_numbers<[1], [0], [0], [1], [0, 0, 1, 1], [], []>} : vector<128x128xbf16>, vector<128x128xbf16>, vector<128x128xf32> -> vector<128x128xf32>
    %c0_48 = arith.constant 0 : index
    %c0_49 = arith.constant 0 : index
    %69 = vector.load %arg11[%c0_48, %c0_49] : memref<1x128xf32, #tpu.memory_space<vmem>>, vector<1x128xf32>
    %70 = vector.broadcast %69 : vector<1x128xf32> to vector<128x128xf32>
    %71 = arith.addf %68, %70 : vector<128x128xf32>
    %72 = math.tanh %71 : vector<128x128xf32>
    %73 = arith.truncf %65 : vector<128x128xf32> to vector<128x128xbf16>
    %c0_50 = arith.constant 0 : index
    %c0_51 = arith.constant 0 : index
    %74 = vector.load %arg10[%c0_50, %c0_51] : memref<128x128xbf16, #tpu.memory_space<vmem>>, vector<128x128xbf16>
    %cst_52 = arith.constant dense<0.000000e+00> : vector<128x128xf32>
    %75 = tpu.matmul %73, %74, %cst_52 {dimension_numbers = #tpu.dot_dimension_numbers<[1], [0], [0], [1], [0, 0, 1, 1], [], []>} : vector<128x128xbf16>, vector<128x128xbf16>, vector<128x128xf32> -> vector<128x128xf32>
    %c0_53 = arith.constant 0 : index
    %c0_54 = arith.constant 0 : index
    %76 = vector.load %arg11[%c0_53, %c0_54] : memref<1x128xf32, #tpu.memory_space<vmem>>, vector<1x128xf32>
    %77 = vector.broadcast %76 : vector<1x128xf32> to vector<128x128xf32>
    %78 = arith.addf %75, %77 : vector<128x128xf32>
    %79 = math.tanh %78 : vector<128x128xf32>
    %80 = arith.truncf %72 : vector<128x128xf32> to vector<128x128xbf16>
    %c0_55 = arith.constant 0 : index
    %c0_56 = arith.constant 0 : index
    %81 = vector.load %arg12[%c0_55, %c0_56] : memref<128x128xbf16, #tpu.memory_space<vmem>>, vector<128x128xbf16>
    %cst_57 = arith.constant dense<0.000000e+00> : vector<128x128xf32>
    %82 = tpu.matmul %80, %81, %cst_57 {dimension_numbers = #tpu.dot_dimension_numbers<[1], [0], [0], [1], [0, 0, 1, 1], [], []>} : vector<128x128xbf16>, vector<128x128xbf16>, vector<128x128xf32> -> vector<128x128xf32>
    %c0_58 = arith.constant 0 : index
    %c0_59 = arith.constant 0 : index
    %83 = vector.load %arg13[%c0_58, %c0_59] : memref<1x128xf32, #tpu.memory_space<vmem>>, vector<1x128xf32>
    %84 = vector.broadcast %83 : vector<1x128xf32> to vector<128x128xf32>
    %85 = arith.addf %82, %84 : vector<128x128xf32>
    %cst_60 = arith.constant 0.000000e+00 : f32
    %86 = vector.broadcast %cst_60 : f32 to vector<128x128xf32>
    %87 = arith.cmpf oge, %85, %86 : vector<128x128xf32>
    %cst_61 = arith.constant 0.00999999977 : f32
    %88 = vector.broadcast %cst_61 : f32 to vector<128x128xf32>
    %89 = arith.mulf %88, %85 : vector<128x128xf32>
    %90 = arith.select %87, %85, %89 : vector<128x128xi1>, vector<128x128xf32>
    %91 = arith.truncf %79 : vector<128x128xf32> to vector<128x128xbf16>
    %c0_62 = arith.constant 0 : index
    %c0_63 = arith.constant 0 : index
    %92 = vector.load %arg12[%c0_62, %c0_63] : memref<128x128xbf16, #tpu.memory_space<vmem>>, vector<128x128xbf16>
    %cst_64 = arith.constant dense<0.000000e+00> : vector<128x128xf32>
    %93 = tpu.matmul %91, %92, %cst_64 {dimension_numbers = #tpu.dot_dimension_numbers<[1], [0], [0], [1], [0, 0, 1, 1], [], []>} : vector<128x128xbf16>, vector<128x128xbf16>, vector<128x128xf32> -> vector<128x128xf32>
    %c0_65 = arith.constant 0 : index
    %c0_66 = arith.constant 0 : index
    %94 = vector.load %arg13[%c0_65, %c0_66] : memref<1x128xf32, #tpu.memory_space<vmem>>, vector<1x128xf32>
    %95 = vector.broadcast %94 : vector<1x128xf32> to vector<128x128xf32>
    %96 = arith.addf %93, %95 : vector<128x128xf32>
    %cst_67 = arith.constant 0.000000e+00 : f32
    %97 = vector.broadcast %cst_67 : f32 to vector<128x128xf32>
    %98 = arith.cmpf oge, %96, %97 : vector<128x128xf32>
    %cst_68 = arith.constant 0.00999999977 : f32
    %99 = vector.broadcast %cst_68 : f32 to vector<128x128xf32>
    %100 = arith.mulf %99, %96 : vector<128x128xf32>
    %101 = arith.select %98, %96, %100 : vector<128x128xi1>, vector<128x128xf32>
    %c0_69 = arith.constant 0 : index
    %c0_70 = arith.constant 0 : index
    %102 = vector.load %arg14[%c0_69, %c0_70] : memref<256x128xf32, #tpu.memory_space<vmem>>, vector<128x128xf32>
    tpu.vector_store %arg14[%c0_69, %c0_70], %90 {strides = array<i32>} : memref<256x128xf32, #tpu.memory_space<vmem>>, vector<128x128xf32>,
    %c128_71 = arith.constant 128 : index
    %c0_72 = arith.constant 0 : index
    %103 = vector.load %arg14[%c128_71, %c0_72] : memref<256x128xf32, #tpu.memory_space<vmem>>, vector<128x128xf32>
    tpu.vector_store %arg14[%c128_71, %c0_72], %101 {strides = array<i32>} : memref<256x128xf32, #tpu.memory_space<vmem>>, vector<128x128xf32>,
    return
  }
  func.func @transform_0(%arg0: i32) -> (i32, i32) {
    %c0_i32 = arith.constant 0 : i32
    %c0_i32_0 = arith.constant 0 : i32
    return %arg0, %c0_i32 : i32, i32
  }
  func.func @transform_1(%arg0: i32) -> (i32, i32) {
    %c0_i32 = arith.constant 0 : i32
    %c0_i32_0 = arith.constant 0 : i32
    %c0_i32_1 = arith.constant 0 : i32
    return %c0_i32, %c0_i32_0 : i32, i32
  }
  func.func @transform_2(%arg0: i32) -> (i32, i32) {
    %c0_i32 = arith.constant 0 : i32
    %c0_i32_0 = arith.constant 0 : i32
    %c0_i32_1 = arith.constant 0 : i32
    return %c0_i32, %c0_i32_0 : i32, i32
  }
  func.func @transform_3(%arg0: i32) -> (i32, i32) {
    %c0_i32 = arith.constant 0 : i32
    %c0_i32_0 = arith.constant 0 : i32
    %c0_i32_1 = arith.constant 0 : i32
    return %c0_i32, %c0_i32_0 : i32, i32
  }
  func.func @transform_4(%arg0: i32) -> (i32, i32) {
    %c0_i32 = arith.constant 0 : i32
    %c0_i32_0 = arith.constant 0 : i32
    %c0_i32_1 = arith.constant 0 : i32
    return %c0_i32, %c0_i32_0 : i32, i32
  }
  func.func @transform_5(%arg0: i32) -> (i32, i32) {
    %c0_i32 = arith.constant 0 : i32
    %c0_i32_0 = arith.constant 0 : i32
    %c0_i32_1 = arith.constant 0 : i32
    return %c0_i32, %c0_i32_0 : i32, i32
  }
  func.func @transform_6(%arg0: i32) -> (i32, i32) {
    %c0_i32 = arith.constant 0 : i32
    %c0_i32_0 = arith.constant 0 : i32
    %c0_i32_1 = arith.constant 0 : i32
    return %c0_i32, %c0_i32_0 : i32, i32
  }
  func.func @transform_7(%arg0: i32) -> (i32, i32) {
    %c0_i32 = arith.constant 0 : i32
    %c0_i32_0 = arith.constant 0 : i32
    %c0_i32_1 = arith.constant 0 : i32
    return %c0_i32, %c0_i32_0 : i32, i32
  }
  func.func @transform_8(%arg0: i32) -> (i32, i32) {
    %c0_i32 = arith.constant 0 : i32
    %c0_i32_0 = arith.constant 0 : i32
    %c0_i32_1 = arith.constant 0 : i32
    return %c0_i32, %c0_i32_0 : i32, i32
  }
  func.func @transform_9(%arg0: i32) -> (i32, i32) {
    %c0_i32 = arith.constant 0 : i32
    %c0_i32_0 = arith.constant 0 : i32
    %c0_i32_1 = arith.constant 0 : i32
    return %c0_i32, %c0_i32_0 : i32, i32
  }
  func.func @transform_10(%arg0: i32) -> (i32, i32) {
    %c0_i32 = arith.constant 0 : i32
    %c0_i32_0 = arith.constant 0 : i32
    %c0_i32_1 = arith.constant 0 : i32
    return %c0_i32, %c0_i32_0 : i32, i32
  }
  func.func @transform_11(%arg0: i32) -> (i32, i32) {
    %c0_i32 = arith.constant 0 : i32
    %c0_i32_0 = arith.constant 0 : i32
    %c0_i32_1 = arith.constant 0 : i32
    return %c0_i32, %c0_i32_0 : i32, i32
  }
  func.func @transform_12(%arg0: i32) -> (i32, i32) {
    %c0_i32 = arith.constant 0 : i32
    %c0_i32_0 = arith.constant 0 : i32
    %c0_i32_1 = arith.constant 0 : i32
    return %c0_i32, %c0_i32_0 : i32, i32
  }
  func.func @transform_13(%arg0: i32) -> (i32, i32) {
    %c0_i32 = arith.constant 0 : i32
    %c0_i32_0 = arith.constant 0 : i32
    return %arg0, %c0_i32 : i32, i32
  }
}

module attributes {stable_mosaic.version = 11 : i64} {
  func.func @ae3hl_kernel(%arg0: i32, %arg1: memref<256x128xf32, #tpu.memory_space<vmem>>, %arg2: memref<128x128xbf16, #tpu.memory_space<vmem>>, %arg3: memref<1x128xf32, #tpu.memory_space<vmem>>, %arg4: memref<128x128xbf16, #tpu.memory_space<vmem>>, %arg5: memref<1x128xf32, #tpu.memory_space<vmem>>, %arg6: memref<128x128xbf16, #tpu.memory_space<vmem>>, %arg7: memref<1x128xf32, #tpu.memory_space<vmem>>, %arg8: memref<128x128xbf16, #tpu.memory_space<vmem>>, %arg9: memref<1x128xf32, #tpu.memory_space<vmem>>, %arg10: memref<128x128xbf16, #tpu.memory_space<vmem>>, %arg11: memref<1x128xf32, #tpu.memory_space<vmem>>, %arg12: memref<128x128xbf16, #tpu.memory_space<vmem>>, %arg13: memref<1x128xf32, #tpu.memory_space<vmem>>, %arg14: memref<256x128xf32, #tpu.memory_space<vmem>>) attributes {dimension_semantics = [#tpu.dimension_semantics<parallel>], iteration_bounds = array<i64: 2>, scalar_prefetch = 0 : i64, scratch_operands = 0 : i64, tpu.core_type = #tpu.core_type<tc>, window_params = [{transform_indices = @transform_0, window_bounds = array<i64: 256, 128>}, {pipeline_mode = #tpu.pipeline_mode<synchronous>, transform_indices = @transform_1, window_bounds = array<i64: 128, 128>}, {pipeline_mode = #tpu.pipeline_mode<synchronous>, transform_indices = @transform_2, window_bounds = array<i64: 1, 128>}, {pipeline_mode = #tpu.pipeline_mode<synchronous>, transform_indices = @transform_3, window_bounds = array<i64: 128, 128>}, {pipeline_mode = #tpu.pipeline_mode<synchronous>, transform_indices = @transform_4, window_bounds = array<i64: 1, 128>}, {pipeline_mode = #tpu.pipeline_mode<synchronous>, transform_indices = @transform_5, window_bounds = array<i64: 128, 128>}, {pipeline_mode = #tpu.pipeline_mode<synchronous>, transform_indices = @transform_6, window_bounds = array<i64: 1, 128>}, {pipeline_mode = #tpu.pipeline_mode<synchronous>, transform_indices = @transform_7, window_bounds = array<i64: 128, 128>}, {pipeline_mode = #tpu.pipeline_mode<synchronous>, transform_indices = @transform_8, window_bounds = array<i64: 1, 128>}, {pipeline_mode = #tpu.pipeline_mode<synchronous>, transform_indices = @transform_9, window_bounds = array<i64: 128, 128>}, {pipeline_mode = #tpu.pipeline_mode<synchronous>, transform_indices = @transform_10, window_bounds = array<i64: 1, 128>}, {pipeline_mode = #tpu.pipeline_mode<synchronous>, transform_indices = @transform_11, window_bounds = array<i64: 128, 128>}, {pipeline_mode = #tpu.pipeline_mode<synchronous>, transform_indices = @transform_12, window_bounds = array<i64: 1, 128>}, {transform_indices = @transform_13, window_bounds = array<i64: 256, 128>}]} {
    %c0 = arith.constant 0 : index
    %c0_0 = arith.constant 0 : index
    %0 = vector.load %arg1[%c0, %c0_0] : memref<256x128xf32, #tpu.memory_space<vmem>>, vector<128x128xf32>
    %c128 = arith.constant 128 : index
    %c0_1 = arith.constant 0 : index
    %1 = vector.load %arg1[%c128, %c0_1] : memref<256x128xf32, #tpu.memory_space<vmem>>, vector<128x128xf32>
    %2 = arith.truncf %0 : vector<128x128xf32> to vector<128x128xbf16>
    %c0_2 = arith.constant 0 : index
    %c0_3 = arith.constant 0 : index
    %3 = vector.load %arg2[%c0_2, %c0_3] : memref<128x128xbf16, #tpu.memory_space<vmem>>, vector<128x128xbf16>
    %cst = arith.constant dense<0.000000e+00> : vector<128x128xf32>
    %4 = tpu.matmul %2, %3, %cst {dimension_numbers = #tpu.dot_dimension_numbers<[1], [0], [0], [1], [0, 0, 1, 1], [], []>} : vector<128x128xbf16>, vector<128x128xbf16>, vector<128x128xf32> -> vector<128x128xf32>
    %c0_4 = arith.constant 0 : index
    %c0_5 = arith.constant 0 : index
    %5 = vector.load %arg3[%c0_4, %c0_5] : memref<1x128xf32, #tpu.memory_space<vmem>>, vector<1x128xf32>
    %6 = vector.broadcast %5 : vector<1x128xf32> to vector<128x128xf32>
    %7 = arith.addf %4, %6 : vector<128x128xf32>
    %8 = math.tanh %7 : vector<128x128xf32>
    %9 = arith.truncf %1 : vector<128x128xf32> to vector<128x128xbf16>
    %c0_6 = arith.constant 0 : index
    %c0_7 = arith.constant 0 : index
    %10 = vector.load %arg2[%c0_6, %c0_7] : memref<128x128xbf16, #tpu.memory_space<vmem>>, vector<128x128xbf16>
    %cst_8 = arith.constant dense<0.000000e+00> : vector<128x128xf32>
    %11 = tpu.matmul %9, %10, %cst_8 {dimension_numbers = #tpu.dot_dimension_numbers<[1], [0], [0], [1], [0, 0, 1, 1], [], []>} : vector<128x128xbf16>, vector<128x128xbf16>, vector<128x128xf32> -> vector<128x128xf32>
    %c0_9 = arith.constant 0 : index
    %c0_10 = arith.constant 0 : index
    %12 = vector.load %arg3[%c0_9, %c0_10] : memref<1x128xf32, #tpu.memory_space<vmem>>, vector<1x128xf32>
    %13 = vector.broadcast %12 : vector<1x128xf32> to vector<128x128xf32>
    %14 = arith.addf %11, %13 : vector<128x128xf32>
    %15 = math.tanh %14 : vector<128x128xf32>
    %16 = arith.truncf %8 : vector<128x128xf32> to vector<128x128xbf16>
    %c0_11 = arith.constant 0 : index
    %c0_12 = arith.constant 0 : index
    %17 = vector.load %arg4[%c0_11, %c0_12] : memref<128x128xbf16, #tpu.memory_space<vmem>>, vector<128x128xbf16>
    %cst_13 = arith.constant dense<0.000000e+00> : vector<128x128xf32>
    %18 = tpu.matmul %16, %17, %cst_13 {dimension_numbers = #tpu.dot_dimension_numbers<[1], [0], [0], [1], [0, 0, 1, 1], [], []>} : vector<128x128xbf16>, vector<128x128xbf16>, vector<128x128xf32> -> vector<128x128xf32>
    %c0_14 = arith.constant 0 : index
    %c0_15 = arith.constant 0 : index
    %19 = vector.load %arg5[%c0_14, %c0_15] : memref<1x128xf32, #tpu.memory_space<vmem>>, vector<1x128xf32>
    %20 = vector.broadcast %19 : vector<1x128xf32> to vector<128x128xf32>
    %21 = arith.addf %18, %20 : vector<128x128xf32>
    %22 = math.tanh %21 : vector<128x128xf32>
    %23 = arith.truncf %15 : vector<128x128xf32> to vector<128x128xbf16>
    %c0_16 = arith.constant 0 : index
    %c0_17 = arith.constant 0 : index
    %24 = vector.load %arg4[%c0_16, %c0_17] : memref<128x128xbf16, #tpu.memory_space<vmem>>, vector<128x128xbf16>
    %cst_18 = arith.constant dense<0.000000e+00> : vector<128x128xf32>
    %25 = tpu.matmul %23, %24, %cst_18 {dimension_numbers = #tpu.dot_dimension_numbers<[1], [0], [0], [1], [0, 0, 1, 1], [], []>} : vector<128x128xbf16>, vector<128x128xbf16>, vector<128x128xf32> -> vector<128x128xf32>
    %c0_19 = arith.constant 0 : index
    %c0_20 = arith.constant 0 : index
    %26 = vector.load %arg5[%c0_19, %c0_20] : memref<1x128xf32, #tpu.memory_space<vmem>>, vector<1x128xf32>
    %27 = vector.broadcast %26 : vector<1x128xf32> to vector<128x128xf32>
    %28 = arith.addf %25, %27 : vector<128x128xf32>
    %29 = math.tanh %28 : vector<128x128xf32>
    %30 = arith.truncf %22 : vector<128x128xf32> to vector<128x128xbf16>
    %c0_21 = arith.constant 0 : index
    %c0_22 = arith.constant 0 : index
    %31 = vector.load %arg6[%c0_21, %c0_22] : memref<128x128xbf16, #tpu.memory_space<vmem>>, vector<128x128xbf16>
    %cst_23 = arith.constant dense<0.000000e+00> : vector<128x128xf32>
    %32 = tpu.matmul %30, %31, %cst_23 {dimension_numbers = #tpu.dot_dimension_numbers<[1], [0], [0], [1], [0, 0, 1, 1], [], []>} : vector<128x128xbf16>, vector<128x128xbf16>, vector<128x128xf32> -> vector<128x128xf32>
    %c0_24 = arith.constant 0 : index
    %c0_25 = arith.constant 0 : index
    %33 = vector.load %arg7[%c0_24, %c0_25] : memref<1x128xf32, #tpu.memory_space<vmem>>, vector<1x128xf32>
    %34 = vector.broadcast %33 : vector<1x128xf32> to vector<128x128xf32>
    %35 = arith.addf %32, %34 : vector<128x128xf32>
    %cst_26 = arith.constant 0.000000e+00 : f32
    %36 = vector.broadcast %cst_26 : f32 to vector<128x128xf32>
    %37 = arith.cmpf oge, %35, %36 : vector<128x128xf32>
    %cst_27 = arith.constant 0.00999999977 : f32
    %38 = vector.broadcast %cst_27 : f32 to vector<128x128xf32>
    %39 = arith.mulf %38, %35 : vector<128x128xf32>
    %40 = arith.select %37, %35, %39 : vector<128x128xi1>, vector<128x128xf32>
    %41 = arith.truncf %29 : vector<128x128xf32> to vector<128x128xbf16>
    %c0_28 = arith.constant 0 : index
    %c0_29 = arith.constant 0 : index
    %42 = vector.load %arg6[%c0_28, %c0_29] : memref<128x128xbf16, #tpu.memory_space<vmem>>, vector<128x128xbf16>
    %cst_30 = arith.constant dense<0.000000e+00> : vector<128x128xf32>
    %43 = tpu.matmul %41, %42, %cst_30 {dimension_numbers = #tpu.dot_dimension_numbers<[1], [0], [0], [1], [0, 0, 1, 1], [], []>} : vector<128x128xbf16>, vector<128x128xbf16>, vector<128x128xf32> -> vector<128x128xf32>
    %c0_31 = arith.constant 0 : index
    %c0_32 = arith.constant 0 : index
    %44 = vector.load %arg7[%c0_31, %c0_32] : memref<1x128xf32, #tpu.memory_space<vmem>>, vector<1x128xf32>
    %45 = vector.broadcast %44 : vector<1x128xf32> to vector<128x128xf32>
    %46 = arith.addf %43, %45 : vector<128x128xf32>
    %cst_33 = arith.constant 0.000000e+00 : f32
    %47 = vector.broadcast %cst_33 : f32 to vector<128x128xf32>
    %48 = arith.cmpf oge, %46, %47 : vector<128x128xf32>
    %cst_34 = arith.constant 0.00999999977 : f32
    %49 = vector.broadcast %cst_34 : f32 to vector<128x128xf32>
    %50 = arith.mulf %49, %46 : vector<128x128xf32>
    %51 = arith.select %48, %46, %50 : vector<128x128xi1>, vector<128x128xf32>
    %52 = arith.truncf %40 : vector<128x128xf32> to vector<128x128xbf16>
    %c0_35 = arith.constant 0 : index
    %c0_36 = arith.constant 0 : index
    %53 = vector.load %arg8[%c0_35, %c0_36] : memref<128x128xbf16, #tpu.memory_space<vmem>>, vector<128x128xbf16>
    %cst_37 = arith.constant dense<0.000000e+00> : vector<128x128xf32>
    %54 = tpu.matmul %52, %53, %cst_37 {dimension_numbers = #tpu.dot_dimension_numbers<[1], [0], [0], [1], [0, 0, 1, 1], [], []>} : vector<128x128xbf16>, vector<128x128xbf16>, vector<128x128xf32> -> vector<128x128xf32>
    %c0_38 = arith.constant 0 : index
    %c0_39 = arith.constant 0 : index
    %55 = vector.load %arg9[%c0_38, %c0_39] : memref<1x128xf32, #tpu.memory_space<vmem>>, vector<1x128xf32>
    %56 = vector.broadcast %55 : vector<1x128xf32> to vector<128x128xf32>
    %57 = arith.addf %54, %56 : vector<128x128xf32>
    %58 = math.tanh %57 : vector<128x128xf32>
    %59 = arith.truncf %51 : vector<128x128xf32> to vector<128x128xbf16>
    %c0_40 = arith.constant 0 : index
    %c0_41 = arith.constant 0 : index
    %60 = vector.load %arg8[%c0_40, %c0_41] : memref<128x128xbf16, #tpu.memory_space<vmem>>, vector<128x128xbf16>
    %cst_42 = arith.constant dense<0.000000e+00> : vector<128x128xf32>
    %61 = tpu.matmul %59, %60, %cst_42 {dimension_numbers = #tpu.dot_dimension_numbers<[1], [0], [0], [1], [0, 0, 1, 1], [], []>} : vector<128x128xbf16>, vector<128x128xbf16>, vector<128x128xf32> -> vector<128x128xf32>
    %c0_43 = arith.constant 0 : index
    %c0_44 = arith.constant 0 : index
    %62 = vector.load %arg9[%c0_43, %c0_44] : memref<1x128xf32, #tpu.memory_space<vmem>>, vector<1x128xf32>
    %63 = vector.broadcast %62 : vector<1x128xf32> to vector<128x128xf32>
    %64 = arith.addf %61, %63 : vector<128x128xf32>
    %65 = math.tanh %64 : vector<128x128xf32>
    %66 = arith.truncf %58 : vector<128x128xf32> to vector<128x128xbf16>
    %c0_45 = arith.constant 0 : index
    %c0_46 = arith.constant 0 : index
    %67 = vector.load %arg10[%c0_45, %c0_46] : memref<128x128xbf16, #tpu.memory_space<vmem>>, vector<128x128xbf16>
    %cst_47 = arith.constant dense<0.000000e+00> : vector<128x128xf32>
    %68 = tpu.matmul %66, %67, %cst_47 {dimension_numbers = #tpu.dot_dimension_numbers<[1], [0], [0], [1], [0, 0, 1, 1], [], []>} : vector<128x128xbf16>, vector<128x128xbf16>, vector<128x128xf32> -> vector<128x128xf32>
    %c0_48 = arith.constant 0 : index
    %c0_49 = arith.constant 0 : index
    %69 = vector.load %arg11[%c0_48, %c0_49] : memref<1x128xf32, #tpu.memory_space<vmem>>, vector<1x128xf32>
    %70 = vector.broadcast %69 : vector<1x128xf32> to vector<128x128xf32>
    %71 = arith.addf %68, %70 : vector<128x128xf32>
    %72 = math.tanh %71 : vector<128x128xf32>
    %73 = arith.truncf %65 : vector<128x128xf32> to vector<128x128xbf16>
    %c0_50 = arith.constant 0 : index
    %c0_51 = arith.constant 0 : index
    %74 = vector.load %arg10[%c0_50, %c0_51] : memref<128x128xbf16, #tpu.memory_space<vmem>>, vector<128x128xbf16>
    %cst_52 = arith.constant dense<0.000000e+00> : vector<128x128xf32>
    %75 = tpu.matmul %73, %74, %cst_52 {dimension_numbers = #tpu.dot_dimension_numbers<[1], [0], [0], [1], [0, 0, 1, 1], [], []>} : vector<128x128xbf16>, vector<128x128xbf16>, vector<128x128xf32> -> vector<128x128xf32>
    %c0_53 = arith.constant 0 : index
    %c0_54 = arith.constant 0 : index
    %76 = vector.load %arg11[%c0_53, %c0_54] : memref<1x128xf32, #tpu.memory_space<vmem>>, vector<1x128xf32>
    %77 = vector.broadcast %76 : vector<1x128xf32> to vector<128x128xf32>
    %78 = arith.addf %75, %77 : vector<128x128xf32>
    %79 = math.tanh %78 : vector<128x128xf32>
    %80 = arith.truncf %72 : vector<128x128xf32> to vector<128x128xbf16>
    %c0_55 = arith.constant 0 : index
    %c0_56 = arith.constant 0 : index
    %81 = vector.load %arg12[%c0_55, %c0_56] : memref<128x128xbf16, #tpu.memory_space<vmem>>, vector<128x128xbf16>
    %cst_57 = arith.constant dense<0.000000e+00> : vector<128x128xf32>
    %82 = tpu.matmul %80, %81, %cst_57 {dimension_numbers = #tpu.dot_dimension_numbers<[1], [0], [0], [1], [0, 0, 1, 1], [], []>} : vector<128x128xbf16>, vector<128x128xbf16>, vector<128x128xf32> -> vector<128x128xf32>
    %c0_58 = arith.constant 0 : index
    %c0_59 = arith.constant 0 : index
    %83 = vector.load %arg13[%c0_58, %c0_59] : memref<1x128xf32, #tpu.memory_space<vmem>>, vector<1x128xf32>
    %84 = vector.broadcast %83 : vector<1x128xf32> to vector<128x128xf32>
    %85 = arith.addf %82, %84 : vector<128x128xf32>
    %cst_60 = arith.constant 0.000000e+00 : f32
    %86 = vector.broadcast %cst_60 : f32 to vector<128x128xf32>
    %87 = arith.cmpf oge, %85, %86 : vector<128x128xf32>
    %cst_61 = arith.constant 0.00999999977 : f32
    %88 = vector.broadcast %cst_61 : f32 to vector<128x128xf32>
    %89 = arith.mulf %88, %85 : vector<128x128xf32>
    %90 = arith.select %87, %85, %89 : vector<128x128xi1>, vector<128x128xf32>
    %91 = arith.truncf %79 : vector<128x128xf32> to vector<128x128xbf16>
    %c0_62 = arith.constant 0 : index
    %c0_63 = arith.constant 0 : index
    %92 = vector.load %arg12[%c0_62, %c0_63] : memref<128x128xbf16, #tpu.memory_space<vmem>>, vector<128x128xbf16>
    %cst_64 = arith.constant dense<0.000000e+00> : vector<128x128xf32>
    %93 = tpu.matmul %91, %92, %cst_64 {dimension_numbers = #tpu.dot_dimension_numbers<[1], [0], [0], [1], [0, 0, 1, 1], [], []>} : vector<128x128xbf16>, vector<128x128xbf16>, vector<128x128xf32> -> vector<128x128xf32>
    %c0_65 = arith.constant 0 : index
    %c0_66 = arith.constant 0 : index
    %94 = vector.load %arg13[%c0_65, %c0_66] : memref<1x128xf32, #tpu.memory_space<vmem>>, vector<1x128xf32>
    %95 = vector.broadcast %94 : vector<1x128xf32> to vector<128x128xf32>
    %96 = arith.addf %93, %95 : vector<128x128xf32>
    %cst_67 = arith.constant 0.000000e+00 : f32
    %97 = vector.broadcast %cst_67 : f32 to vector<128x128xf32>
    %98 = arith.cmpf oge, %96, %97 : vector<128x128xf32>
    %cst_68 = arith.constant 0.00999999977 : f32
    %99 = vector.broadcast %cst_68 : f32 to vector<128x128xf32>
    %100 = arith.mulf %99, %96 : vector<128x128xf32>
    %101 = arith.select %98, %96, %100 : vector<128x128xi1>, vector<128x128xf32>
    %c0_69 = arith.constant 0 : index
    %c0_70 = arith.constant 0 : index
    %102 = vector.load %arg14[%c0_69, %c0_70] : memref<256x128xf32, #tpu.memory_space<vmem>>, vector<128x128xf32>
    tpu.vector_store %arg14[%c0_69, %c0_70], %90 {strides = array<i32>} : memref<256x128xf32, #tpu.memory_space<vmem>>, vector<128x128xf32>,
    %c128_71 = arith.constant 128 : index
    %c0_72 = arith.constant 0 : index
    %103 = vector.load %arg14[%c128_71, %c0_72] : memref<256x128xf32, #tpu.memory_space<vmem>>, vector<128x128xf32>
    tpu.vector_store %arg14[%c128_71, %c0_72], %101 {strides = array<i32>} : memref<256x128xf32, #tpu.memory_space<vmem>>, vector<128x128xf32>,
    return
  }
  func.func @transform_0(%arg0: i32) -> (i32, i32) {
    %c0_i32 = arith.constant 0 : i32
    %c0_i32_0 = arith.constant 0 : i32
    return %arg0, %c0_i32 : i32, i32
  }
  func.func @transform_1(%arg0: i32) -> (i32, i32) {
    %c0_i32 = arith.constant 0 : i32
    %c0_i32_0 = arith.constant 0 : i32
    %c0_i32_1 = arith.constant 0 : i32
    return %c0_i32, %c0_i32_0 : i32, i32
  }
  func.func @transform_2(%arg0: i32) -> (i32, i32) {
    %c0_i32 = arith.constant 0 : i32
    %c0_i32_0 = arith.constant 0 : i32
    %c0_i32_1 = arith.constant 0 : i32
    return %c0_i32, %c0_i32_0 : i32, i32
  }
  func.func @transform_3(%arg0: i32) -> (i32, i32) {
    %c0_i32 = arith.constant 0 : i32
    %c0_i32_0 = arith.constant 0 : i32
    %c0_i32_1 = arith.constant 0 : i32
    return %c0_i32, %c0_i32_0 : i32, i32
  }
  func.func @transform_4(%arg0: i32) -> (i32, i32) {
    %c0_i32 = arith.constant 0 : i32
    %c0_i32_0 = arith.constant 0 : i32
    %c0_i32_1 = arith.constant 0 : i32
    return %c0_i32, %c0_i32_0 : i32, i32
  }
  func.func @transform_5(%arg0: i32) -> (i32, i32) {
    %c0_i32 = arith.constant 0 : i32
    %c0_i32_0 = arith.constant 0 : i32
    %c0_i32_1 = arith.constant 0 : i32
    return %c0_i32, %c0_i32_0 : i32, i32
  }
  func.func @transform_6(%arg0: i32) -> (i32, i32) {
    %c0_i32 = arith.constant 0 : i32
    %c0_i32_0 = arith.constant 0 : i32
    %c0_i32_1 = arith.constant 0 : i32
    return %c0_i32, %c0_i32_0 : i32, i32
  }
  func.func @transform_7(%arg0: i32) -> (i32, i32) {
    %c0_i32 = arith.constant 0 : i32
    %c0_i32_0 = arith.constant 0 : i32
    %c0_i32_1 = arith.constant 0 : i32
    return %c0_i32, %c0_i32_0 : i32, i32
  }
  func.func @transform_8(%arg0: i32) -> (i32, i32) {
    %c0_i32 = arith.constant 0 : i32
    %c0_i32_0 = arith.constant 0 : i32
    %c0_i32_1 = arith.constant 0 : i32
    return %c0_i32, %c0_i32_0 : i32, i32
  }
  func.func @transform_9(%arg0: i32) -> (i32, i32) {
    %c0_i32 = arith.constant 0 : i32
    %c0_i32_0 = arith.constant 0 : i32
    %c0_i32_1 = arith.constant 0 : i32
    return %c0_i32, %c0_i32_0 : i32, i32
  }
  func.func @transform_10(%arg0: i32) -> (i32, i32) {
    %c0_i32 = arith.constant 0 : i32
    %c0_i32_0 = arith.constant 0 : i32
    %c0_i32_1 = arith.constant 0 : i32
    return %c0_i32, %c0_i32_0 : i32, i32
  }
  func.func @transform_11(%arg0: i32) -> (i32, i32) {
    %c0_i32 = arith.constant 0 : i32
    %c0_i32_0 = arith.constant 0 : i32
    %c0_i32_1 = arith.constant 0 : i32
    return %c0_i32, %c0_i32_0 : i32, i32
  }
  func.func @transform_12(%arg0: i32) -> (i32, i32) {
    %c0_i32 = arith.constant 0 : i32
    %c0_i32_0 = arith.constant 0 : i32
    %c0_i32_1 = arith.constant 0 : i32
    return %c0_i32, %c0_i32_0 : i32, i32
  }
  func.func @transform_13(%arg0: i32) -> (i32, i32) {
    %c0_i32 = arith.constant 0 : i32
    %c0_i32_0 = arith.constant 0 : i32
    return %arg0, %c0_i32 : i32, i32
  }
}

</mosaic_0001>

<bundles_post_ra>
// kernel: tpu_custom_call.1
= control target key start
LH: loop header
LB: loop body
LE: loop exit
PB: predicated region body
PF: predicated region fallthrough
CT: control target
= control target key end

     0   :  { %s4848_s0 = inlined_call_operand.hbm [shape: f32[500,128], index: 0, kind: input, shape index: {}]   ;;  %s4849_s1 = inlined_call_operand.hbm [shape: bf16[128,128], index: 1, kind: input, shape index: {}]   ;;  %s4850_s2 = inlined_call_operand.vmem [shape: f32[1,128], index: 2, kind: input, shape index: {}]   ;;  %s4851_s3 = inlined_call_operand.hbm [shape: bf16[128,128], index: 3, kind: input, shape index: {}]   ;;  %s4852_s4 = inlined_call_operand.vmem [shape: f32[1,128], index: 4, kind: input, shape index: {}]   ;;  %s4853_s5 = inlined_call_operand.hbm [shape: bf16[128,128], index: 5, kind: input, shape index: {}]   ;;  %s4854_s6 = inlined_call_operand.vmem [shape: f32[1,128], index: 6, kind: input, shape index: {}]   ;;  %s4855_s7 = inlined_call_operand.hbm [shape: bf16[128,128], index: 7, kind: input, shape index: {}]   ;;  %s4856_s8 = inlined_call_operand.vmem [shape: f32[1,128], index: 8, kind: input, shape index: {}]   ;;  %s4857_s9 = inlined_call_operand.hbm [shape: bf16[128,128], index: 9, kind: input, shape index: {}]   ;;  %s4858_s10 = inlined_call_operand.vmem [shape: f32[1,128], index: 10, kind: input, shape index: {}]   ;;  %s4859_s11 = inlined_call_operand.hbm [shape: bf16[128,128], index: 11, kind: input, shape index: {}]   ;;  %s4860_s12 = inlined_call_operand.vmem [shape: f32[1,128], index: 12, kind: input, shape index: {}]   ;;  %s4861_s13 = inlined_call_operand.hbm [shape: f32[500,128], index: 13, kind: output, shape index: {}]  }
   0x1   :  { %4870 = sst [smem:[#allocation25_spill]] %s4849_s1 }
   0x2   :  { %4871 = sst [smem:[#allocation26_spill]] %s4860_s12 }
   0x3   :  { %4872 = sst [smem:[#allocation27_spill]] %s4861_s13 }
   0x4   :  { %18 = vsyncpa [#allocation3], 0 }
   0x5   :  { %20 = vsyncpa [#allocation3 + $0x1], 0 }
   0x6   :  { %21 = vsyncpa [#allocation6], 0 }
   0x7   :  { %22 = vsyncpa [#allocation9], 0 }
   0x8   :  { %23 = vsyncpa [#allocation12], 0 }
   0x9   :  { %24 = vsyncpa [#allocation4], 0 }
   0xa   :  { %26 = vsyncpa [#allocation4 + $0x1], 0  ;;  %s4203_s25 = smov 0   ;;  %s4205_s26 = smov 0  }
   0xb   :  { %s4207_s27 = smov 0   ;;  %s4209_s28 = smov 0  }
   0xc LB: > { %4873 = sst [smem:[#allocation20_spill]] %s4105_s25  ;;  %s4224_s29 = sadd.s32 4294967295, %s4117_s28   ;;  %s4117_s28 = sphi %s4209_s28, %s4900_s28   ;;  %s4113_s27 = sphi %s4207_s27, %s4904_s27   ;;  %s4109_s26 = sphi %s4205_s26, %s4903_s26   ;;  %s4105_s25 = sphi %s4203_s25, %s4902_s25  }
   0xd   : > { %s2783_s30 = sadd.s32 4294967294, %s4117_s28   ;;  %s4228_s14 = sadd.s32 1, %s4117_s28  }
   0xe   : > { %4874 = sst [smem:[#allocation21_spill]] %s4228_s14  ;;  %s39_s15 = sadd.s32 1, %s4113_s27 }
   0xf   : > { %s36_s16 = ssub.s32 %s4117_s28, %s4228_s14  ;;  %p46_p0 = scmp.ne.s32.totalorder %s4113_s27, %s4109_s26 }
  0x10   : > { %p37_p1 = scmp.eq.s32.totalorder %s36_s16, 0  ;;  %p47_p2 = scmp.eq.s32.totalorder %s4117_s28, 0 }
  0x11   : > { %p52_p3 = scmp.ne.s32.totalorder %s4109_s26, %s4105_s25  ;;  %p4864_p4 = scmp.eq.s32.totalorder %s4224_s29, 0 }
  0x12   : > { %s4240_s17 = scalar_select %p37_p1, %s4113_s27, %s39_s15  }
  0x13   : > { %p4242_p5 = por %p47_p2, %p46_p0  ;;  %p4248_p6 = por %p4864_p4, %p52_p3 }
  0x14   : > { %4875 = sst [smem:[#allocation22_spill]] %s4240_s17  ;;  %p328_p7 = scmp.eq.s32.totalorder %s4224_s29, 1 }
  0x15   : > { %p334_p8 = scmp.eq.s32.totalorder %s2783_s30, 1  ;;  %p2784_p9 = scmp.ge.s32.totalorder %s4117_s28, 1 }
  0x16   : > { %p341_p10 = scmp.lt.s32.totalorder %s4117_s28, 3  ;;  %p4255_p11 = por %p328_p7, %p46_p0 }
  0x17   : > { %p4259_p12 = por %p334_p8, %p52_p3  ;;  %s4119_s23 = smov [#allocation5]  }
  0x18   : > { %s4878_s20 = scalar_select %p4255_p11, 1, 0 }
  0x19   : > { %s4880_s21 = scalar_select %p4259_p12, 1, 0 }
  0x1a   : > { %4879 = sst [smem:[#allocation23_spill]] %s4878_s20  ;;  %p4263_p13 = pnand %p2784_p9, %p341_p10 }
  0x1b   : > { %4881 = sst [smem:[#allocation24_spill]] %s4880_s21  ;;  %s353_s24 = sshll.u32 %s4119_s23, 4  ;;  %s354_s24 = int_to_ptr.vmem [resolvable:$true] %s353_s24 }
  0x1c   : > { %p3475_p1 = pneg %p4263_p13  ;;  %s4120_s15 = smov [#allocation8]  }
  0x1d   : > { %s385_s16 = sshll.u32 %s4120_s15, 4  ;;  %s3870_s14 = scalar_lea.vmem %s354_s24, 1024  ;;  %s386_s16 = int_to_ptr.vmem [resolvable:$true] %s385_s16 }
  0x1e   : > { %p4271_p2 = pnand %p3475_p1, %p4864_p4  ;;  %p3871_p3 = scmp.ne.s32.totalorder %s354_s24, %s3870_s14 }
  0x1f   : > { %p3878_p9 = scmp.lt.s32.totalorder %s354_s24, %s354_s24  ;;  %p3879_p10 = scmp.lt.s32.totalorder %s3870_s14, %s3870_s14 }
  0x20   : > { %p4277_p0 = pneg %p4271_p2 }
  0x21   : > { %p3880_p1 = por %p3879_p10, %p3878_p9 }
  0x22   : > { %p3873_p7 = pnand %p3871_p3, %p4277_p0 }
  0x24   : > { %p3874_p8 = pneg %p3873_p7 }
  0x26   : > { %p3881_p4 = pnand %p3880_p1, %p3874_p8 }
  0x28   : > { %3884 = shalt.err (!%p3881_p4)
}
  0x29   : > { %s4121_s23 = smov 64   ;;  %s4122_s15 = smov 4  }
  0x2a   : > { %s4885_s1 = sld [smem:[#allocation25_spill]]  ;;  %s3896_s13 = scalar_lea.vmem %s386_s16, 1024 }
  0x2b   : > { %p3897_p3 = scmp.ne.s32.totalorder %s386_s16, %s3896_s13  ;;  %p3904_p9 = scmp.lt.s32.totalorder %s386_s16, %s386_s16 }
  0x2c   : > { %p3905_p8 = scmp.lt.s32.totalorder %s3896_s13, %s3896_s13 }
  0x2d   : > { %p3899_p7 = pnand %p3897_p3, %p4277_p0 }
  0x2e   : > { %p3906_p4 = por %p3905_p8, %p3904_p9 }
  0x2f   : > { %p3900_p12 = pneg %p3899_p7 }
  0x30   : > { %3478 = dma.hbm_to_vmem [thread:$0]  (!%p4271_p2), %s4885_s1, 1024, %s354_s24, [#allocation6], %s4121_s23, %s4121_s23, %s4122_s15  }
  0x31   : > { %p3907_p10 = pnand %p3906_p4, %p3900_p12 }
  0x33   : > { %3910 = shalt.err (!%p3907_p10)
}
  0x34   : > { %3484 = dma.hbm_to_vmem [thread:$0]  (!%p4271_p2), %s4853_s5, 1024, %s386_s16, [#allocation9], %s4121_s23, %s4121_s23, %s4122_s15  }
  0x35   : > { %s4123_s25 = smov [#allocation11]   ;;  %s4124_s24 = smov [#allocation7]  }
  0x36   : > { %s417_s21 = sshll.u32 %s4123_s25, 4  ;;  %s369_s1 = sshll.u32 %s4124_s24, 4  ;;  %s418_s21 = int_to_ptr.vmem [resolvable:$true] %s417_s21  ;;  %s370_s1 = int_to_ptr.vmem [resolvable:$true] %s369_s1 }
  0x37   : > { %s3922_s12 = scalar_lea.vmem %s418_s21, 1024  ;;  %p3930_p7 = scmp.lt.s32.totalorder %s418_s21, %s418_s21 }
  0x38   : > { %p3923_p1 = scmp.ne.s32.totalorder %s418_s21, %s3922_s12  ;;  %p3931_p9 = scmp.lt.s32.totalorder %s3922_s12, %s3922_s12 }
  0x3a   : > { %p3925_p12 = pnand %p3923_p1, %p4277_p0  ;;  %p3932_p8 = por %p3931_p9, %p3930_p7 }
  0x3c   : > { %p3926_p3 = pneg %p3925_p12 }
  0x3e   : > { %p3933_p4 = pnand %p3932_p8, %p3926_p3 }
  0x40   : > { %3936 = shalt.err (!%p3933_p4)
}
  0x41   : > { %3490 = dma.hbm_to_vmem [thread:$0]  (!%p4271_p2), %s4857_s9, 1024, %s418_s21, [#allocation12], %s4121_s23, %s4121_s23, %s4122_s15  }
  0x42   : > { %s3948_s16 = scalar_lea.vmem %s370_s1, 1024  ;;  %p3956_p11 = scmp.lt.s32.totalorder %s370_s1, %s370_s1 }
  0x43   : > { %p3949_p10 = scmp.ne.s32.totalorder %s370_s1, %s3948_s16  ;;  %p3957_p7 = scmp.lt.s32.totalorder %s3948_s16, %s3948_s16 }
  0x45   : > { %p3951_p1 = pnand %p3949_p10, %p4277_p0  ;;  %p3958_p3 = por %p3957_p7, %p3956_p11 }
  0x47   : > { %p3952_p12 = pneg %p3951_p1 }
  0x49   : > { %p3959_p9 = pnand %p3958_p3, %p3952_p12 }
  0x4b   : > { %3962 = shalt.err (!%p3959_p9)
}
  0x4c   : > { %3481 = dma.hbm_to_vmem [thread:$0]  (!%p4271_p2), %s4851_s3, 1024, %s370_s1, [#allocation6], %s4121_s23, %s4121_s23, %s4122_s15  }
  0x4d   : > { %s4125_s25 = smov [#allocation10]   ;;  %s4126_s24 = smov [#allocation13]  }
  0x4e   : > { %s401_s21 = sshll.u32 %s4125_s25, 4  ;;  %s433_s13 = sshll.u32 %s4126_s24, 4  ;;  %s402_s21 = int_to_ptr.vmem [resolvable:$true] %s401_s21  ;;  %s434_s13 = int_to_ptr.vmem [resolvable:$true] %s433_s13 }
  0x4f   : > { %s3974_s20 = scalar_lea.vmem %s402_s21, 1024  ;;  %p3982_p10 = scmp.lt.s32.totalorder %s402_s21, %s402_s21 }
  0x50   : > { %p3975_p8 = scmp.ne.s32.totalorder %s402_s21, %s3974_s20  ;;  %p3983_p1 = scmp.lt.s32.totalorder %s3974_s20, %s3974_s20 }
  0x52   : > { %p3977_p11 = pnand %p3975_p8, %p4277_p0  ;;  %p3984_p12 = por %p3983_p1, %p3982_p10 }
  0x54   : > { %p3978_p4 = pneg %p3977_p11 }
  0x56   : > { %p3985_p7 = pnand %p3984_p12, %p3978_p4 }
  0x58   : > { %3988 = shalt.err (!%p3985_p7)
}
  0x59   : > { %3487 = dma.hbm_to_vmem [thread:$0]  (!%p4271_p2), %s4855_s7, 1024, %s402_s21, [#allocation9], %s4121_s23, %s4121_s23, %s4122_s15  }
  0x5a   : > { %s4000_s12 = scalar_lea.vmem %s434_s13, 1024  ;;  %p4008_p11 = scmp.lt.s32.totalorder %s434_s13, %s434_s13 }
  0x5b   : > { %p4001_p3 = scmp.ne.s32.totalorder %s434_s13, %s4000_s12  ;;  %p4009_p10 = scmp.lt.s32.totalorder %s4000_s12, %s4000_s12 }
  0x5d   : > { %p4003_p9 = pnand %p4001_p3, %p4277_p0  ;;  %p4010_p4 = por %p4009_p10, %p4008_p11 }
  0x5f   : > { %p4004_p8 = pneg %p4003_p9 }
  0x61   : > { %p4011_p1 = pnand %p4010_p4, %p4004_p8 }
  0x63   : > { %4014 = shalt.err (!%p4011_p1)
}
  0x64   : > { %3493 = dma.hbm_to_vmem [thread:$0]  (!%p4271_p2), %s4859_s11, 1024, %s434_s13, [#allocation12], %s4121_s23, %s4121_s23, %s4122_s15  }
  0x65   : > { %p4869_p12 = scmp.ge.s32.totalorder %s4117_s28, 2 }
  0x67   : > { %446 = sbr.rel (%p4869_p12) target bundleno = 140 (0x8c), region = 64 }
  0x6c   : > { %449 = sbr.rel (!%p4242_p5) target bundleno = 140 (0x8c), region = 68  ;;  %s450_s17 = sand.u32 (%p4242_p5), 1, %s4113_s27  }
  0x6d   : > { %s2793_s21 = sshll.u32 (%p4242_p5), %s4117_s28, 5  ;;  %s2792_s30 = sshll.u32 (%p4242_p5), %s450_s17, 8 }
  0x6e   : > { %s456_s24 = ssub.s32 (%p4242_p5), 63, %s2793_s21  ;;  %s4351_s15 = scalar_lea.sflag (%p4242_p5), [#allocation3], %s450_s17 }
  0x6f   : > { %p457_p0 = scmp.lt.s32.totalorder (%p4242_p5), %s456_s24, 32  ;;  %s454_s13 = scalar_lea.vmem (%p4242_p5), [#allocation2], %s2792_s30 }
  0x71   : > { %s4906_s24 = smov (!%p457_p0, %s456_s24), 32 }
  0x72   : > { %s4348_s20 = sshll.u32 %s4906_s24, 7 }
  0x73   : > { %s461_s23 = ssub.s32 4096, %s4348_s20 }
  0x74   : > { %462 = vsyncadd %s4351_s15, %s461_s23  ;;  %p2795_p5 = scmp.ne.s32.totalorder %s4348_s20, 0  ;;  %s2871_s18 = sshll.u32 %s4117_s28, 12 }
  0x75   : > { %s4359_s12 = scalar_lea.hbm %s4848_s0, %s2871_s18  ;;  %s467_s14 = sshll.u32 %s454_s13, 4  ;;  %s4361_s14 = int_to_ptr.vmem [resolvable:$true] %s467_s14 }
  0x76   : > { %s4015_s25 = scalar_lea.hbm %s4359_s12, %s4348_s20  ;;  %s4019_s30 = scalar_lea.hbm %s4848_s0, 8064 }
  0x77   : > { %p4016_p2 = scmp.ne.s32.totalorder %s4359_s12, %s4015_s25  ;;  %p4020_p9 = scmp.lt.s32.totalorder %s4359_s12, %s4848_s0 }
  0x78   : > { %p4021_p8 = scmp.lt.s32.totalorder %s4019_s30, %s4015_s25 }
  0x79   : > { %p4017_p7 = pnand %p4016_p2, %p2795_p5 }
  0x7a   : > { %p4022_p11 = por %p4021_p8, %p4020_p9 }
  0x7b   : > { %p4018_p3 = pneg %p4017_p7 }
  0x7d   : > { %p4023_p10 = pnand %p4022_p11, %p4018_p3 }
  0x7f   : > { %4026 = shalt.err (!%p4023_p10)
}
  0x80   : > { %s4027_s13 = scalar_lea.vmem %s4361_s14, %s4348_s20  ;;  %s4127_s18 = smov [#allocation2]  }
  0x81   : > { %p4028_p4 = scmp.ne.s32.totalorder %s4361_s14, %s4027_s13  ;;  %s4031_s1 = sshll.u32 %s4127_s18, 4  ;;  %s4032_s1 = int_to_ptr.vmem [resolvable:$false] %s4031_s1 }
  0x82   : > { %s4033_s16 = scalar_lea.vmem %s4032_s1, 8192  ;;  %p4034_p2 = scmp.lt.s32.totalorder %s4361_s14, %s4032_s1 }
  0x83   : > { %p4029_p1 = pnand %p4028_p4, %p2795_p5  ;;  %p4035_p7 = scmp.lt.s32.totalorder %s4033_s16, %s4027_s13 }
  0x85   : > { %p4030_p0 = pneg %p4029_p1  ;;  %p4036_p12 = por %p4035_p7, %p4034_p2 }
  0x87   : > { %p4037_p9 = pnand %p4036_p12, %p4030_p0 }
  0x89   : > { %4040 = shalt.err (!%p4037_p9)
}
  0x8a   : > { %s4128_s25 = smov 128   ;;  %s4129_s17 = smov 8  }
  0x8b   : > { %473 = dma.hbm_to_vmem [thread:$0]  (%p2795_p5), %s4359_s12, %s4348_s20, %s4361_s14, %s4351_s15, %s4128_s25, %s4128_s25, %s4129_s17  }
  0x8c PF: > { %479 = sbr.rel (%p4263_p13) target bundleno = 1529 (0x5f9), region = 72  ;;  %s4390_s21 = sand.u32 (!%p4263_p13), 1, %s4109_s26  }
  0x8d   : > { %s2800_s30 = sshll.u32 (!%p4263_p13), %s4390_s21, 8  ;;  %s482_s24 = scalar_lea.sflag (!%p4263_p13), [#allocation3], %s4390_s21 }
  0x8e   : > { %s4396_s23 = scalar_lea.vmem (!%p4263_p13), [#allocation2], %s2800_s30 }
  0x91   : > { %4084 = dma.done.wait (%p4248_p6), %s482_s24, 4096  }
  0x92   : > { %4086 = vsyncadd (%p4248_p6), %s482_s24, 4294963200  ;;  %p4886_p12 = scmp.eq.s32.totalorder %s4224_s29, 0 }
  0x94   : > { %4088 = dma.done.wait (%p4886_p12), [#allocation6], 2048   ;;  %p4887_p13 = pmov %p4886_p12 }
  0x95   : > { %p4888_p5 = pmov %p4886_p12 }
  0x96   : > { %4090 = vsyncadd (%p4887_p13), [#allocation6], 4294965248 }
  0x97   : > { %4092 = dma.done.wait (%p4888_p5), [#allocation9], 2048   ;;  %p4889_p3 = pmov %p4888_p5 }
  0x99   : > { %4094 = vsyncadd (%p4889_p3), [#allocation9], 4294965248  ;;  %p4890_p8 = pmov %p4889_p3 }
  0x9a   : > { %p4891_p11 = pmov %p4889_p3 }
  0x9b   : > { %4096 = dma.done.wait (%p4890_p8), [#allocation12], 2048  }
  0x9c   : > { %4098 = vsyncadd (%p4891_p11), [#allocation12], 4294965248  ;;  %v3555_v0 = vld [vmem:[#allocation5 + $0x38] sm:$0xff]   ;;  %v3556_v1 = vld [vmem:[#allocation5 + $0x30] sm:$0xff]   ;;  %s4892_s24 = sld [smem:[#allocation26_spill]] }
  0x9d   : > { %3065 = vmatprep.subr.bf16.mxu0 %v3555_v0  ;;  %3097 = vmatprep.subr.bf16.mxu1 %v3555_v0  ;;  %v3557_v2 = vld [vmem:[#allocation5 + $0x28] sm:$0xff]   ;;  %v3558_v3 = vld [vmem:[#allocation5 + $0x20] sm:$0xff]   ;;  %v3559_v10 = vld [vmem:[#allocation5 + $0x18] sm:$0xff]   ;;  %s4893_s19 = sld [smem:[#allocation23_spill]] }
  0x9e   : > { %3066 = vmatpush3.bf16.msra.mxu0 %v3555_v0  ;;  %3098 = vmatpush3.bf16.msra.mxu1 %v3555_v0  ;;  %v563_v4 = vld [vmem:[%s4396_s23] sm:$0xff]  ;;  %v564_v5 = vld [vmem:[%s4396_s23 + $0x8] sm:$0xff]  ;;  %v3560_v11 = vld [vmem:[#allocation5 + $0x10] sm:$0xff]  }
  0x9f   : > { %3067 = vmatprep.subr.bf16.mxu0 %v3556_v1  ;;  %3099 = vmatprep.subr.bf16.mxu1 %v3556_v1  ;;  %v579_v6 = vld [vmem:[%s4396_s23 + $0x80] sm:$0xff]  ;;  %v595_v7 = vpack.c.bf16 %v564_v5, %v563_v4  ;;  %v580_v8 = vld [vmem:[%s4396_s23 + $0x88] sm:$0xff]  ;;  %v565_v14 = vld [vmem:[%s4396_s23 + $0x10] sm:$0xff] }
  0xa0   : > { %v787_v9 = vpack.c.bf16 %v580_v8, %v579_v6  ;;  %v3561_v12 = vld [vmem:[#allocation5 + $0x8] sm:$0xff]   ;;  %v3562_v13 = vld [vmem:[#allocation5] sm:$0xff]   ;;  %v566_v15 = vld [vmem:[%s4396_s23 + $0x18] sm:$0xff] }
  0xa1   : > { %3081 = vmatprep.mubr.bf16.mxu0 %v595_v7  ;;  %v581_v16 = vld [vmem:[%s4396_s23 + $0x90] sm:$0xff]  ;;  %v582_v17 = vld [vmem:[%s4396_s23 + $0x98] sm:$0xff]  ;;  %v567_v18 = vld [vmem:[%s4396_s23 + $0x20] sm:$0xff]  ;;  %v596_v23 = vpack.c.bf16 %v566_v15, %v565_v14 }
  0xa2   : > { %3068 = vmatpush3.bf16.msra.mxu0 %v3556_v1  ;;  %3100 = vmatpush3.bf16.msra.mxu1 %v3556_v1  ;;  %v568_v19 = vld [vmem:[%s4396_s23 + $0x28] sm:$0xff]  ;;  %v583_v20 = vld [vmem:[%s4396_s23 + $0xa0] sm:$0xff]  ;;  %v3563_v22 = vld [vmem:[#allocation7 + $0x38] sm:$0xff]   ;;  %v788_v24 = vpack.c.bf16 %v582_v17, %v581_v16 }
  0xa3   : > { %3069 = vmatprep.subr.bf16.mxu0 %v3557_v2  ;;  %3101 = vmatprep.subr.bf16.mxu1 %v3557_v2  ;;  %v584_v21 = vld [vmem:[%s4396_s23 + $0xa8] sm:$0xff]  ;;  %v597_v25 = vpack.c.bf16 %v568_v19, %v567_v18  ;;  %v3564_v27 = vld [vmem:[#allocation7 + $0x30] sm:$0xff]   ;;  %v570_v29 = vld [vmem:[%s4396_s23 + $0x38] sm:$0xff]  ;;  %p4894_p6 = scmp.ne.s32.totalorder %s4893_s19, 0 }
  0xa4   : > { %3113 = vmatprep.mubr.bf16.mxu1 %v787_v9  ;;  %v789_v26 = vpack.c.bf16 %v584_v21, %v583_v20  ;;  %v569_v28 = vld [vmem:[%s4396_s23 + $0x30] sm:$0xff]  ;;  %v586_v31 = vld [vmem:[%s4396_s23 + $0xb8] sm:$0xff]  ;;  %v571_v32 = vld [vmem:[%s4396_s23 + $0x40] sm:$0xff]  ;;  %s2863_s22 = sshll.u32 (%p4894_p6), %s4224_s29, 5 }
  0xa5   : > { %v585_v30 = vld [vmem:[%s4396_s23 + $0xb0] sm:$0xff]  ;;  %v572_v33 = vld [vmem:[%s4396_s23 + $0x48] sm:$0xff]  ;;  %v587_v34 = vld [vmem:[%s4396_s23 + $0xc0] sm:$0xff]  ;;  %v598_v36 = vpack.c.bf16 %v570_v29, %v569_v28  ;;  %s2642_s20 = ssub.s32 (%p4894_p6), 63, %s2863_s22 }
  0xa6   : > { %3070 = vmatpush3.bf16.msra.mxu0 %v3557_v2  ;;  %3102 = vmatpush3.bf16.msra.mxu1 %v3557_v2  ;;  %v588_v35 = vld [vmem:[%s4396_s23 + $0xc8] sm:$0xff]  ;;  %v790_v37 = vpack.c.bf16 %v586_v31, %v585_v30  ;;  %v599_v38 = vpack.c.bf16 %v572_v33, %v571_v32  ;;  %v573_v40 = vld [vmem:[%s4396_s23 + $0x50] sm:$0xff]  ;;  %v574_v41 = vld [vmem:[%s4396_s23 + $0x58] sm:$0xff]  ;;  %p2643_p10 = scmp.lt.s32.totalorder (%p4894_p6), %s2642_s20, 32 }
  0xa7   : > { %3071 = vmatprep.subr.bf16.mxu0 %v3558_v3  ;;  %3103 = vmatprep.subr.bf16.mxu1 %v3558_v3  ;;  %v791_v39 = vpack.c.bf16 %v588_v35, %v587_v34  ;;  %v589_v42 = vld [vmem:[%s4396_s23 + $0xd0] sm:$0xff]  ;;  %v590_v43 = vld [vmem:[%s4396_s23 + $0xd8] sm:$0xff]  ;;  %v575_v44 = vld [vmem:[%s4396_s23 + $0x60] sm:$0xff]  ;;  %v600_v48 = vpack.c.bf16 %v574_v41, %v573_v40 }
  0xa8   : > { %v576_v45 = vld [vmem:[%s4396_s23 + $0x68] sm:$0xff]  ;;  %v591_v46 = vld [vmem:[%s4396_s23 + $0xe0] sm:$0xff]  ;;  %v792_v49 = vpack.c.bf16 %v590_v43, %v589_v42  ;;  %v577_v52 = vld [vmem:[%s4396_s23 + $0x70] sm:$0xff] }
  0xa9   : > { %v592_v47 = vld [vmem:[%s4396_s23 + $0xe8] sm:$0xff]  ;;  %v601_v50 = vpack.c.bf16 %v576_v45, %v575_v44  ;;  %v578_v53 = vld [vmem:[%s4396_s23 + $0x78] sm:$0xff]  ;;  %v593_v54 = vld [vmem:[%s4396_s23 + $0xf0] sm:$0xff] }
  0xaa   : > { %3072 = vmatpush3.bf16.msra.mxu0 %v3558_v3  ;;  %3104 = vmatpush3.bf16.msra.mxu1 %v3558_v3  ;;  %v793_v51 = vpack.c.bf16 %v592_v47, %v591_v46  ;;  %v594_v55 = vld [vmem:[%s4396_s23 + $0xf8] sm:$0xff]  ;;  %v602_v56 = vpack.c.bf16 %v578_v53, %v577_v52  ;;  %v3565_v58 = vld [vmem:[#allocation7 + $0x28] sm:$0xff]   ;;  %v3566_v59 = vld [vmem:[#allocation7 + $0x20] sm:$0xff]   ;;  %s4724_s23 = scalar_lea.vmem [#allocation14], %s2800_s30  ;;  %s2634_s30 = scalar_lea.sflag [#allocation4], %s4390_s21 }
  0xab   : > { %3073 = vmatprep.subr.bf16.mxu0 %v3559_v10  ;;  %3105 = vmatprep.subr.bf16.mxu1 %v3559_v10  ;;  %v794_v57 = vpack.c.bf16 %v594_v55, %v593_v54  ;;  %v3567_v60 = vld [vmem:[#allocation7 + $0x18] sm:$0xff]   ;;  %v3568_v61 = vld [vmem:[#allocation7 + $0x10] sm:$0xff]   ;;  %v3569_v62 = vld [vmem:[#allocation7 + $0x8] sm:$0xff]  }
  0xac   : > { %v3570_v63 = vld [vmem:[#allocation7] sm:$0xff]   ;;  %v4446_v0 = vld [vmem:[#allocation8 + $0x38] sm:$0xff]  }
  0xad   : > { %v4453_v1 = vld [vmem:[%s4850_s2] ss:$0 sm:$0xff] }
  0xae   : > { %3074 = vmatpush3.bf16.msra.mxu0 %v3559_v10  ;;  %3106 = vmatpush3.bf16.msra.mxu1 %v3559_v10 }
  0xaf   : > { %3075 = vmatprep.subr.bf16.mxu0 %v3560_v11  ;;  %3107 = vmatprep.subr.bf16.mxu1 %v3560_v11 }
  0xb2   : > { %3076 = vmatpush3.bf16.msra.mxu0 %v3560_v11  ;;  %3108 = vmatpush3.bf16.msra.mxu1 %v3560_v11 }
  0xb3   : > { %3077 = vmatprep.subr.bf16.mxu0 %v3561_v12  ;;  %3109 = vmatprep.subr.bf16.mxu1 %v3561_v12 }
  0xb6   : > { %3078 = vmatpush3.bf16.msra.mxu0 %v3561_v12  ;;  %3110 = vmatpush3.bf16.msra.mxu1 %v3561_v12 }
  0xb7   : > { %3079 = vmatprep.subr.bf16.mxu0 %v3562_v13  ;;  %3111 = vmatprep.subr.bf16.mxu1 %v3562_v13 }
  0xba   : > { %3080 = vmatpush3.bf16.msra.mxu0 %v3562_v13  ;;  %3112 = vmatpush3.bf16.msra.mxu1 %v3562_v13 }
  0xbb   : > { %3129 = vmatprep.subr.bf16.mxu0 %v3563_v22  ;;  %3161 = vmatprep.subr.bf16.mxu1 %v3563_v22 }
  0xbd   : > { %3082 = vmatmul.mubr.bf16.vlgmr.msra.gmra.mxu0 %v596_v23  ;;  %3114 = vmatmul.mubr.bf16.vlgmr.msra.gmra.mxu1 %v788_v24 }
  0xbe   : > { %3085 = vmatprep.mubr.bf16.mxu0 %v597_v25  ;;  %3117 = vmatprep.mubr.bf16.mxu1 %v789_v26 }
  0xbf   : > { %3130 = vmatpush3.bf16.msra.mxu0 %v3563_v22  ;;  %3162 = vmatpush3.bf16.msra.mxu1 %v3563_v22 }
  0xc0   : > { %3131 = vmatprep.subr.bf16.mxu0 %v3564_v27  ;;  %3163 = vmatprep.subr.bf16.mxu1 %v3564_v27 }
  0xc3   : > { %3132 = vmatpush3.bf16.msra.mxu0 %v3564_v27  ;;  %3164 = vmatpush3.bf16.msra.mxu1 %v3564_v27 }
  0xc4   : > { %3133 = vmatprep.subr.bf16.mxu0 %v3565_v58  ;;  %3165 = vmatprep.subr.bf16.mxu1 %v3565_v58 }
  0xc5   : > { %3086 = vmatmul.mubr.bf16.gmra.mxu0 %v598_v36  ;;  %3118 = vmatmul.mubr.bf16.gmra.mxu1 %v790_v37 }
  0xc6   : > { %3089 = vmatprep.mubr.bf16.mxu0 %v599_v38  ;;  %3121 = vmatprep.mubr.bf16.mxu1 %v791_v39 }
  0xc7   : > { %3134 = vmatpush3.bf16.msra.mxu0 %v3565_v58  ;;  %3166 = vmatpush3.bf16.msra.mxu1 %v3565_v58 }
  0xc8   : > { %3135 = vmatprep.subr.bf16.mxu0 %v3566_v59  ;;  %3167 = vmatprep.subr.bf16.mxu1 %v3566_v59 }
  0xcb   : > { %3136 = vmatpush3.bf16.msra.mxu0 %v3566_v59  ;;  %3168 = vmatpush3.bf16.msra.mxu1 %v3566_v59 }
  0xcc   : > { %3137 = vmatprep.subr.bf16.mxu0 %v3567_v60  ;;  %3169 = vmatprep.subr.bf16.mxu1 %v3567_v60 }
  0xcd   : > { %3090 = vmatmul.mubr.bf16.gmra.mxu0 %v600_v48  ;;  %3122 = vmatmul.mubr.bf16.gmra.mxu1 %v792_v49 }
  0xce   : > { %3093 = vmatprep.mubr.bf16.mxu0 %v601_v50  ;;  %3125 = vmatprep.mubr.bf16.mxu1 %v793_v51 }
  0xcf   : > { %3138 = vmatpush3.bf16.msra.mxu0 %v3567_v60  ;;  %3170 = vmatpush3.bf16.msra.mxu1 %v3567_v60 }
  0xd0   : > { %3139 = vmatprep.subr.bf16.mxu0 %v3568_v61  ;;  %3171 = vmatprep.subr.bf16.mxu1 %v3568_v61 }
  0xd3   : > { %3140 = vmatpush3.bf16.msra.mxu0 %v3568_v61  ;;  %3172 = vmatpush3.bf16.msra.mxu1 %v3568_v61 }
  0xd4   : > { %3141 = vmatprep.subr.bf16.mxu0 %v3569_v62  ;;  %3173 = vmatprep.subr.bf16.mxu1 %v3569_v62 }
  0xd5   : > { %3094 = vmatmul.mubr.bf16.gmra.mxu0 %v602_v56  ;;  %3126 = vmatmul.mubr.bf16.gmra.mxu1 %v794_v57 }
  0xd7   : > { %3142 = vmatpush3.bf16.msra.mxu0 %v3569_v62  ;;  %3174 = vmatpush3.bf16.msra.mxu1 %v3569_v62 }
  0xd8   : > { %3143 = vmatprep.subr.bf16.mxu0 %v3570_v63  ;;  %3175 = vmatprep.subr.bf16.mxu1 %v3570_v63 }
  0xdb   : > { %3144 = vmatpush3.bf16.msra.mxu0 %v3570_v63  ;;  %3176 = vmatpush3.bf16.msra.mxu1 %v3570_v63  ;;  %v3572_v63 = vld [vmem:[#allocation8 + $0x30] sm:$0xff]  }
  0xdc   : > { %3193 = vmatprep.subr.bf16.mxu0 %v4446_v0  ;;  %3225 = vmatprep.subr.bf16.mxu1 %v4446_v0 }
 0x17d   : > { %v3083_v2 = vpop.f32.mrf.mxu0  ;;  %v3115_v3 = vpop.f32.mrf.mxu1 }
 0x17e   : > { %v717_v4 = vadd.f32 %v3083_v2, %v4453_v1  ;;  %v838_v15 = vadd.f32 %v3115_v3, %v4453_v1 }
 0x17f   : > { %v708_v5 = vpop.f32.mrf.mxu0  ;;  %v829_v6 = vpop.f32.mrf.mxu1 }
 0x180   : > { %v709_v7 = vadd.f32 %v4453_v1, %v708_v5  ;;  %v830_v8 = vadd.f32 %v4453_v1, %v829_v6  ;;  %3603 = vtanh.f32 %v717_v4 }
 0x181   : > { %v3084_v9 = vpop.f32.mrf.mxu0  ;;  %v3116_v10 = vpop.f32.mrf.mxu1 }
 0x182   : > { %3605 = vtanh.f32 %v709_v7  ;;  %v720_v11 = vadd.f32 %v3084_v9, %v4453_v1  ;;  %v841_v12 = vadd.f32 %v3116_v10, %v4453_v1 }
 0x183   : > { %3607 = vtanh.f32 %v830_v8  ;;  %v711_v13 = vpop.f32.mrf.mxu0  ;;  %v832_v14 = vpop.f32.mrf.mxu1 }
 0x184   : > { %3609 = vtanh.f32 %v720_v11  ;;  %v712_v16 = vadd.f32 %v4453_v1, %v711_v13  ;;  %v833_v17 = vadd.f32 %v4453_v1, %v832_v14 }
 0x185   : > { %3611 = vtanh.f32 %v841_v12  ;;  %v3087_v18 = vpop.f32.mrf.mxu0  ;;  %v3119_v19 = vpop.f32.mrf.mxu1 }
 0x186   : > { %3613 = vtanh.f32 %v712_v16  ;;  %v733_v20 = vadd.f32 %v3087_v18, %v4453_v1  ;;  %v854_v31 = vadd.f32 %v3119_v19, %v4453_v1 }
 0x187   : > { %3615 = vtanh.f32 %v833_v17  ;;  %v724_v21 = vpop.f32.mrf.mxu0  ;;  %v845_v22 = vpop.f32.mrf.mxu1 }
 0x188   : > { %3617 = vtanh.f32 %v838_v15  ;;  %v725_v23 = vadd.f32 %v4453_v1, %v724_v21  ;;  %v846_v24 = vadd.f32 %v4453_v1, %v845_v22 }
 0x189   : > { %3619 = vtanh.f32 %v733_v20  ;;  %v3088_v25 = vpop.f32.mrf.mxu0  ;;  %v3120_v26 = vpop.f32.mrf.mxu1 }
 0x18a   : > { %3621 = vtanh.f32 %v725_v23  ;;  %v736_v27 = vadd.f32 %v3088_v25, %v4453_v1  ;;  %v857_v28 = vadd.f32 %v3120_v26, %v4453_v1 }
 0x18b   : > { %3623 = vtanh.f32 %v846_v24  ;;  %v727_v29 = vpop.f32.mrf.mxu0  ;;  %v848_v30 = vpop.f32.mrf.mxu1 }
 0x18c   : > { %3625 = vtanh.f32 %v736_v27  ;;  %v728_v32 = vadd.f32 %v4453_v1, %v727_v29  ;;  %v849_v33 = vadd.f32 %v4453_v1, %v848_v30 }
 0x18d   : > { %3627 = vtanh.f32 %v857_v28  ;;  %v3091_v34 = vpop.f32.mrf.mxu0  ;;  %v3123_v35 = vpop.f32.mrf.mxu1 }
 0x18e   : > { %v3604_v36 = vpop.eup %3603  ;;  %3629 = vtanh.f32 %v728_v32  ;;  %v749_v37 = vadd.f32 %v3091_v34, %v4453_v1  ;;  %v870_v51 = vadd.f32 %v3123_v35, %v4453_v1 }
 0x18f   : > { %v3606_v38 = vpop.eup %3605  ;;  %3631 = vtanh.f32 %v849_v33  ;;  %v740_v39 = vpop.f32.mrf.mxu0 }
 0x190   : > { %v861_v40 = vpop.f32.mrf.mxu1  ;;  %v3608_v41 = vpop.eup %3607  ;;  %3633 = vtanh.f32 %v854_v31  ;;  %v741_v42 = vadd.f32 %v4453_v1, %v740_v39 }
 0x191   : > { %v862_v43 = vadd.f32 %v4453_v1, %v861_v40  ;;  %v3610_v44 = vpop.eup %3609  ;;  %3635 = vtanh.f32 %v749_v37  ;;  %v3092_v45 = vpop.f32.mrf.mxu0 }
 0x192   : > { %v3124_v46 = vpop.f32.mrf.mxu1  ;;  %v3612_v47 = vpop.eup %3611  ;;  %3637 = vtanh.f32 %v741_v42  ;;  %v752_v48 = vadd.f32 %v3092_v45, %v4453_v1  ;;  %v909_v62 = vpack.c.bf16 %v3610_v44, %v3604_v36 }
 0x193   : > { %v873_v49 = vadd.f32 %v3124_v46, %v4453_v1  ;;  %v3614_v50 = vpop.eup %3613  ;;  %3639 = vtanh.f32 %v862_v43  ;;  %v743_v52 = vpop.f32.mrf.mxu0 }
 0x194   : > { %v864_v53 = vpop.f32.mrf.mxu1  ;;  %v3616_v54 = vpop.eup %3615  ;;  %3641 = vtanh.f32 %v752_v48  ;;  %v744_v55 = vadd.f32 %v4453_v1, %v743_v52  ;;  %v908_v57 = vpack.c.bf16 %v3614_v50, %v3606_v38  ;;  %v3574_v52 = vld [vmem:[#allocation8 + $0x20] sm:$0xff]  }
 0x195   : > { %v865_v56 = vadd.f32 %v4453_v1, %v864_v53  ;;  %v3618_v58 = vpop.eup %3617  ;;  %3643 = vtanh.f32 %v873_v49  ;;  %v3095_v59 = vpop.f32.mrf.mxu0  ;;  %v1100_v61 = vpack.c.bf16 %v3616_v54, %v3608_v41  ;;  %v3575_v53 = vld [vmem:[#allocation8 + $0x18] sm:$0xff]   ;;  %v3576_v54 = vld [vmem:[#allocation8 + $0x10] sm:$0xff]  }
 0x196   : > { %v3127_v60 = vpop.f32.mrf.mxu1  ;;  %v3620_v2 = vpop.eup %3619  ;;  %3645 = vtanh.f32 %v744_v55  ;;  %v765_v3 = vadd.f32 %v3095_v59, %v4453_v1  ;;  %3145 = vmatprep.mubr.bf16.mxu0 %v908_v57  ;;  %v1101_v4 = vpack.c.bf16 %v3612_v47, %v3618_v58  ;;  %v3577_v55 = vld [vmem:[#allocation8 + $0x8] sm:$0xff]   ;;  %v4489_v57 = vld [vmem:[#allocation10 + $0x38] sm:$0xff]   ;;  %v4496_v58 = vld [vmem:[%s4852_s4] ss:$0 sm:$0xff] }
 0x197   : > { %v3622_v5 = vpop.eup %3621  ;;  %3647 = vtanh.f32 %v865_v56  ;;  %3177 = vmatprep.mubr.bf16.mxu1 %v1100_v61  ;;  %v756_v6 = vpop.f32.mrf.mxu0  ;;  %3146 = vmatmul.mubr.bf16.vlgmr.msra.gmra.mxu0 %v909_v62  ;;  %v886_v18 = vadd.f32 %v3127_v60, %v4453_v1  ;;  %v3578_v56 = vld [vmem:[#allocation8] sm:$0xff]  }
 0x198   : > { %v877_v7 = vpop.f32.mrf.mxu1  ;;  %v3624_v8 = vpop.eup %3623  ;;  %3649 = vtanh.f32 %v870_v51  ;;  %v757_v9 = vadd.f32 %v4453_v1, %v756_v6  ;;  %3178 = vmatmul.mubr.bf16.vlgmr.msra.gmra.mxu1 %v1101_v4  ;;  %3194 = vmatpush3.bf16.msra.mxu0 %v4446_v0  ;;  %v3573_v51 = vld [vmem:[#allocation8 + $0x28] sm:$0xff]  }
 0x199   : > { %v878_v10 = vadd.f32 %v4453_v1, %v877_v7  ;;  %v3626_v11 = vpop.eup %3625  ;;  %3651 = vtanh.f32 %v765_v3  ;;  %v3096_v12 = vpop.f32.mrf.mxu0  ;;  %3226 = vmatpush3.bf16.msra.mxu1 %v4446_v0  ;;  %3195 = vmatprep.subr.bf16.mxu0 %v3572_v63 }
 0x19a   : > { %v3128_v13 = vpop.f32.mrf.mxu1  ;;  %v3628_v14 = vpop.eup %3627  ;;  %3653 = vtanh.f32 %v757_v9  ;;  %v768_v15 = vadd.f32 %v3096_v12, %v4453_v1  ;;  %3227 = vmatprep.subr.bf16.mxu1 %v3572_v63  ;;  %v911_v26 = vpack.c.bf16 %v3626_v11, %v3620_v2 }
 0x19b   : > { %v889_v16 = vadd.f32 %v3128_v13, %v4453_v1  ;;  %v3630_v17 = vpop.eup %3629  ;;  %3655 = vtanh.f32 %v878_v10  ;;  %v759_v19 = vpop.f32.mrf.mxu0 }
 0x19c   : > { %v880_v20 = vpop.f32.mrf.mxu1  ;;  %v3632_v21 = vpop.eup %3631  ;;  %3657 = vtanh.f32 %v768_v15  ;;  %v760_v22 = vadd.f32 %v4453_v1, %v759_v19  ;;  %v910_v23 = vpack.c.bf16 %v3630_v17, %v3622_v5  ;;  %3196 = vmatpush3.bf16.msra.mxu0 %v3572_v63 }
 0x19d   : > { %v881_v0 = vadd.f32 %v4453_v1, %v880_v20  ;;  %v3634_v24 = vpop.eup %3633  ;;  %3659 = vtanh.f32 %v889_v16  ;;  %v1102_v25 = vpack.c.bf16 %v3632_v21, %v3624_v8  ;;  %3228 = vmatpush3.bf16.msra.mxu1 %v3572_v63  ;;  %3197 = vmatprep.subr.bf16.mxu0 %v3573_v51 }
 0x19e   : > { %v3636_v27 = vpop.eup %3635  ;;  %3661 = vtanh.f32 %v760_v22  ;;  %3149 = vmatprep.mubr.bf16.mxu0 %v910_v23  ;;  %v1103_v28 = vpack.c.bf16 %v3628_v14, %v3634_v24  ;;  %3229 = vmatprep.subr.bf16.mxu1 %v3573_v51 }
 0x19f   : > { %v3638_v29 = vpop.eup %3637  ;;  %3663 = vtanh.f32 %v881_v0  ;;  %3181 = vmatprep.mubr.bf16.mxu1 %v1102_v25  ;;  %3150 = vmatmul.mubr.bf16.gmra.mxu0 %v911_v26 }
 0x1a0   : > { %v3640_v30 = vpop.eup %3639  ;;  %3665 = vtanh.f32 %v886_v18  ;;  %3182 = vmatmul.mubr.bf16.gmra.mxu1 %v1103_v28  ;;  %3198 = vmatpush3.bf16.msra.mxu0 %v3573_v51 }
 0x1a1   : > { %v3642_v31 = vpop.eup %3641  ;;  %3230 = vmatpush3.bf16.msra.mxu1 %v3573_v51  ;;  %3199 = vmatprep.subr.bf16.mxu0 %v3574_v52 }
 0x1a2   : > { %v3644_v1 = vpop.eup %3643  ;;  %v913_v37 = vpack.c.bf16 %v3642_v31, %v3636_v27  ;;  %3231 = vmatprep.subr.bf16.mxu1 %v3574_v52 }
 0x1a3   : > { %v3646_v32 = vpop.eup %3645 }
 0x1a4   : > { %v3648_v33 = vpop.eup %3647  ;;  %v912_v34 = vpack.c.bf16 %v3646_v32, %v3638_v29  ;;  %3200 = vmatpush3.bf16.msra.mxu0 %v3574_v52 }
 0x1a5   : > { %v3650_v35 = vpop.eup %3649  ;;  %v1104_v36 = vpack.c.bf16 %v3648_v33, %v3640_v30  ;;  %3232 = vmatpush3.bf16.msra.mxu1 %v3574_v52  ;;  %3201 = vmatprep.subr.bf16.mxu0 %v3575_v53 }
 0x1a6   : > { %v3652_v38 = vpop.eup %3651  ;;  %3153 = vmatprep.mubr.bf16.mxu0 %v912_v34  ;;  %v1105_v39 = vpack.c.bf16 %v3644_v1, %v3650_v35  ;;  %3233 = vmatprep.subr.bf16.mxu1 %v3575_v53 }
 0x1a7   : > { %v3654_v40 = vpop.eup %3653  ;;  %3185 = vmatprep.mubr.bf16.mxu1 %v1104_v36  ;;  %3154 = vmatmul.mubr.bf16.gmra.mxu0 %v913_v37 }
 0x1a8   : > { %v3656_v41 = vpop.eup %3655  ;;  %3186 = vmatmul.mubr.bf16.gmra.mxu1 %v1105_v39  ;;  %3202 = vmatpush3.bf16.msra.mxu0 %v3575_v53 }
 0x1a9   : > { %v3658_v42 = vpop.eup %3657  ;;  %3234 = vmatpush3.bf16.msra.mxu1 %v3575_v53  ;;  %3203 = vmatprep.subr.bf16.mxu0 %v3576_v54 }
 0x1aa   : > { %v3660_v43 = vpop.eup %3659  ;;  %v915_v49 = vpack.c.bf16 %v3658_v42, %v3652_v38  ;;  %3235 = vmatprep.subr.bf16.mxu1 %v3576_v54 }
 0x1ab   : > { %v3662_v44 = vpop.eup %3661 }
 0x1ac   : > { %v3664_v45 = vpop.eup %3663  ;;  %v914_v46 = vpack.c.bf16 %v3662_v44, %v3654_v40  ;;  %3204 = vmatpush3.bf16.msra.mxu0 %v3576_v54 }
 0x1ad   : > { %v3666_v47 = vpop.eup %3665  ;;  %v1106_v48 = vpack.c.bf16 %v3664_v45, %v3656_v41  ;;  %3236 = vmatpush3.bf16.msra.mxu1 %v3576_v54  ;;  %3205 = vmatprep.subr.bf16.mxu0 %v3577_v55 }
 0x1ae   : > { %3157 = vmatprep.mubr.bf16.mxu0 %v914_v46  ;;  %v1107_v50 = vpack.c.bf16 %v3660_v43, %v3666_v47  ;;  %3237 = vmatprep.subr.bf16.mxu1 %v3577_v55 }
 0x1af   : > { %3189 = vmatprep.mubr.bf16.mxu1 %v1106_v48  ;;  %3158 = vmatmul.mubr.bf16.gmra.mxu0 %v915_v49 }
 0x1b0   : > { %3190 = vmatmul.mubr.bf16.gmra.mxu1 %v1107_v50  ;;  %3206 = vmatpush3.bf16.msra.mxu0 %v3577_v55 }
 0x1b1   : > { %3238 = vmatpush3.bf16.msra.mxu1 %v3577_v55  ;;  %3207 = vmatprep.subr.bf16.mxu0 %v3578_v56  ;;  %v3580_v55 = vld [vmem:[#allocation10 + $0x30] sm:$0xff]  }
 0x1b2   : > { %3239 = vmatprep.subr.bf16.mxu1 %v3578_v56 }
 0x1b4   : > { %3208 = vmatpush3.bf16.msra.mxu0 %v3578_v56 }
 0x1b5   : > { %3240 = vmatpush3.bf16.msra.mxu1 %v3578_v56  ;;  %3257 = vmatprep.subr.bf16.mxu0 %v4489_v57 }
 0x1b6   : > { %3289 = vmatprep.subr.bf16.mxu1 %v4489_v57 }
 0x257   : > { %v3147_v59 = vpop.f32.mrf.mxu0 }
 0x258   : > { %v1030_v60 = vadd.f32 %v3147_v59, %v4496_v58  ;;  %v3179_v61 = vpop.f32.mrf.mxu1 }
 0x259   : > { %v1021_v62 = vpop.f32.mrf.mxu0  ;;  %v1151_v9 = vadd.f32 %v3179_v61, %v4496_v58 }
 0x25a   : > { %v1022_v63 = vadd.f32 %v4496_v58, %v1021_v62  ;;  %v1142_v2 = vpop.f32.mrf.mxu1  ;;  %3667 = vtanh.f32 %v1030_v60 }
 0x25b   : > { %v1143_v3 = vadd.f32 %v4496_v58, %v1142_v2  ;;  %v3148_v4 = vpop.f32.mrf.mxu0 }
 0x25c   : > { %3669 = vtanh.f32 %v1022_v63  ;;  %v1033_v5 = vadd.f32 %v3148_v4, %v4496_v58  ;;  %v3180_v6 = vpop.f32.mrf.mxu1 }
 0x25d   : > { %3671 = vtanh.f32 %v1143_v3  ;;  %v1154_v7 = vadd.f32 %v3180_v6, %v4496_v58  ;;  %v1024_v8 = vpop.f32.mrf.mxu0 }
 0x25e   : > { %3673 = vtanh.f32 %v1033_v5  ;;  %v1025_v10 = vadd.f32 %v4496_v58, %v1024_v8  ;;  %v1145_v11 = vpop.f32.mrf.mxu1  ;;  %v3581_v8 = vld [vmem:[#allocation10 + $0x28] sm:$0xff]  }
 0x25f   : > { %3675 = vtanh.f32 %v1154_v7  ;;  %v1146_v12 = vadd.f32 %v4496_v58, %v1145_v11  ;;  %v3151_v13 = vpop.f32.mrf.mxu0 }
 0x260   : > { %3677 = vtanh.f32 %v1025_v10  ;;  %v1046_v14 = vadd.f32 %v3151_v13, %v4496_v58  ;;  %v3183_v15 = vpop.f32.mrf.mxu1 }
 0x261   : > { %3679 = vtanh.f32 %v1146_v12  ;;  %v1037_v16 = vpop.f32.mrf.mxu0  ;;  %v1167_v24 = vadd.f32 %v3183_v15, %v4496_v58 }
 0x262   : > { %3681 = vtanh.f32 %v1151_v9  ;;  %v1038_v17 = vadd.f32 %v4496_v58, %v1037_v16  ;;  %v1158_v18 = vpop.f32.mrf.mxu1 }
 0x263   : > { %3683 = vtanh.f32 %v1046_v14  ;;  %v1159_v19 = vadd.f32 %v4496_v58, %v1158_v18  ;;  %v3152_v20 = vpop.f32.mrf.mxu0 }
 0x264   : > { %3685 = vtanh.f32 %v1038_v17  ;;  %v1049_v21 = vadd.f32 %v3152_v20, %v4496_v58  ;;  %v3184_v22 = vpop.f32.mrf.mxu1 }
 0x265   : > { %3687 = vtanh.f32 %v1159_v19  ;;  %v1170_v0 = vadd.f32 %v3184_v22, %v4496_v58  ;;  %v1040_v23 = vpop.f32.mrf.mxu0 }
 0x266   : > { %3689 = vtanh.f32 %v1049_v21  ;;  %v1041_v25 = vadd.f32 %v4496_v58, %v1040_v23  ;;  %v1161_v26 = vpop.f32.mrf.mxu1 }
 0x267   : > { %3691 = vtanh.f32 %v1170_v0  ;;  %v1162_v27 = vadd.f32 %v4496_v58, %v1161_v26  ;;  %v3155_v28 = vpop.f32.mrf.mxu0  ;;  %v3668_v29 = vpop.eup %3667  ;;  %v3582_v0 = vld [vmem:[#allocation10 + $0x20] sm:$0xff]  }
 0x268   : > { %3693 = vtanh.f32 %v1041_v25  ;;  %v1062_v30 = vadd.f32 %v3155_v28, %v4496_v58  ;;  %v3187_v31 = vpop.f32.mrf.mxu1 }
 0x269   : > { %v3670_v1 = vpop.eup %3669  ;;  %3695 = vtanh.f32 %v1162_v27  ;;  %v1053_v32 = vpop.f32.mrf.mxu0  ;;  %v1183_v46 = vadd.f32 %v3187_v31, %v4496_v58 }
 0x26a   : > { %v3672_v33 = vpop.eup %3671  ;;  %3697 = vtanh.f32 %v1167_v24  ;;  %v1054_v34 = vadd.f32 %v4496_v58, %v1053_v32  ;;  %v1174_v35 = vpop.f32.mrf.mxu1 }
 0x26b   : > { %v3674_v36 = vpop.eup %3673  ;;  %3699 = vtanh.f32 %v1062_v30  ;;  %v1175_v37 = vadd.f32 %v4496_v58, %v1174_v35  ;;  %v3156_v38 = vpop.f32.mrf.mxu0 }
 0x26c   : > { %v3676_v39 = vpop.eup %3675  ;;  %3701 = vtanh.f32 %v1054_v34  ;;  %v1065_v40 = vadd.f32 %v3156_v38, %v4496_v58  ;;  %v3188_v41 = vpop.f32.mrf.mxu1  ;;  %v1222_v54 = vpack.c.bf16 %v3674_v36, %v3668_v29 }
 0x26d   : > { %v3678_v42 = vpop.eup %3677  ;;  %3703 = vtanh.f32 %v1175_v37  ;;  %v1186_v43 = vadd.f32 %v3188_v41, %v4496_v58  ;;  %v1056_v44 = vpop.f32.mrf.mxu0 }
 0x26e   : > { %v3680_v45 = vpop.eup %3679  ;;  %3705 = vtanh.f32 %v1065_v40  ;;  %v1057_v47 = vadd.f32 %v4496_v58, %v1056_v44  ;;  %v1177_v48 = vpop.f32.mrf.mxu1  ;;  %v1221_v49 = vpack.c.bf16 %v3678_v42, %v3670_v1 }
 0x26f   : > { %v3682_v50 = vpop.eup %3681  ;;  %3707 = vtanh.f32 %v1186_v43  ;;  %v1178_v51 = vadd.f32 %v4496_v58, %v1177_v48  ;;  %v3159_v52 = vpop.f32.mrf.mxu0  ;;  %v1445_v53 = vpack.c.bf16 %v3680_v45, %v3672_v33  ;;  %v3585_v48 = vld [vmem:[#allocation10 + $0x8] sm:$0xff]  }
 0x270   : > { %v3684_v56 = vpop.eup %3683  ;;  %3709 = vtanh.f32 %v1057_v47  ;;  %v1078_v59 = vadd.f32 %v3159_v52, %v4496_v58  ;;  %v3191_v60 = vpop.f32.mrf.mxu1  ;;  %3209 = vmatprep.mubr.bf16.mxu0 %v1221_v49  ;;  %v1446_v61 = vpack.c.bf16 %v3676_v39, %v3682_v50  ;;  %v3584_v47 = vld [vmem:[#allocation10 + $0x10] sm:$0xff]   ;;  %v3586_v49 = vld [vmem:[#allocation10] sm:$0xff]   ;;  %v4532_v50 = vld [vmem:[#allocation11 + $0x38] sm:$0xff]  }
 0x271   : > { %v3686_v62 = vpop.eup %3685  ;;  %3711 = vtanh.f32 %v1178_v51  ;;  %3241 = vmatprep.mubr.bf16.mxu1 %v1445_v53  ;;  %v1069_v63 = vpop.f32.mrf.mxu0  ;;  %3210 = vmatmul.mubr.bf16.vlgmr.msra.gmra.mxu0 %v1222_v54  ;;  %v1199_v16 = vadd.f32 %v3191_v60, %v4496_v58  ;;  %v4539_v51 = vld [vmem:[%s4854_s6] ss:$0 sm:$0xff] }
 0x272   : > { %v3688_v2 = vpop.eup %3687  ;;  %3713 = vtanh.f32 %v1183_v46  ;;  %v1070_v3 = vadd.f32 %v4496_v58, %v1069_v63  ;;  %v1190_v4 = vpop.f32.mrf.mxu1  ;;  %3242 = vmatmul.mubr.bf16.vlgmr.msra.gmra.mxu1 %v1446_v61  ;;  %3258 = vmatpush3.bf16.msra.mxu0 %v4489_v57 }
 0x273   : > { %v3690_v5 = vpop.eup %3689  ;;  %3715 = vtanh.f32 %v1078_v59  ;;  %v1191_v6 = vadd.f32 %v4496_v58, %v1190_v4  ;;  %v3160_v7 = vpop.f32.mrf.mxu0  ;;  %3290 = vmatpush3.bf16.msra.mxu1 %v4489_v57  ;;  %3259 = vmatprep.subr.bf16.mxu0 %v3580_v55 }
 0x274   : > { %v3692_v9 = vpop.eup %3691  ;;  %3717 = vtanh.f32 %v1070_v3  ;;  %v1081_v10 = vadd.f32 %v3160_v7, %v4496_v58  ;;  %v3192_v11 = vpop.f32.mrf.mxu1  ;;  %3291 = vmatprep.subr.bf16.mxu1 %v3580_v55  ;;  %v1224_v22 = vpack.c.bf16 %v3690_v5, %v3684_v56 }
 0x275   : > { %v3694_v12 = vpop.eup %3693  ;;  %3719 = vtanh.f32 %v1191_v6  ;;  %v1202_v13 = vadd.f32 %v3192_v11, %v4496_v58  ;;  %v1072_v14 = vpop.f32.mrf.mxu0 }
 0x276   : > { %v3696_v15 = vpop.eup %3695  ;;  %3721 = vtanh.f32 %v1081_v10  ;;  %v1073_v17 = vadd.f32 %v4496_v58, %v1072_v14  ;;  %v1193_v57 = vpop.f32.mrf.mxu1  ;;  %v1223_v18 = vpack.c.bf16 %v3694_v12, %v3686_v62  ;;  %3260 = vmatpush3.bf16.msra.mxu0 %v3580_v55 }
 0x277   : > { %v3698_v19 = vpop.eup %3697  ;;  %3723 = vtanh.f32 %v1202_v13  ;;  %v1194_v20 = vadd.f32 %v4496_v58, %v1193_v57  ;;  %v1447_v21 = vpack.c.bf16 %v3696_v15, %v3688_v2  ;;  %3292 = vmatpush3.bf16.msra.mxu1 %v3580_v55  ;;  %3261 = vmatprep.subr.bf16.mxu0 %v3581_v8  ;;  %v3583_v58 = vld [vmem:[#allocation10 + $0x18] sm:$0xff]  }
 0x278   : > { %v3700_v23 = vpop.eup %3699  ;;  %3725 = vtanh.f32 %v1073_v17  ;;  %3213 = vmatprep.mubr.bf16.mxu0 %v1223_v18  ;;  %v1448_v24 = vpack.c.bf16 %v3692_v9, %v3698_v19  ;;  %3293 = vmatprep.subr.bf16.mxu1 %v3581_v8 }
 0x279   : > { %v3702_v25 = vpop.eup %3701  ;;  %3727 = vtanh.f32 %v1194_v20  ;;  %3245 = vmatprep.mubr.bf16.mxu1 %v1447_v21  ;;  %3214 = vmatmul.mubr.bf16.gmra.mxu0 %v1224_v22 }
 0x27a   : > { %v3704_v26 = vpop.eup %3703  ;;  %3729 = vtanh.f32 %v1199_v16  ;;  %3246 = vmatmul.mubr.bf16.gmra.mxu1 %v1448_v24  ;;  %3262 = vmatpush3.bf16.msra.mxu0 %v3581_v8 }
 0x27b   : > { %v3706_v27 = vpop.eup %3705  ;;  %3294 = vmatpush3.bf16.msra.mxu1 %v3581_v8  ;;  %3263 = vmatprep.subr.bf16.mxu0 %v3582_v0 }
 0x27c   : > { %v3708_v28 = vpop.eup %3707  ;;  %3295 = vmatprep.subr.bf16.mxu1 %v3582_v0  ;;  %v1226_v33 = vpack.c.bf16 %v3706_v27, %v3700_v23 }
 0x27d   : > { %v3710_v29 = vpop.eup %3709 }
 0x27e   : > { %v3712_v30 = vpop.eup %3711  ;;  %v1225_v31 = vpack.c.bf16 %v3710_v29, %v3702_v25  ;;  %3264 = vmatpush3.bf16.msra.mxu0 %v3582_v0 }
 0x27f   : > { %v3714_v1 = vpop.eup %3713  ;;  %v1449_v32 = vpack.c.bf16 %v3712_v30, %v3704_v26  ;;  %3296 = vmatpush3.bf16.msra.mxu1 %v3582_v0  ;;  %3265 = vmatprep.subr.bf16.mxu0 %v3583_v58 }
 0x280   : > { %v3716_v34 = vpop.eup %3715  ;;  %3217 = vmatprep.mubr.bf16.mxu0 %v1225_v31  ;;  %v1450_v35 = vpack.c.bf16 %v3708_v28, %v3714_v1  ;;  %3297 = vmatprep.subr.bf16.mxu1 %v3583_v58 }
 0x281   : > { %v3718_v36 = vpop.eup %3717  ;;  %3249 = vmatprep.mubr.bf16.mxu1 %v1449_v32  ;;  %3218 = vmatmul.mubr.bf16.gmra.mxu0 %v1226_v33 }
 0x282   : > { %v3720_v37 = vpop.eup %3719  ;;  %3250 = vmatmul.mubr.bf16.gmra.mxu1 %v1450_v35  ;;  %3266 = vmatpush3.bf16.msra.mxu0 %v3583_v58 }
 0x283   : > { %v3722_v38 = vpop.eup %3721  ;;  %3298 = vmatpush3.bf16.msra.mxu1 %v3583_v58  ;;  %3267 = vmatprep.subr.bf16.mxu0 %v3584_v47 }
 0x284   : > { %v3724_v39 = vpop.eup %3723  ;;  %v1228_v45 = vpack.c.bf16 %v3722_v38, %v3716_v34  ;;  %3299 = vmatprep.subr.bf16.mxu1 %v3584_v47  ;;  %v3588_v34 = vld [vmem:[#allocation11 + $0x30] sm:$0xff]  }
 0x285   : > { %v3726_v40 = vpop.eup %3725 }
 0x286   : > { %v3728_v41 = vpop.eup %3727  ;;  %v1227_v42 = vpack.c.bf16 %v3726_v40, %v3718_v36  ;;  %3268 = vmatpush3.bf16.msra.mxu0 %v3584_v47 }
 0x287   : > { %v3730_v43 = vpop.eup %3729  ;;  %v1451_v44 = vpack.c.bf16 %v3728_v41, %v3720_v37  ;;  %3300 = vmatpush3.bf16.msra.mxu1 %v3584_v47  ;;  %3269 = vmatprep.subr.bf16.mxu0 %v3585_v48 }
 0x288   : > { %3221 = vmatprep.mubr.bf16.mxu0 %v1227_v42  ;;  %v1452_v46 = vpack.c.bf16 %v3724_v39, %v3730_v43  ;;  %3301 = vmatprep.subr.bf16.mxu1 %v3585_v48 }
 0x289   : > { %3253 = vmatprep.mubr.bf16.mxu1 %v1451_v44  ;;  %3222 = vmatmul.mubr.bf16.gmra.mxu0 %v1228_v45 }
 0x28a   : > { %3254 = vmatmul.mubr.bf16.gmra.mxu1 %v1452_v46  ;;  %3270 = vmatpush3.bf16.msra.mxu0 %v3585_v48 }
 0x28b   : > { %3302 = vmatpush3.bf16.msra.mxu1 %v3585_v48  ;;  %3271 = vmatprep.subr.bf16.mxu0 %v3586_v49 }
 0x28c   : > { %3303 = vmatprep.subr.bf16.mxu1 %v3586_v49 }
 0x28e   : > { %3272 = vmatpush3.bf16.msra.mxu0 %v3586_v49 }
 0x28f   : > { %3304 = vmatpush3.bf16.msra.mxu1 %v3586_v49  ;;  %3321 = vmatprep.subr.bf16.mxu0 %v4532_v50 }
 0x290   : > { %3353 = vmatprep.subr.bf16.mxu1 %v4532_v50 }
 0x331   : > { %v3211_v52 = vpop.f32.mrf.mxu0 }
 0x332   : > { %v3243_v53 = vpop.f32.mrf.mxu1  ;;  %v1343_v54 = vadd.f32 %v3211_v52, %v4539_v51 }
 0x333   : > { %v1334_v55 = vpop.f32.mrf.mxu0  ;;  %v1496_v56 = vadd.f32 %v3243_v53, %v4539_v51 }
 0x334   : > { %v1335_v59 = vadd.f32 %v4539_v51, %v1334_v55  ;;  %v1487_v60 = vpop.f32.mrf.mxu1  ;;  %vm1399_vm0 = vcmp.ge.f32.partialorder %v1343_v54, 0.0  ;;  %v1415_v2 = vmul.f32 0.01, %v1343_v54 }
 0x335   : > { %v3212_v61 = vpop.f32.mrf.mxu0  ;;  %v1488_v3 = vadd.f32 %v4539_v51, %v1487_v60  ;;  %vm1552_vm1 = vcmp.ge.f32.partialorder %v1496_v56, 0.0  ;;  %v1568_v13 = vmul.f32 0.01, %v1496_v56 }
 0x336   : > { %v1346_v62 = vadd.f32 %v3212_v61, %v4539_v51  ;;  %v3244_v63 = vpop.f32.mrf.mxu1  ;;  %v1413_v6 = vmul.f32 0.01, %v1335_v59  ;;  %vm1397_vm4 = vcmp.ge.f32.partialorder %v1335_v59, 0.0  ;;  %v1431_v19 = vsel %vm1399_vm0, %v1343_v54, %v1415_v2 }
 0x337   : > { %v1499_v4 = vadd.f32 %v3244_v63, %v4539_v51  ;;  %v1337_v5 = vpop.f32.mrf.mxu0  ;;  %v1566_v16 = vmul.f32 0.01, %v1488_v3  ;;  %vm1550_vm7 = vcmp.ge.f32.partialorder %v1488_v3, 0.0  ;;  %v1584_v27 = vsel %vm1552_vm1, %v1496_v56, %v1568_v13 }
 0x338   : > { %v1416_v7 = vmul.f32 0.01, %v1346_v62  ;;  %v1338_v8 = vadd.f32 %v4539_v51, %v1337_v5  ;;  %v1490_v9 = vpop.f32.mrf.mxu1  ;;  %vm1400_vm2 = vcmp.ge.f32.partialorder %v1346_v62, 0.0  ;;  %v1429_v25 = vsel %vm1397_vm4, %v1335_v59, %v1413_v6 }
 0x339   : > { %vm1553_vm3 = vcmp.ge.f32.partialorder %v1499_v4, 0.0  ;;  %v1569_v10 = vmul.f32 0.01, %v1499_v4  ;;  %v1491_v11 = vadd.f32 %v4539_v51, %v1490_v9  ;;  %v3215_v12 = vpop.f32.mrf.mxu0  ;;  %v1582_v33 = vsel %vm1550_vm7, %v1488_v3, %v1566_v16 }
 0x33a   : > { %vm1398_vm5 = vcmp.ge.f32.partialorder %v1338_v8, 0.0  ;;  %v1414_v14 = vmul.f32 0.01, %v1338_v8  ;;  %v3247_v15 = vpop.f32.mrf.mxu1  ;;  %v4550_v57 = vadd.f32 %v3215_v12, %v4539_v51  ;;  %v1432_v20 = vsel %vm1400_vm2, %v1346_v62, %v1416_v7 }
 0x33b   : > { %vm1551_vm6 = vcmp.ge.f32.partialorder %v1491_v11, 0.0  ;;  %v1567_v17 = vmul.f32 0.01, %v1491_v11  ;;  %v1350_v18 = vpop.f32.mrf.mxu0  ;;  %v1585_v21 = vsel %vm1553_vm3, %v1499_v4, %v1569_v10  ;;  %v1599_v31 = vpack.c.bf16 %v1432_v20, %v1431_v19 }
 0x33c   : > { %v1503_v22 = vpop.f32.mrf.mxu1  ;;  %v1351_v0 = vadd.f32 %v4539_v51, %v1350_v18  ;;  %v1430_v26 = vsel %vm1398_vm5, %v1338_v8, %v1414_v14  ;;  %v1791_v1 = vpack.c.bf16 %v1585_v21, %v1584_v27  ;;  %vm1403_vm8 = vcmp.ge.f32.partialorder %v4550_v57, 0.0 }
 0x33d   : > { %v1504_v23 = vadd.f32 %v4539_v51, %v1503_v22  ;;  %v3216_v24 = vpop.f32.mrf.mxu0  ;;  %v1598_v29 = vpack.c.bf16 %v1430_v26, %v1429_v25  ;;  %v1583_v30 = vsel %vm1551_vm6, %v1491_v11, %v1567_v17  ;;  %v4565_v35 = vadd.f32 %v3247_v15, %v4539_v51 }
 0x33e   : > { %v1362_v58 = vadd.f32 %v3216_v24, %v4539_v51  ;;  %v3248_v28 = vpop.f32.mrf.mxu1  ;;  %vm1401_vm9 = vcmp.ge.f32.partialorder %v1351_v0, 0.0  ;;  %v1417_v36 = vmul.f32 0.01, %v1351_v0  ;;  %v1790_v42 = vpack.c.bf16 %v1583_v30, %v1582_v33 }
 0x33f   : > { %v1353_v32 = vpop.f32.mrf.mxu0  ;;  %3273 = vmatprep.mubr.bf16.mxu0 %v1598_v29  ;;  %v1570_v39 = vmul.f32 0.01, %v1504_v23  ;;  %v1515_v44 = vadd.f32 %v3248_v28, %v4539_v51  ;;  %v1419_v47 = vmul.f32 0.01, %v4550_v57  ;;  %vm1554_vm12 = vcmp.ge.f32.partialorder %v1504_v23, 0.0 }
 0x340   : > { %v1354_v37 = vadd.f32 %v4539_v51, %v1353_v32  ;;  %v1506_v38 = vpop.f32.mrf.mxu1  ;;  %v1420_v40 = vmul.f32 0.01, %v1362_v58  ;;  %3274 = vmatmul.mubr.bf16.vlgmr.msra.gmra.mxu0 %v1599_v31  ;;  %vm1404_vm10 = vcmp.ge.f32.partialorder %v1362_v58, 0.0  ;;  %3305 = vmatprep.mubr.bf16.mxu1 %v1790_v42  ;;  %vm1556_vm13 = vcmp.ge.f32.partialorder %v4565_v35, 0.0 }
 0x341   : > { %v1507_v41 = vadd.f32 %v4539_v51, %v1506_v38  ;;  %v3219_v43 = vpop.f32.mrf.mxu0  ;;  %3322 = vmatpush3.bf16.msra.mxu0 %v4532_v50  ;;  %3306 = vmatmul.mubr.bf16.vlgmr.msra.gmra.mxu1 %v1791_v1  ;;  %v1572_v56 = vmul.f32 0.01, %v4565_v35  ;;  %v1433_v61 = vsel %vm1401_vm9, %v1351_v0, %v1417_v36  ;;  %vm1557_vm15 = vcmp.ge.f32.partialorder %v1515_v44, 0.0 }
 0x342   : > { %vm1402_vm11 = vcmp.ge.f32.partialorder %v1354_v37, 0.0  ;;  %v1418_v45 = vmul.f32 0.01, %v1354_v37  ;;  %v3251_v46 = vpop.f32.mrf.mxu1  ;;  %v4573_v49 = vadd.f32 %v3219_v43, %v4539_v51  ;;  %3323 = vmatprep.subr.bf16.mxu0 %v3588_v34  ;;  %v1436_v62 = vsel %vm1404_vm10, %v1362_v58, %v1420_v40  ;;  %3354 = vmatpush3.bf16.msra.mxu1 %v4532_v50 }
 0x343   : > { %v1571_v48 = vmul.f32 0.01, %v1507_v41  ;;  %v1366_v52 = vpop.f32.mrf.mxu0  ;;  %vm1555_vm14 = vcmp.ge.f32.partialorder %v1507_v41, 0.0  ;;  %v4577_v53 = vadd.f32 %v3251_v46, %v4539_v51  ;;  %v1573_v63 = vmul.f32 0.01, %v1515_v44  ;;  %3355 = vmatprep.subr.bf16.mxu1 %v3588_v34 }
 0x344   : > { %v1519_v54 = vpop.f32.mrf.mxu1  ;;  %v1434_v55 = vsel %vm1402_vm11, %v1354_v37, %v1418_v45  ;;  %v1367_v59 = vadd.f32 %v4539_v51, %v1366_v52  ;;  %v1586_v4 = vsel %vm1554_vm12, %v1504_v23, %v1570_v39  ;;  %vm1407_vm0 = vcmp.ge.f32.partialorder %v4573_v49, 0.0 }
 0x345   : > { %v3220_v60 = vpop.f32.mrf.mxu0  ;;  %v4586_v2 = vadd.f32 %v4539_v51, %v1519_v54  ;;  %3324 = vmatpush3.bf16.msra.mxu0 %v3588_v34  ;;  %v1600_v6 = vpack.c.bf16 %v1434_v55, %v1433_v61  ;;  %v1587_v7 = vsel %vm1555_vm14, %v1507_v41, %v1571_v48  ;;  %v1435_v50 = vsel %vm1403_vm8, %v4550_v57, %v1419_v47 }
 0x346   : > { %v3252_v3 = vpop.f32.mrf.mxu1  ;;  %v1423_v8 = vmul.f32 0.01, %v4573_v49  ;;  %v4596_v9 = vmul.f32 0.01, %v4577_v53  ;;  %v1378_v10 = vadd.f32 %v3220_v60, %v4539_v51  ;;  %v1601_v12 = vpack.c.bf16 %v1436_v62, %v1435_v50  ;;  %3356 = vmatpush3.bf16.msra.mxu1 %v3588_v34 }
 0x347   : > { %v1369_v5 = vpop.f32.mrf.mxu0  ;;  %vm1560_vm1 = vcmp.ge.f32.partialorder %v4577_v53, 0.0  ;;  %vm1405_vm2 = vcmp.ge.f32.partialorder %v1367_v59, 0.0  ;;  %v1421_v13 = vmul.f32 0.01, %v1367_v59  ;;  %3277 = vmatprep.mubr.bf16.mxu0 %v1600_v6  ;;  %vm1558_vm3 = vcmp.ge.f32.partialorder %v4586_v2, 0.0 }
 0x348   : > { %v1522_v11 = vpop.f32.mrf.mxu1  ;;  %v1370_v14 = vadd.f32 %v4539_v51, %v1369_v5  ;;  %v1531_v17 = vadd.f32 %v3252_v3, %v4539_v51  ;;  %v1792_v57 = vpack.c.bf16 %v1587_v7, %v1586_v4  ;;  %3278 = vmatmul.mubr.bf16.gmra.mxu0 %v1601_v12  ;;  %v1589_v18 = vsel %vm1557_vm15, %v1515_v44, %v1573_v63  ;;  %v3591_v12 = vld [vmem:[#allocation11 + $0x18] sm:$0xff]  }
 0x349   : > { %v1523_v15 = vadd.f32 %v4539_v51, %v1522_v11  ;;  %v3223_v16 = vpop.f32.mrf.mxu0  ;;  %v1574_v20 = vmul.f32 0.01, %v4586_v2  ;;  %v1588_v22 = vsel %vm1556_vm13, %v4565_v35, %v1572_v56  ;;  %vm1408_vm5 = vcmp.ge.f32.partialorder %v1378_v10, 0.0  ;;  %v3590_v11 = vld [vmem:[#allocation11 + $0x20] sm:$0xff]  }
 0x34a   : > { %v3255_v19 = vpop.f32.mrf.mxu1  ;;  %vm1406_vm4 = vcmp.ge.f32.partialorder %v1370_v14, 0.0  ;;  %v1422_v21 = vmul.f32 0.01, %v1370_v14  ;;  %v1424_v23 = vmul.f32 0.01, %v1378_v10  ;;  %3309 = vmatprep.mubr.bf16.mxu1 %v1792_v57  ;;  %v1793_v25 = vpack.c.bf16 %v1589_v18, %v1588_v22 }
 0x34b   : > { %v1382_v0 = vpop.f32.mrf.mxu0  ;;  %v1575_v24 = vmul.f32 0.01, %v1523_v15  ;;  %v1437_v29 = vsel %vm1405_vm2, %v1367_v59, %v1421_v13  ;;  %vm1561_vm6 = vcmp.ge.f32.partialorder %v1531_v17, 0.0  ;;  %vm1559_vm7 = vcmp.ge.f32.partialorder %v1523_v15, 0.0  ;;  %v3592_v13 = vld [vmem:[#allocation11 + $0x10] sm:$0xff]  }
 0x34c   : > { %v1535_v26 = vpop.f32.mrf.mxu1  ;;  %v1383_v27 = vadd.f32 %v4539_v51, %v1382_v0  ;;  %v1438_v30 = vsel %vm1406_vm4, %v1370_v14, %v1422_v21  ;;  %3310 = vmatmul.mubr.bf16.gmra.mxu1 %v1793_v25  ;;  %v1577_v33 = vmul.f32 0.01, %v1531_v17  ;;  %v1391_v34 = vadd.f32 %v3223_v16, %v4539_v51  ;;  %v3593_v14 = vld [vmem:[#allocation11 + $0x8] sm:$0xff]   ;;  %v4633_v16 = vld [vmem:[#allocation13 + $0x38] sm:$0xff]  }
 0x34d   : > { %v1536_v58 = vadd.f32 %v4539_v51, %v1535_v26  ;;  %v3224_v28 = vpop.f32.mrf.mxu0  ;;  %v1602_v32 = vpack.c.bf16 %v1438_v30, %v1437_v29  ;;  %v1544_v35 = vadd.f32 %v3255_v19, %v4539_v51  ;;  %v1591_v44 = vsel %vm1559_vm7, %v1523_v15, %v1575_v24  ;;  %v3594_v15 = vld [vmem:[#allocation11] sm:$0xff]  }
 0x34e   : > { %v1394_v31 = vadd.f32 %v3224_v28, %v4539_v51  ;;  %v3256_v1 = vpop.f32.mrf.mxu1  ;;  %vm1409_vm8 = vcmp.ge.f32.partialorder %v1383_v27, 0.0  ;;  %v1425_v37 = vmul.f32 0.01, %v1383_v27  ;;  %v1590_v46 = vsel %vm1558_vm3, %v4586_v2, %v1574_v20 }
 0x34f   : > { %v1385_v36 = vpop.f32.mrf.mxu0  ;;  %vm1562_vm9 = vcmp.ge.f32.partialorder %v1536_v58, 0.0  ;;  %v1578_v38 = vmul.f32 0.01, %v1536_v58  ;;  %3281 = vmatprep.mubr.bf16.mxu0 %v1602_v32  ;;  %v1547_v42 = vadd.f32 %v3256_v1, %v4539_v51  ;;  %v1439_v47 = vsel %vm1407_vm0, %v4573_v49, %v1423_v8 }
 0x350   : > { %v1386_v39 = vadd.f32 %v4539_v51, %v1385_v36  ;;  %v1538_v40 = vpop.f32.mrf.mxu1  ;;  %v1428_v41 = vmul.f32 0.01, %v1394_v31  ;;  %v1794_v52 = vpack.c.bf16 %v1591_v44, %v1590_v46  ;;  %v1440_v54 = vsel %vm1408_vm5, %v1378_v10, %v1424_v23  ;;  %v3589_v10 = vld [vmem:[#allocation11 + $0x28] sm:$0xff]  }
 0x351   : > { %v1539_v43 = vadd.f32 %v4539_v51, %v1538_v40  ;;  %v1603_v55 = vpack.c.bf16 %v1440_v54, %v1439_v47  ;;  %v1592_v51 = vsel %vm1560_vm1, %v4577_v53, %v4596_v9  ;;  %v1593_v56 = vsel %vm1561_vm6, %v1531_v17, %v1577_v33  ;;  %3325 = vmatprep.subr.bf16.mxu0 %v3589_v10  ;;  %v4640_v17 = vld [vmem:[%s4856_s8] ss:$0 sm:$0xff] }
 0x352   : > { %vm1410_vm10 = vcmp.ge.f32.partialorder %v1386_v39, 0.0  ;;  %v1426_v45 = vmul.f32 0.01, %v1386_v39  ;;  %v1441_v59 = vsel %vm1409_vm8, %v1383_v27, %v1425_v37  ;;  %3313 = vmatprep.mubr.bf16.mxu1 %v1794_v52  ;;  %v1795_v60 = vpack.c.bf16 %v1593_v56, %v1592_v51  ;;  %3357 = vmatprep.subr.bf16.mxu1 %v3589_v10 }
 0x353   : > { %vm1563_vm11 = vcmp.ge.f32.partialorder %v1539_v43, 0.0  ;;  %v1579_v48 = vmul.f32 0.01, %v1539_v43  ;;  %v1594_v49 = vsel %vm1562_vm9, %v1536_v58, %v1578_v38  ;;  %vm1412_vm12 = vcmp.ge.f32.partialorder %v1394_v31, 0.0  ;;  %3282 = vmatmul.mubr.bf16.gmra.mxu0 %v1603_v55  ;;  %3358 = vmatpush3.bf16.msra.mxu1 %v3589_v10 }
 0x354   : > { %v1442_v61 = vsel %vm1410_vm10, %v1386_v39, %v1426_v45  ;;  %v1581_v63 = vmul.f32 0.01, %v1547_v42  ;;  %v1427_v4 = vmul.f32 0.01, %v1391_v34  ;;  %vm1565_vm13 = vcmp.ge.f32.partialorder %v1547_v42, 0.0  ;;  %3314 = vmatmul.mubr.bf16.gmra.mxu1 %v1795_v60  ;;  %3326 = vmatpush3.bf16.msra.mxu0 %v3589_v10 }
 0x355   : > { %v1595_v62 = vsel %vm1563_vm11, %v1539_v43, %v1579_v48  ;;  %v1604_v2 = vpack.c.bf16 %v1442_v61, %v1441_v59  ;;  %vm1411_vm14 = vcmp.ge.f32.partialorder %v1391_v34, 0.0  ;;  %v1580_v53 = vmul.f32 0.01, %v1544_v35  ;;  %3327 = vmatprep.subr.bf16.mxu0 %v3590_v11  ;;  %3359 = vmatprep.subr.bf16.mxu1 %v3590_v11 }
 0x356   : > { %v1796_v3 = vpack.c.bf16 %v1595_v62, %v1594_v49  ;;  %vm1564_vm15 = vcmp.ge.f32.partialorder %v1544_v35, 0.0  ;;  %v1444_v5 = vsel %vm1412_vm12, %v1394_v31, %v1428_v41  ;;  %v1597_v6 = vsel %vm1565_vm13, %v1547_v42, %v1581_v63 }
 0x357   : > { %3285 = vmatprep.mubr.bf16.mxu0 %v1604_v2  ;;  %v1443_v7 = vsel %vm1411_vm14, %v1391_v34, %v1427_v4  ;;  %v1596_v8 = vsel %vm1564_vm15, %v1544_v35, %v1580_v53  ;;  %3360 = vmatpush3.bf16.msra.mxu1 %v3590_v11  ;;  %v3596_v2 = vld [vmem:[#allocation13 + $0x30] sm:$0xff]  }
 0x358   : > { %3317 = vmatprep.mubr.bf16.mxu1 %v1796_v3  ;;  %v1605_v50 = vpack.c.bf16 %v1444_v5, %v1443_v7  ;;  %v1797_v9 = vpack.c.bf16 %v1597_v6, %v1596_v8  ;;  %3328 = vmatpush3.bf16.msra.mxu0 %v3590_v11 }
 0x359   : > { %3329 = vmatprep.subr.bf16.mxu0 %v3591_v12  ;;  %3361 = vmatprep.subr.bf16.mxu1 %v3591_v12 }
 0x35b   : > { %3286 = vmatmul.mubr.bf16.gmra.mxu0 %v1605_v50  ;;  %3362 = vmatpush3.bf16.msra.mxu1 %v3591_v12 }
 0x35c   : > { %3318 = vmatmul.mubr.bf16.gmra.mxu1 %v1797_v9  ;;  %3330 = vmatpush3.bf16.msra.mxu0 %v3591_v12 }
 0x35d   : > { %3331 = vmatprep.subr.bf16.mxu0 %v3592_v13  ;;  %3363 = vmatprep.subr.bf16.mxu1 %v3592_v13 }
 0x35f   : > { %3364 = vmatpush3.bf16.msra.mxu1 %v3592_v13 }
 0x360   : > { %3332 = vmatpush3.bf16.msra.mxu0 %v3592_v13  ;;  %3365 = vmatprep.subr.bf16.mxu1 %v3593_v14 }
 0x361   : > { %3333 = vmatprep.subr.bf16.mxu0 %v3593_v14 }
 0x363   : > { %3366 = vmatpush3.bf16.msra.mxu1 %v3593_v14 }
 0x364   : > { %3334 = vmatpush3.bf16.msra.mxu0 %v3593_v14  ;;  %3367 = vmatprep.subr.bf16.mxu1 %v3594_v15 }
 0x365   : > { %3335 = vmatprep.subr.bf16.mxu0 %v3594_v15 }
 0x367   : > { %3368 = vmatpush3.bf16.msra.mxu1 %v3594_v15 }
 0x368   : > { %3336 = vmatpush3.bf16.msra.mxu0 %v3594_v15  ;;  %3417 = vmatprep.subr.bf16.mxu1 %v4633_v16 }
 0x369   : > { %3385 = vmatprep.subr.bf16.mxu0 %v4633_v16 }
 0x400   : > { %v3275_v57 = vpop.f32.mrf.mxu0 }
 0x401   : > { %v1720_v18 = vadd.f32 %v3275_v57, %v4640_v17  ;;  %v3307_v20 = vpop.f32.mrf.mxu1 }
 0x402   : > { %v1711_v19 = vpop.f32.mrf.mxu0  ;;  %v1841_v28 = vadd.f32 %v3307_v20, %v4640_v17 }
 0x403   : > { %v1712_v21 = vadd.f32 %v4640_v17, %v1711_v19  ;;  %v1832_v0 = vpop.f32.mrf.mxu1  ;;  %3731 = vtanh.f32 %v1720_v18 }
 0x404   : > { %v3276_v22 = vpop.f32.mrf.mxu0  ;;  %v1833_v24 = vadd.f32 %v4640_v17, %v1832_v0 }
 0x405   : > { %v1723_v23 = vadd.f32 %v3276_v22, %v4640_v17  ;;  %3733 = vtanh.f32 %v1712_v21  ;;  %v3308_v26 = vpop.f32.mrf.mxu1 }
 0x406   : > { %v1714_v25 = vpop.f32.mrf.mxu0  ;;  %v1844_v58 = vadd.f32 %v3308_v26, %v4640_v17 }
 0x407   : > { %v1715_v27 = vadd.f32 %v4640_v17, %v1714_v25  ;;  %3735 = vtanh.f32 %v1723_v23  ;;  %v1835_v29 = vpop.f32.mrf.mxu1 }
 0x408   : > { %v3279_v30 = vpop.f32.mrf.mxu0  ;;  %v1836_v31 = vadd.f32 %v4640_v17, %v1835_v29 }
 0x409   : > { %3737 = vtanh.f32 %v1715_v27  ;;  %v1736_v32 = vadd.f32 %v3279_v30, %v4640_v17 }
 0x40a   : > { %3739 = vtanh.f32 %v1833_v24  ;;  %v1727_v1 = vpop.f32.mrf.mxu0 }
 0x40b   : > { %3741 = vtanh.f32 %v1844_v58  ;;  %v1728_v34 = vadd.f32 %v4640_v17, %v1727_v1 }
 0x40c   : > { %3743 = vtanh.f32 %v1836_v31  ;;  %v3311_v33 = vpop.f32.mrf.mxu1  ;;  %v3280_v35 = vpop.f32.mrf.mxu0 }
 0x40d   : > { %3745 = vtanh.f32 %v1841_v28  ;;  %v1739_v36 = vadd.f32 %v3280_v35, %v4640_v17  ;;  %v1857_v44 = vadd.f32 %v3311_v33, %v4640_v17 }
 0x40e   : > { %v1848_v37 = vpop.f32.mrf.mxu1  ;;  %v1730_v38 = vpop.f32.mrf.mxu0  ;;  %3747 = vtanh.f32 %v1736_v32 }
 0x40f   : > { %v1849_v39 = vadd.f32 %v4640_v17, %v1848_v37  ;;  %v1731_v40 = vadd.f32 %v4640_v17, %v1730_v38  ;;  %3749 = vtanh.f32 %v1728_v34 }
 0x410   : > { %v3312_v41 = vpop.f32.mrf.mxu1  ;;  %3751 = vtanh.f32 %v1739_v36  ;;  %v3732_v43 = vpop.eup %3731 }
 0x411   : > { %v1860_v42 = vadd.f32 %v3312_v41, %v4640_v17  ;;  %3753 = vtanh.f32 %v1731_v40 }
 0x412   : > { %v1851_v45 = vpop.f32.mrf.mxu1  ;;  %v3734_v46 = vpop.eup %3733  ;;  %3755 = vtanh.f32 %v1849_v39 }
 0x413   : > { %v1852_v47 = vadd.f32 %v4640_v17, %v1851_v45  ;;  %3757 = vtanh.f32 %v1860_v42  ;;  %v3283_v52 = vpop.f32.mrf.mxu0 }
 0x414   : > { %v3736_v48 = vpop.eup %3735  ;;  %v1752_v55 = vadd.f32 %v3283_v52, %v4640_v17  ;;  %v3315_v51 = vpop.f32.mrf.mxu1 }
 0x415   : > { %3759 = vtanh.f32 %v1852_v47  ;;  %v1743_v59 = vpop.f32.mrf.mxu0  ;;  %v1912_v63 = vpack.c.bf16 %v3736_v48, %v3732_v43  ;;  %v1873_v11 = vadd.f32 %v3315_v51, %v4640_v17 }
 0x416   : > { %v3738_v54 = vpop.eup %3737  ;;  %3761 = vtanh.f32 %v1857_v44  ;;  %v1744_v49 = vadd.f32 %v4640_v17, %v1743_v59  ;;  %v1864_v62 = vpop.f32.mrf.mxu1 }
 0x417   : > { %v3740_v56 = vpop.eup %3739  ;;  %v1911_v60 = vpack.c.bf16 %v3738_v54, %v3734_v46  ;;  %3763 = vtanh.f32 %v1752_v55  ;;  %v1865_v4 = vadd.f32 %v4640_v17, %v1864_v62  ;;  %v3284_v53 = vpop.f32.mrf.mxu0 }
 0x418   : > { %v3742_v61 = vpop.eup %3741  ;;  %3765 = vtanh.f32 %v1744_v49  ;;  %v1755_v6 = vadd.f32 %v3284_v53, %v4640_v17  ;;  %v3316_v7 = vpop.f32.mrf.mxu1  ;;  %v3597_v53 = vld [vmem:[#allocation13 + $0x28] sm:$0xff]  }
 0x419   : > { %v3744_v3 = vpop.eup %3743  ;;  %3337 = vmatprep.mubr.bf16.mxu0 %v1911_v60  ;;  %3767 = vtanh.f32 %v1865_v4  ;;  %v1876_v8 = vadd.f32 %v3316_v7, %v4640_v17  ;;  %v1746_v9 = vpop.f32.mrf.mxu0  ;;  %v3600_v7 = vld [vmem:[#allocation13 + $0x10] sm:$0xff]  }
 0x41a   : > { %v3746_v5 = vpop.eup %3745  ;;  %v2103_v50 = vpack.c.bf16 %v3744_v3, %v3740_v56  ;;  %3338 = vmatmul.mubr.bf16.vlgmr.msra.gmra.mxu0 %v1912_v63  ;;  %3769 = vtanh.f32 %v1755_v6  ;;  %v1747_v12 = vadd.f32 %v4640_v17, %v1746_v9  ;;  %v1867_v13 = vpop.f32.mrf.mxu1  ;;  %v3599_v6 = vld [vmem:[#allocation13 + $0x18] sm:$0xff]   ;;  %v4679_v9 = vld [vmem:[%s4858_s10] ss:$0 sm:$0xff] }
 0x41b   : > { %v2104_v10 = vpack.c.bf16 %v3742_v61, %v3746_v5  ;;  %3386 = vmatpush3.bf16.msra.mxu0 %v4633_v16  ;;  %v3748_v14 = vpop.eup %3747  ;;  %3771 = vtanh.f32 %v1876_v8  ;;  %v1868_v15 = vadd.f32 %v4640_v17, %v1867_v13  ;;  %v3287_v57 = vpop.f32.mrf.mxu0  ;;  %v3598_v5 = vld [vmem:[#allocation13 + $0x20] sm:$0xff]  }
 0x41c   : > { %3369 = vmatprep.mubr.bf16.mxu1 %v2103_v50  ;;  %3387 = vmatprep.subr.bf16.mxu0 %v3596_v2  ;;  %v3750_v18 = vpop.eup %3749  ;;  %3773 = vtanh.f32 %v1747_v12  ;;  %v1768_v19 = vadd.f32 %v3287_v57, %v4640_v17  ;;  %v3319_v20 = vpop.f32.mrf.mxu1  ;;  %v3601_v50 = vld [vmem:[#allocation13 + $0x8] sm:$0xff]   ;;  %v3602_v8 = vld [vmem:[#allocation13] sm:$0xff]  }
 0x41d   : > { %3370 = vmatmul.mubr.bf16.vlgmr.msra.gmra.mxu1 %v2104_v10  ;;  %v3752_v21 = vpop.eup %3751  ;;  %3775 = vtanh.f32 %v1868_v15  ;;  %v1759_v22 = vpop.f32.mrf.mxu0  ;;  %v1889_v34 = vadd.f32 %v3319_v20, %v4640_v17 }
 0x41e   : > { %3418 = vmatpush3.bf16.msra.mxu1 %v4633_v16  ;;  %v3754_v0 = vpop.eup %3753  ;;  %3777 = vtanh.f32 %v1873_v11  ;;  %v1760_v23 = vadd.f32 %v4640_v17, %v1759_v22  ;;  %v1880_v24 = vpop.f32.mrf.mxu1  ;;  %v1914_v30 = vpack.c.bf16 %v3752_v21, %v3748_v14 }
 0x41f   : > { %3419 = vmatprep.subr.bf16.mxu1 %v3596_v2  ;;  %3388 = vmatpush3.bf16.msra.mxu0 %v3596_v2  ;;  %v3756_v25 = vpop.eup %3755  ;;  %3779 = vtanh.f32 %v1768_v19  ;;  %v1881_v26 = vadd.f32 %v4640_v17, %v1880_v24  ;;  %v3288_v27 = vpop.f32.mrf.mxu0  ;;  %v1913_v58 = vpack.c.bf16 %v3754_v0, %v3750_v18 }
 0x420   : > { %v3758_v28 = vpop.eup %3757  ;;  %3781 = vtanh.f32 %v1760_v23  ;;  %v1771_v16 = vadd.f32 %v3288_v27, %v4640_v17  ;;  %v3320_v29 = vpop.f32.mrf.mxu1  ;;  %3389 = vmatprep.subr.bf16.mxu0 %v3597_v53 }
 0x421   : > { %3783 = vtanh.f32 %v1881_v26  ;;  %v1892_v1 = vadd.f32 %v3320_v29, %v4640_v17  ;;  %v1762_v32 = vpop.f32.mrf.mxu0  ;;  %3341 = vmatprep.mubr.bf16.mxu0 %v1913_v58 }
 0x422   : > { %3420 = vmatpush3.bf16.msra.mxu1 %v3596_v2  ;;  %v3760_v31 = vpop.eup %3759  ;;  %3785 = vtanh.f32 %v1771_v16  ;;  %v1763_v35 = vadd.f32 %v4640_v17, %v1762_v32  ;;  %v1883_v36 = vpop.f32.mrf.mxu1  ;;  %3342 = vmatmul.mubr.bf16.gmra.mxu0 %v1914_v30 }
 0x423   : > { %v3762_v33 = vpop.eup %3761  ;;  %v2105_v37 = vpack.c.bf16 %v3760_v31, %v3756_v25  ;;  %3787 = vtanh.f32 %v1892_v1  ;;  %v1884_v38 = vadd.f32 %v4640_v17, %v1883_v36  ;;  %3421 = vmatprep.subr.bf16.mxu1 %v3597_v53  ;;  %3390 = vmatpush3.bf16.msra.mxu0 %v3597_v53 }
 0x424   : > { %v2106_v39 = vpack.c.bf16 %v3758_v28, %v3762_v33  ;;  %v3764_v40 = vpop.eup %3763  ;;  %3789 = vtanh.f32 %v1763_v35  ;;  %3391 = vmatprep.subr.bf16.mxu0 %v3598_v5 }
 0x425   : > { %3373 = vmatprep.mubr.bf16.mxu1 %v2105_v37  ;;  %v3766_v41 = vpop.eup %3765  ;;  %3791 = vtanh.f32 %v1884_v38 }
 0x426   : > { %3374 = vmatmul.mubr.bf16.gmra.mxu1 %v2106_v39  ;;  %v3768_v42 = vpop.eup %3767  ;;  %3793 = vtanh.f32 %v1889_v34 }
 0x427   : > { %v3770_v43 = vpop.eup %3769  ;;  %3422 = vmatpush3.bf16.msra.mxu1 %v3597_v53  ;;  %3392 = vmatpush3.bf16.msra.mxu0 %v3598_v5 }
 0x428   : > { %v3772_v44 = vpop.eup %3771  ;;  %v1916_v54 = vpack.c.bf16 %v3770_v43, %v3764_v40  ;;  %3423 = vmatprep.subr.bf16.mxu1 %v3598_v5  ;;  %3393 = vmatprep.subr.bf16.mxu0 %v3599_v6 }
 0x429   : > { %v3774_v45 = vpop.eup %3773 }
 0x42a   : > { %v3776_v46 = vpop.eup %3775  ;;  %v1915_v47 = vpack.c.bf16 %v3774_v45, %v3766_v41 }
 0x42b   : > { %v3778_v48 = vpop.eup %3777  ;;  %v2107_v52 = vpack.c.bf16 %v3776_v46, %v3768_v42  ;;  %3424 = vmatpush3.bf16.msra.mxu1 %v3598_v5  ;;  %3394 = vmatpush3.bf16.msra.mxu0 %v3599_v6 }
 0x42c   : > { %v3780_v55 = vpop.eup %3779  ;;  %3345 = vmatprep.mubr.bf16.mxu0 %v1915_v47  ;;  %v2108_v17 = vpack.c.bf16 %v3772_v44, %v3778_v48  ;;  %3425 = vmatprep.subr.bf16.mxu1 %v3599_v6 }
 0x42d   : > { %v3782_v51 = vpop.eup %3781  ;;  %3377 = vmatprep.mubr.bf16.mxu1 %v2107_v52  ;;  %3346 = vmatmul.mubr.bf16.gmra.mxu0 %v1916_v54 }
 0x42e   : > { %v3784_v56 = vpop.eup %3783  ;;  %3378 = vmatmul.mubr.bf16.gmra.mxu1 %v2108_v17  ;;  %3395 = vmatprep.subr.bf16.mxu0 %v3600_v7 }
 0x42f   : > { %v3786_v59 = vpop.eup %3785  ;;  %3426 = vmatpush3.bf16.msra.mxu1 %v3599_v6  ;;  %3396 = vmatpush3.bf16.msra.mxu0 %v3600_v7 }
 0x430   : > { %v3788_v60 = vpop.eup %3787  ;;  %v1918_v3 = vpack.c.bf16 %v3786_v59, %v3780_v55  ;;  %3427 = vmatprep.subr.bf16.mxu1 %v3600_v7  ;;  %3397 = vmatprep.subr.bf16.mxu0 %v3601_v50 }
 0x431   : > { %v3790_v61 = vpop.eup %3789 }
 0x432   : > { %v3792_v49 = vpop.eup %3791  ;;  %v1917_v62 = vpack.c.bf16 %v3790_v61, %v3782_v51 }
 0x433   : > { %v3794_v63 = vpop.eup %3793  ;;  %v2109_v2 = vpack.c.bf16 %v3792_v49, %v3784_v56  ;;  %3428 = vmatpush3.bf16.msra.mxu1 %v3600_v7  ;;  %3398 = vmatpush3.bf16.msra.mxu0 %v3601_v50 }
 0x434   : > { %3349 = vmatprep.mubr.bf16.mxu0 %v1917_v62  ;;  %v2110_v4 = vpack.c.bf16 %v3788_v60, %v3794_v63  ;;  %3429 = vmatprep.subr.bf16.mxu1 %v3601_v50 }
 0x435   : > { %3381 = vmatprep.mubr.bf16.mxu1 %v2109_v2  ;;  %3350 = vmatmul.mubr.bf16.gmra.mxu0 %v1918_v3 }
 0x436   : > { %3382 = vmatmul.mubr.bf16.gmra.mxu1 %v2110_v4  ;;  %3399 = vmatprep.subr.bf16.mxu0 %v3602_v8 }
 0x437   : > { %3430 = vmatpush3.bf16.msra.mxu1 %v3601_v50  ;;  %3400 = vmatpush3.bf16.msra.mxu0 %v3602_v8 }
 0x438   : > { %3431 = vmatprep.subr.bf16.mxu1 %v3602_v8 }
 0x43b   : > { %3432 = vmatpush3.bf16.msra.mxu1 %v3602_v8 }
 0x4da   : > { %v3339_v10 = vpop.f32.mrf.mxu0 }
 0x4db   : > { %v2033_v11 = vadd.f32 %v3339_v10, %v4679_v9 }
 0x4dc   : > { %v2024_v12 = vpop.f32.mrf.mxu0 }
 0x4dd   : > { %v3371_v13 = vpop.f32.mrf.mxu1  ;;  %v2025_v14 = vadd.f32 %v4679_v9, %v2024_v12  ;;  %3795 = vtanh.f32 %v2033_v11 }
 0x4de   : > { %v3340_v15 = vpop.f32.mrf.mxu0  ;;  %v2154_v23 = vadd.f32 %v3371_v13, %v4679_v9 }
 0x4df   : > { %v2145_v57 = vpop.f32.mrf.mxu1  ;;  %v2036_v18 = vadd.f32 %v3340_v15, %v4679_v9  ;;  %3797 = vtanh.f32 %v2025_v14 }
 0x4e0   : > { %v2146_v19 = vadd.f32 %v4679_v9, %v2145_v57  ;;  %v2027_v20 = vpop.f32.mrf.mxu0 }
 0x4e1   : > { %v3372_v21 = vpop.f32.mrf.mxu1  ;;  %v2028_v22 = vadd.f32 %v4679_v9, %v2027_v20  ;;  %3799 = vtanh.f32 %v2036_v18 }
 0x4e2   : > { %v2157_v0 = vadd.f32 %v3372_v21, %v4679_v9  ;;  %v3343_v26 = vpop.f32.mrf.mxu0 }
 0x4e3   : > { %3801 = vtanh.f32 %v2028_v22  ;;  %v2148_v24 = vpop.f32.mrf.mxu1  ;;  %v2049_v27 = vadd.f32 %v3343_v26, %v4679_v9 }
 0x4e4   : > { %3803 = vtanh.f32 %v2146_v19  ;;  %v2149_v25 = vadd.f32 %v4679_v9, %v2148_v24  ;;  %v2040_v58 = vpop.f32.mrf.mxu0 }
 0x4e5   : > { %3805 = vtanh.f32 %v2157_v0  ;;  %v2041_v16 = vadd.f32 %v4679_v9, %v2040_v58 }
 0x4e6   : > { %3807 = vtanh.f32 %v2149_v25  ;;  %v3375_v28 = vpop.f32.mrf.mxu1  ;;  %v3344_v29 = vpop.f32.mrf.mxu0 }
 0x4e7   : > { %3809 = vtanh.f32 %v2154_v23  ;;  %v2052_v31 = vadd.f32 %v3344_v29, %v4679_v9  ;;  %v2170_v37 = vadd.f32 %v3375_v28, %v4679_v9 }
 0x4e8   : > { %v2161_v30 = vpop.f32.mrf.mxu1  ;;  %3811 = vtanh.f32 %v2049_v27  ;;  %v2043_v32 = vpop.f32.mrf.mxu0 }
 0x4e9   : > { %v2162_v1 = vadd.f32 %v4679_v9, %v2161_v30  ;;  %3813 = vtanh.f32 %v2041_v16  ;;  %v2044_v34 = vadd.f32 %v4679_v9, %v2043_v32 }
 0x4ea   : > { %v3376_v33 = vpop.f32.mrf.mxu1  ;;  %3815 = vtanh.f32 %v2052_v31  ;;  %v3796_v36 = vpop.eup %3795 }
 0x4eb   : > { %v2173_v35 = vadd.f32 %v3376_v33, %v4679_v9  ;;  %3817 = vtanh.f32 %v2044_v34 }
 0x4ec   : > { %v2164_v38 = vpop.f32.mrf.mxu1  ;;  %v3798_v39 = vpop.eup %3797  ;;  %3819 = vtanh.f32 %v2162_v1 }
 0x4ed   : > { %v2165_v40 = vadd.f32 %v4679_v9, %v2164_v38  ;;  %3821 = vtanh.f32 %v2173_v35  ;;  %v3347_v42 = vpop.f32.mrf.mxu0 }
 0x4ee   : > { %v3800_v41 = vpop.eup %3799  ;;  %v2065_v44 = vadd.f32 %v3347_v42, %v4679_v9  ;;  %v3379_v45 = vpop.f32.mrf.mxu1 }
 0x4ef   : > { %3823 = vtanh.f32 %v2165_v40  ;;  %v2056_v47 = vpop.f32.mrf.mxu0  ;;  %v2225_v17 = vpack.c.bf16 %v3800_v41, %v3796_v36  ;;  %v2186_v4 = vadd.f32 %v3379_v45, %v4679_v9 }
 0x4f0   : > { %v3802_v43 = vpop.eup %3801  ;;  %3825 = vtanh.f32 %v2170_v37  ;;  %v2057_v54 = vadd.f32 %v4679_v9, %v2056_v47  ;;  %v2177_v55 = vpop.f32.mrf.mxu1 }
 0x4f1   : > { %v3804_v46 = vpop.eup %3803  ;;  %v2224_v48 = vpack.c.bf16 %v3802_v43, %v3798_v39  ;;  %3827 = vtanh.f32 %v2065_v44  ;;  %v2178_v56 = vadd.f32 %v4679_v9, %v2177_v55  ;;  %v3348_v59 = vpop.f32.mrf.mxu0 }
 0x4f2   : > { %v3806_v52 = vpop.eup %3805  ;;  %3829 = vtanh.f32 %v2057_v54  ;;  %v2068_v61 = vadd.f32 %v3348_v59, %v4679_v9  ;;  %v3380_v49 = vpop.f32.mrf.mxu1  ;;  %v4716_v59 = vld [vmem:[%s4892_s24] ss:$0 sm:$0xff] }
 0x4f3   : > { %v3808_v51 = vpop.eup %3807  ;;  %3401 = vmatprep.mubr.bf16.mxu0 %v2224_v48  ;;  %3831 = vtanh.f32 %v2178_v56  ;;  %v2189_v63 = vadd.f32 %v3380_v49, %v4679_v9  ;;  %v2059_v2 = vpop.f32.mrf.mxu0 }
 0x4f4   : > { %v3810_v60 = vpop.eup %3809  ;;  %v2448_v62 = vpack.c.bf16 %v3808_v51, %v3804_v46  ;;  %3402 = vmatmul.mubr.bf16.vlgmr.msra.gmra.mxu0 %v2225_v17  ;;  %3833 = vtanh.f32 %v2068_v61  ;;  %v2060_v53 = vadd.f32 %v4679_v9, %v2059_v2  ;;  %v2180_v5 = vpop.f32.mrf.mxu1 }
 0x4f5   : > { %v2449_v3 = vpack.c.bf16 %v3806_v52, %v3810_v60  ;;  %v3812_v6 = vpop.eup %3811  ;;  %3835 = vtanh.f32 %v2189_v63  ;;  %v2181_v7 = vadd.f32 %v4679_v9, %v2180_v5  ;;  %v3351_v50 = vpop.f32.mrf.mxu0 }
 0x4f6   : > { %3433 = vmatprep.mubr.bf16.mxu1 %v2448_v62  ;;  %v3814_v8 = vpop.eup %3813  ;;  %3837 = vtanh.f32 %v2060_v53  ;;  %v2081_v10 = vadd.f32 %v3351_v50, %v4679_v9  ;;  %v3383_v11 = vpop.f32.mrf.mxu1 }
 0x4f7   : > { %3434 = vmatmul.mubr.bf16.vlgmr.msra.gmra.mxu1 %v2449_v3  ;;  %v3816_v12 = vpop.eup %3815  ;;  %3839 = vtanh.f32 %v2181_v7  ;;  %v2072_v13 = vpop.f32.mrf.mxu0  ;;  %v2202_v28 = vadd.f32 %v3383_v11, %v4679_v9 }
 0x4f8   : > { %v3818_v14 = vpop.eup %3817  ;;  %3841 = vtanh.f32 %v2186_v4  ;;  %v2073_v15 = vadd.f32 %v4679_v9, %v2072_v13  ;;  %v2193_v57 = vpop.f32.mrf.mxu1  ;;  %v2227_v24 = vpack.c.bf16 %v3816_v12, %v3812_v6 }
 0x4f9   : > { %v3820_v18 = vpop.eup %3819  ;;  %3843 = vtanh.f32 %v2081_v10  ;;  %v2194_v19 = vadd.f32 %v4679_v9, %v2193_v57  ;;  %v3352_v20 = vpop.f32.mrf.mxu0  ;;  %v2226_v21 = vpack.c.bf16 %v3818_v14, %v3814_v8 }
 0x4fa   : > { %v3822_v22 = vpop.eup %3821  ;;  %3845 = vtanh.f32 %v2073_v15  ;;  %v2084_v0 = vadd.f32 %v3352_v20, %v4679_v9  ;;  %v3384_v23 = vpop.f32.mrf.mxu1 }
 0x4fb   : > { %3847 = vtanh.f32 %v2194_v19  ;;  %v2205_v26 = vadd.f32 %v3384_v23, %v4679_v9  ;;  %v2075_v27 = vpop.f32.mrf.mxu0  ;;  %3405 = vmatprep.mubr.bf16.mxu0 %v2226_v21 }
 0x4fc   : > { %v3824_v25 = vpop.eup %3823  ;;  %3849 = vtanh.f32 %v2084_v0  ;;  %v2076_v16 = vadd.f32 %v4679_v9, %v2075_v27  ;;  %v2196_v29 = vpop.f32.mrf.mxu1  ;;  %3406 = vmatmul.mubr.bf16.gmra.mxu0 %v2227_v24 }
 0x4fd   : > { %v3826_v58 = vpop.eup %3825  ;;  %v2450_v30 = vpack.c.bf16 %v3824_v25, %v3820_v18  ;;  %3851 = vtanh.f32 %v2205_v26  ;;  %v2197_v31 = vadd.f32 %v4679_v9, %v2196_v29 }
 0x4fe   : > { %v2451_v1 = vpack.c.bf16 %v3822_v22, %v3826_v58  ;;  %v3828_v32 = vpop.eup %3827  ;;  %3853 = vtanh.f32 %v2076_v16 }
 0x4ff   : > { %3437 = vmatprep.mubr.bf16.mxu1 %v2450_v30  ;;  %v3830_v33 = vpop.eup %3829  ;;  %3855 = vtanh.f32 %v2197_v31 }
 0x500   : > { %3438 = vmatmul.mubr.bf16.gmra.mxu1 %v2451_v1  ;;  %v3832_v34 = vpop.eup %3831  ;;  %3857 = vtanh.f32 %v2202_v28 }
 0x501   : > { %v3834_v35 = vpop.eup %3833 }
 0x502   : > { %v3836_v36 = vpop.eup %3835  ;;  %v2229_v42 = vpack.c.bf16 %v3834_v35, %v3828_v32 }
 0x503   : > { %v3838_v37 = vpop.eup %3837 }
 0x504   : > { %v3840_v38 = vpop.eup %3839  ;;  %v2228_v39 = vpack.c.bf16 %v3838_v37, %v3830_v33 }
 0x505   : > { %v3842_v40 = vpop.eup %3841  ;;  %v2452_v41 = vpack.c.bf16 %v3840_v38, %v3832_v34 }
 0x506   : > { %v3844_v43 = vpop.eup %3843  ;;  %3409 = vmatprep.mubr.bf16.mxu0 %v2228_v39  ;;  %v2453_v9 = vpack.c.bf16 %v3836_v36, %v3842_v40 }
 0x507   : > { %v3846_v44 = vpop.eup %3845  ;;  %3441 = vmatprep.mubr.bf16.mxu1 %v2452_v41  ;;  %3410 = vmatmul.mubr.bf16.gmra.mxu0 %v2229_v42 }
 0x508   : > { %v3848_v45 = vpop.eup %3847  ;;  %3442 = vmatmul.mubr.bf16.gmra.mxu1 %v2453_v9 }
 0x509   : > { %v3850_v46 = vpop.eup %3849 }
 0x50a   : > { %v3852_v47 = vpop.eup %3851  ;;  %v2231_v51 = vpack.c.bf16 %v3850_v46, %v3844_v43 }
 0x50b   : > { %v3854_v48 = vpop.eup %3853 }
 0x50c   : > { %v3856_v52 = vpop.eup %3855  ;;  %v2230_v54 = vpack.c.bf16 %v3854_v48, %v3846_v44 }
 0x50d   : > { %v3858_v55 = vpop.eup %3857  ;;  %v2454_v17 = vpack.c.bf16 %v3856_v52, %v3848_v45 }
 0x50e   : > { %3413 = vmatprep.mubr.bf16.mxu0 %v2230_v54  ;;  %v2455_v56 = vpack.c.bf16 %v3852_v47, %v3858_v55 }
 0x50f   : > { %3445 = vmatprep.mubr.bf16.mxu1 %v2454_v17  ;;  %3414 = vmatmul.mubr.bf16.gmra.mxu0 %v2231_v51 }
 0x510   : > { %3446 = vmatmul.mubr.bf16.gmra.mxu1 %v2455_v56 }
 0x5b4   : > { %v3403_v60 = vpop.f32.mrf.mxu0 }
 0x5b5   : > { %v2346_v61 = vadd.f32 %v3403_v60, %v4716_v59 }
 0x5b6   : > { %v2337_v49 = vpop.f32.mrf.mxu0 }
 0x5b7   : > { %vm2402_vm0 = vcmp.ge.f32.partialorder %v2346_v61, 0.0  ;;  %v2418_v62 = vmul.f32 0.01, %v2346_v61  ;;  %v3435_v63 = vpop.f32.mrf.mxu1  ;;  %v2338_v2 = vadd.f32 %v4716_v59, %v2337_v49 }
 0x5b8   : > { %v2499_v3 = vadd.f32 %v3435_v63, %v4716_v59  ;;  %v3404_v4 = vpop.f32.mrf.mxu0 }
 0x5b9   : > { %v2434_v53 = vsel %vm2402_vm0, %v2346_v61, %v2418_v62  ;;  %vm2400_vm1 = vcmp.ge.f32.partialorder %v2338_v2, 0.0  ;;  %v2416_v5 = vmul.f32 0.01, %v2338_v2  ;;  %v2490_v6 = vpop.f32.mrf.mxu1  ;;  %v2349_v7 = vadd.f32 %v3404_v4, %v4716_v59 }
 0x5ba   : > { %2603 = vst [vmem:[%s4724_s23 + $0x10] sm:$0xff] %v2434_v53  ;;  %vm2555_vm2 = vcmp.ge.f32.partialorder %v2499_v3, 0.0  ;;  %v2571_v50 = vmul.f32 0.01, %v2499_v3  ;;  %v2491_v8 = vadd.f32 %v4716_v59, %v2490_v6  ;;  %v2340_v10 = vpop.f32.mrf.mxu0 }
 0x5bb   : > { %v2432_v11 = vsel %vm2400_vm1, %v2338_v2, %v2416_v5  ;;  %vm2403_vm3 = vcmp.ge.f32.partialorder %v2349_v7, 0.0  ;;  %v2419_v12 = vmul.f32 0.01, %v2349_v7  ;;  %v3436_v13 = vpop.f32.mrf.mxu1  ;;  %v2341_v14 = vadd.f32 %v4716_v59, %v2340_v10 }
 0x5bc   : > { %v2587_v15 = vsel %vm2555_vm2, %v2499_v3, %v2571_v50  ;;  %2601 = vst [vmem:[%s4724_s23] sm:$0xff] %v2432_v11  ;;  %vm2553_vm4 = vcmp.ge.f32.partialorder %v2491_v8, 0.0  ;;  %v2569_v57 = vmul.f32 0.01, %v2491_v8  ;;  %v2502_v18 = vadd.f32 %v3436_v13, %v4716_v59  ;;  %v3407_v24 = vpop.f32.mrf.mxu0 }
 0x5bd   : > { %2619 = vst [vmem:[%s4724_s23 + $0x90] sm:$0xff] %v2587_v15  ;;  %v2435_v19 = vsel %vm2403_vm3, %v2349_v7, %v2419_v12  ;;  %vm2401_vm5 = vcmp.ge.f32.partialorder %v2341_v14, 0.0  ;;  %v2417_v20 = vmul.f32 0.01, %v2341_v14  ;;  %v2493_v21 = vpop.f32.mrf.mxu1  ;;  %v2362_v26 = vadd.f32 %v3407_v24, %v4716_v59 }
 0x5be   : > { %v2585_v22 = vsel %vm2553_vm4, %v2491_v8, %v2569_v57  ;;  %2604 = vst [vmem:[%s4724_s23 + $0x18] sm:$0xff] %v2435_v19  ;;  %vm2556_vm6 = vcmp.ge.f32.partialorder %v2502_v18, 0.0  ;;  %v2572_v0 = vmul.f32 0.01, %v2502_v18  ;;  %v2494_v23 = vadd.f32 %v4716_v59, %v2493_v21  ;;  %v2353_v28 = vpop.f32.mrf.mxu0 }
 0x5bf   : > { %2617 = vst [vmem:[%s4724_s23 + $0x80] sm:$0xff] %v2585_v22  ;;  %v2433_v25 = vsel %vm2401_vm5, %v2341_v14, %v2417_v20  ;;  %vm2406_vm8 = vcmp.ge.f32.partialorder %v2362_v26, 0.0  ;;  %v2422_v16 = vmul.f32 0.01, %v2362_v26  ;;  %v2354_v30 = vadd.f32 %v4716_v59, %v2353_v28 }
 0x5c0   : > { %v2588_v27 = vsel %vm2556_vm6, %v2502_v18, %v2572_v0  ;;  %2602 = vst [vmem:[%s4724_s23 + $0x8] sm:$0xff] %v2433_v25  ;;  %vm2554_vm7 = vcmp.ge.f32.partialorder %v2494_v23, 0.0  ;;  %v2570_v58 = vmul.f32 0.01, %v2494_v23  ;;  %v3439_v29 = vpop.f32.mrf.mxu1  ;;  %v3408_v32 = vpop.f32.mrf.mxu0 }
 0x5c1   : > { %2620 = vst [vmem:[%s4724_s23 + $0x98] sm:$0xff] %v2588_v27  ;;  %v2515_v1 = vadd.f32 %v3439_v29, %v4716_v59  ;;  %v2438_v33 = vsel %vm2406_vm8, %v2362_v26, %v2422_v16  ;;  %vm2404_vm9 = vcmp.ge.f32.partialorder %v2354_v30, 0.0  ;;  %v2420_v34 = vmul.f32 0.01, %v2354_v30 }
 0x5c2   : > { %v2586_v31 = vsel %vm2554_vm7, %v2494_v23, %v2570_v58  ;;  %v2506_v35 = vpop.f32.mrf.mxu1  ;;  %v2365_v36 = vadd.f32 %v3408_v32, %v4716_v59  ;;  %2607 = vst [vmem:[%s4724_s23 + $0x30] sm:$0xff] %v2438_v33  ;;  %v2356_v39 = vpop.f32.mrf.mxu0 }
 0x5c3   : > { %2618 = vst [vmem:[%s4724_s23 + $0x88] sm:$0xff] %v2586_v31  ;;  %vm2559_vm10 = vcmp.ge.f32.partialorder %v2515_v1, 0.0  ;;  %v2575_v37 = vmul.f32 0.01, %v2515_v1  ;;  %v2507_v38 = vadd.f32 %v4716_v59, %v2506_v35  ;;  %v2436_v40 = vsel %vm2404_vm9, %v2354_v30, %v2420_v34 }
 0x5c4   : > { %vm2407_vm11 = vcmp.ge.f32.partialorder %v2365_v36, 0.0  ;;  %v2423_v41 = vmul.f32 0.01, %v2365_v36  ;;  %v3440_v42 = vpop.f32.mrf.mxu1  ;;  %v2357_v43 = vadd.f32 %v4716_v59, %v2356_v39  ;;  %2605 = vst [vmem:[%s4724_s23 + $0x20] sm:$0xff] %v2436_v40 }
 0x5c5   : > { %v2591_v9 = vsel %vm2559_vm10, %v2515_v1, %v2575_v37  ;;  %vm2557_vm12 = vcmp.ge.f32.partialorder %v2507_v38, 0.0  ;;  %v2573_v44 = vmul.f32 0.01, %v2507_v38  ;;  %v2518_v45 = vadd.f32 %v3440_v42, %v4716_v59 }
 0x5c6   : > { %2623 = vst [vmem:[%s4724_s23 + $0xb0] sm:$0xff] %v2591_v9  ;;  %v2439_v46 = vsel %vm2407_vm11, %v2365_v36, %v2423_v41  ;;  %vm2405_vm13 = vcmp.ge.f32.partialorder %v2357_v43, 0.0  ;;  %v2421_v47 = vmul.f32 0.01, %v2357_v43  ;;  %v2509_v48 = vpop.f32.mrf.mxu1 }
 0x5c7   : > { %v2589_v52 = vsel %vm2557_vm12, %v2507_v38, %v2573_v44  ;;  %2608 = vst [vmem:[%s4724_s23 + $0x38] sm:$0xff] %v2439_v46  ;;  %vm2560_vm14 = vcmp.ge.f32.partialorder %v2518_v45, 0.0  ;;  %v2576_v54 = vmul.f32 0.01, %v2518_v45  ;;  %v2510_v55 = vadd.f32 %v4716_v59, %v2509_v48  ;;  %v3411_v51 = vpop.f32.mrf.mxu0 }
 0x5c8   : > { %2621 = vst [vmem:[%s4724_s23 + $0xa0] sm:$0xff] %v2589_v52  ;;  %v2437_v17 = vsel %vm2405_vm13, %v2357_v43, %v2421_v47  ;;  %v2378_v61 = vadd.f32 %v3411_v51, %v4716_v59  ;;  %v3443_v49 = vpop.f32.mrf.mxu1 }
 0x5c9   : > { %v2592_v56 = vsel %vm2560_vm14, %v2518_v45, %v2576_v54  ;;  %2606 = vst [vmem:[%s4724_s23 + $0x28] sm:$0xff] %v2437_v17  ;;  %vm2558_vm15 = vcmp.ge.f32.partialorder %v2510_v55, 0.0  ;;  %v2574_v60 = vmul.f32 0.01, %v2510_v55  ;;  %v2531_v62 = vadd.f32 %v3443_v49, %v4716_v59  ;;  %v2369_v63 = vpop.f32.mrf.mxu0 }
 0x5ca   : > { %2624 = vst [vmem:[%s4724_s23 + $0xb8] sm:$0xff] %v2592_v56  ;;  %vm2410_vm0 = vcmp.ge.f32.partialorder %v2378_v61, 0.0  ;;  %v2426_v3 = vmul.f32 0.01, %v2378_v61  ;;  %v2370_v4 = vadd.f32 %v4716_v59, %v2369_v63  ;;  %v2522_v53 = vpop.f32.mrf.mxu1 }
 0x5cb   : > { %v2590_v2 = vsel %vm2558_vm15, %v2510_v55, %v2574_v60  ;;  %vm2563_vm1 = vcmp.ge.f32.partialorder %v2531_v62, 0.0  ;;  %v2579_v5 = vmul.f32 0.01, %v2531_v62  ;;  %v2523_v6 = vadd.f32 %v4716_v59, %v2522_v53  ;;  %v3412_v7 = vpop.f32.mrf.mxu0 }
 0x5cc   : > { %2622 = vst [vmem:[%s4724_s23 + $0xa8] sm:$0xff] %v2590_v2  ;;  %v2442_v50 = vsel %vm2410_vm0, %v2378_v61, %v2426_v3  ;;  %vm2408_vm2 = vcmp.ge.f32.partialorder %v2370_v4, 0.0  ;;  %v2424_v8 = vmul.f32 0.01, %v2370_v4  ;;  %v2381_v10 = vadd.f32 %v3412_v7, %v4716_v59  ;;  %v3444_v11 = vpop.f32.mrf.mxu1 }
 0x5cd   : > { %2611 = vst [vmem:[%s4724_s23 + $0x50] sm:$0xff] %v2442_v50  ;;  %v2595_v12 = vsel %vm2563_vm1, %v2531_v62, %v2579_v5  ;;  %vm2561_vm3 = vcmp.ge.f32.partialorder %v2523_v6, 0.0  ;;  %v2577_v13 = vmul.f32 0.01, %v2523_v6  ;;  %v2534_v14 = vadd.f32 %v3444_v11, %v4716_v59  ;;  %v2372_v15 = vpop.f32.mrf.mxu0 }
 0x5ce   : > { %2627 = vst [vmem:[%s4724_s23 + $0xd0] sm:$0xff] %v2595_v12  ;;  %v2440_v57 = vsel %vm2408_vm2, %v2370_v4, %v2424_v8  ;;  %vm2411_vm4 = vcmp.ge.f32.partialorder %v2381_v10, 0.0  ;;  %v2427_v18 = vmul.f32 0.01, %v2381_v10  ;;  %v2373_v19 = vadd.f32 %v4716_v59, %v2372_v15  ;;  %v2525_v20 = vpop.f32.mrf.mxu1 }
 0x5cf   : > { %2609 = vst [vmem:[%s4724_s23 + $0x40] sm:$0xff] %v2440_v57  ;;  %v2593_v21 = vsel %vm2561_vm3, %v2523_v6, %v2577_v13  ;;  %vm2564_vm5 = vcmp.ge.f32.partialorder %v2534_v14, 0.0  ;;  %v2580_v22 = vmul.f32 0.01, %v2534_v14  ;;  %v2526_v0 = vadd.f32 %v4716_v59, %v2525_v20  ;;  %v3415_v23 = vpop.f32.mrf.mxu0 }
 0x5d0   : > { %2625 = vst [vmem:[%s4724_s23 + $0xc0] sm:$0xff] %v2593_v21  ;;  %v2443_v24 = vsel %vm2411_vm4, %v2381_v10, %v2427_v18  ;;  %vm2409_vm6 = vcmp.ge.f32.partialorder %v2373_v19, 0.0  ;;  %v2425_v25 = vmul.f32 0.01, %v2373_v19  ;;  %v2394_v26 = vadd.f32 %v3415_v23, %v4716_v59  ;;  %v3447_v27 = vpop.f32.mrf.mxu1 }
 0x5d1   : > { %2612 = vst [vmem:[%s4724_s23 + $0x58] sm:$0xff] %v2443_v24  ;;  %v2596_v58 = vsel %vm2564_vm5, %v2534_v14, %v2580_v22  ;;  %vm2562_vm7 = vcmp.ge.f32.partialorder %v2526_v0, 0.0  ;;  %v2578_v28 = vmul.f32 0.01, %v2526_v0  ;;  %v2547_v16 = vadd.f32 %v3447_v27, %v4716_v59  ;;  %v2385_v29 = vpop.f32.mrf.mxu0 }
 0x5d2   : > { %2628 = vst [vmem:[%s4724_s23 + $0xd8] sm:$0xff] %v2596_v58  ;;  %v2441_v30 = vsel %vm2409_vm6, %v2373_v19, %v2425_v25  ;;  %vm2414_vm8 = vcmp.ge.f32.partialorder %v2394_v26, 0.0  ;;  %v2430_v31 = vmul.f32 0.01, %v2394_v26  ;;  %v2386_v1 = vadd.f32 %v4716_v59, %v2385_v29  ;;  %v2538_v32 = vpop.f32.mrf.mxu1 }
 0x5d3   : > { %2610 = vst [vmem:[%s4724_s23 + $0x48] sm:$0xff] %v2441_v30  ;;  %v2594_v33 = vsel %vm2562_vm7, %v2526_v0, %v2578_v28  ;;  %vm2567_vm9 = vcmp.ge.f32.partialorder %v2547_v16, 0.0  ;;  %v2583_v34 = vmul.f32 0.01, %v2547_v16  ;;  %v2539_v35 = vadd.f32 %v4716_v59, %v2538_v32  ;;  %v3416_v36 = vpop.f32.mrf.mxu0 }
 0x5d4   : > { %2626 = vst [vmem:[%s4724_s23 + $0xc8] sm:$0xff] %v2594_v33  ;;  %v2446_v37 = vsel %vm2414_vm8, %v2394_v26, %v2430_v31  ;;  %vm2412_vm10 = vcmp.ge.f32.partialorder %v2386_v1, 0.0  ;;  %v2428_v38 = vmul.f32 0.01, %v2386_v1  ;;  %v2397_v39 = vadd.f32 %v3416_v36, %v4716_v59  ;;  %v3448_v40 = vpop.f32.mrf.mxu1 }
 0x5d5   : > { %2615 = vst [vmem:[%s4724_s23 + $0x70] sm:$0xff] %v2446_v37  ;;  %v2599_v41 = vsel %vm2567_vm9, %v2547_v16, %v2583_v34  ;;  %vm2565_vm11 = vcmp.ge.f32.partialorder %v2539_v35, 0.0  ;;  %v2581_v42 = vmul.f32 0.01, %v2539_v35  ;;  %v2550_v43 = vadd.f32 %v3448_v40, %v4716_v59  ;;  %v2388_v9 = vpop.f32.mrf.mxu0 }
 0x5d6   : > { %2631 = vst [vmem:[%s4724_s23 + $0xf0] sm:$0xff] %v2599_v41  ;;  %v2444_v44 = vsel %vm2412_vm10, %v2386_v1, %v2428_v38  ;;  %vm2415_vm12 = vcmp.ge.f32.partialorder %v2397_v39, 0.0  ;;  %v2431_v45 = vmul.f32 0.01, %v2397_v39  ;;  %v2389_v46 = vadd.f32 %v4716_v59, %v2388_v9  ;;  %v2541_v47 = vpop.f32.mrf.mxu1 }
 0x5d7   : > { %2613 = vst [vmem:[%s4724_s23 + $0x60] sm:$0xff] %v2444_v44  ;;  %v2597_v48 = vsel %vm2565_vm11, %v2539_v35, %v2581_v42  ;;  %vm2568_vm13 = vcmp.ge.f32.partialorder %v2550_v43, 0.0  ;;  %v2584_v52 = vmul.f32 0.01, %v2550_v43  ;;  %v2542_v54 = vadd.f32 %v4716_v59, %v2541_v47 }
 0x5d8   : > { %2629 = vst [vmem:[%s4724_s23 + $0xe0] sm:$0xff] %v2597_v48  ;;  %v2447_v55 = vsel %vm2415_vm12, %v2397_v39, %v2431_v45  ;;  %vm2413_vm14 = vcmp.ge.f32.partialorder %v2389_v46, 0.0  ;;  %v2429_v17 = vmul.f32 0.01, %v2389_v46  ;;  %2640 = sbr.rel (!%p4894_p6) target bundleno = 1529 (0x5f9), region = 104 }
 0x5d9   : > { %2616 = vst [vmem:[%s4724_s23 + $0x78] sm:$0xff] %v2447_v55  ;;  %v2600_v51 = vsel %vm2568_vm13, %v2550_v43, %v2584_v52  ;;  %vm2566_vm15 = vcmp.ge.f32.partialorder %v2542_v54, 0.0  ;;  %v2582_v56 = vmul.f32 0.01, %v2542_v54 }
 0x5da   : > { %2632 = vst [vmem:[%s4724_s23 + $0xf8] sm:$0xff] %v2600_v51  ;;  %v2445_v60 = vsel %vm2413_vm14, %v2389_v46, %v2429_v17 }
 0x5db   : > { %2614 = vst [vmem:[%s4724_s23 + $0x68] sm:$0xff] %v2445_v60  ;;  %v2598_v61 = vsel %vm2566_vm15, %v2542_v54, %v2582_v56 }
 0x5dc   : > { %2630 = vst [vmem:[%s4724_s23 + $0xe8] sm:$0xff] %v2598_v61 }
 0x5dd   : > { %s4908_s20 = smov (!%p2643_p10, %s2642_s20), 32 }
 0x5de   : > { %s4790_s15 = sshll.u32 %s4908_s20, 7 }
 0x5df   : > { %s2647_s12 = ssub.s32 4096, %s4790_s15 }
 0x5e0   : > { %2648 = vsyncadd %s2634_s30, %s2647_s12  ;;  %p2865_p4 = scmp.ne.s32.totalorder %s4790_s15, 0  ;;  %s2872_s14 = sshll.u32 %s4224_s29, 12 }
 0x5e1   : > { %s4895_s1 = sld [smem:[#allocation27_spill]]  ;;  %s2653_s25 = sshll.u32 %s4724_s23, 4  ;;  %s4803_s25 = int_to_ptr.vmem [resolvable:$true] %s2653_s25 }
 0x5e2   : > { %s4041_s17 = scalar_lea.vmem %s4803_s25, %s4790_s15  ;;  %s4130_s24 = smov [#allocation14]  }
 0x5e3   : > { %p4042_p1 = scmp.ne.s32.totalorder %s4803_s25, %s4041_s17  ;;  %s4045_s19 = sshll.u32 %s4130_s24, 4  ;;  %s4046_s19 = int_to_ptr.vmem [resolvable:$false] %s4045_s19 }
 0x5e4   : > { %s4047_s29 = scalar_lea.vmem %s4046_s19, 8192  ;;  %p4048_p7 = scmp.lt.s32.totalorder %s4803_s25, %s4046_s19 }
 0x5e5   : > { %p4043_p0 = pnand %p4042_p1, %p2865_p4  ;;  %p4049_p9 = scmp.lt.s32.totalorder %s4047_s29, %s4041_s17 }
 0x5e7   : > { %s4800_s16 = scalar_lea.hbm %s4895_s1, %s2872_s14  ;;  %p4044_p2 = pneg %p4043_p0 }
 0x5e8   : > { %p4050_p12 = por %p4049_p9, %p4048_p7 }
 0x5ea   : > { %p4051_p13 = pnand %p4050_p12, %p4044_p2 }
 0x5ec   : > { %4054 = shalt.err (!%p4051_p13)
}
 0x5ed   : > { %s4055_s23 = scalar_lea.hbm %s4800_s16, %s4790_s15  ;;  %s4059_s12 = scalar_lea.hbm %s4895_s1, 8064 }
 0x5ee   : > { %p4056_p5 = scmp.ne.s32.totalorder %s4800_s16, %s4055_s23  ;;  %p4060_p11 = scmp.lt.s32.totalorder %s4800_s16, %s4895_s1 }
 0x5ef   : > { %p4061_p6 = scmp.lt.s32.totalorder %s4059_s12, %s4055_s23 }
 0x5f0   : > { %p4057_p3 = pnand %p4056_p5, %p2865_p4 }
 0x5f1   : > { %p4062_p10 = por %p4061_p6, %p4060_p11 }
 0x5f2   : > { %p4058_p8 = pneg %p4057_p3 }
 0x5f4   : > { %p4063_p1 = pnand %p4062_p10, %p4058_p8 }
 0x5f6   : > { %4066 = shalt.err (!%p4063_p1)
}
 0x5f7   : > { %s4131_s18 = smov 128   ;;  %s4132_s17 = smov 8  }
 0x5f8   : > { %2659 = dma.vmem_to_hbm [thread:$0]  (%p2865_p4), %s4803_s25, %s4790_s15, %s4800_s16, %s2634_s30, %s4131_s18, %s4131_s18, %s4132_s17  }
 0x5f9 PF: > { %s4896_s24 = sld [smem:[#allocation20_spill]]  ;;  %p4899_p2 = scmp.ge.s32.totalorder %s4117_s28, 2 }
 0x5fa   : > { %s4897_s19 = sld [smem:[#allocation24_spill]] }
 0x5ff   : > { %s2668_s29 = sand.u32 1, %s4896_s24  }
 0x600   : > { %p4898_p0 = scmp.ne.s32.totalorder %s4897_s19, 0  ;;  %s2669_s23 = scalar_lea.sflag [#allocation4], %s2668_s29 }
 0x602   : > { %p3495_p7 = pnand %p4899_p2, %p4898_p0 }
 0x604   : > { %p3496_p9 = pneg %p3495_p7 }
 0x606   : > { %4100 = dma.done.wait (%p3496_p9), %s2669_s23, 4096  }
 0x607   : > { %4102 = vsyncadd (%p3496_p9), %s2669_s23, 4294963200  ;;  %s4900_s28 = sld [smem:[#allocation21_spill]]  ;;  %s4902_s25 = smov %s4109_s26 }
 0x608   : > { %s4901_s22 = sld [smem:[#allocation22_spill]]  ;;  %s4903_s26 = smov %s4113_s27 }
 0x60d   : > { %p29_p12 = scmp.ge.s32.totalorder %s4900_s28, 4  }
 0x60e   : > { %s4904_s27 = smov %s4901_s22 }
 0x60f   :  { %31 = sbr.rel (!%p29_p12) target bundleno = 12 (0xc), region = 141 }
 0x614   :  { %2674 = vsyncpa [#allocation3], 1 }
 0x615   :  { %2676 = vsyncpa [#allocation3 + $0x1], 1 }
 0x616   :  { %2677 = vsyncpa [#allocation6], 1 }
 0x617   :  { %2678 = vsyncpa [#allocation9], 1 }
 0x618   :  { %2679 = vsyncpa [#allocation12], 1 }
 0x619   :  { %2680 = vsyncpa [#allocation4], 1 }
 0x61a   :  { %2682 = vsyncpa [#allocation4 + $0x1], 1 }

// kernel: tpu_custom_call.1
= control target key start
LH: loop header
LB: loop body
LE: loop exit
PB: predicated region body
PF: predicated region fallthrough
CT: control target
= control target key end

     0   :  { %s4848_s0 = inlined_call_operand.hbm [shape: f32[500,128], index: 0, kind: input, shape index: {}]   ;;  %s4849_s1 = inlined_call_operand.hbm [shape: bf16[128,128], index: 1, kind: input, shape index: {}]   ;;  %s4850_s2 = inlined_call_operand.vmem [shape: f32[1,128], index: 2, kind: input, shape index: {}]   ;;  %s4851_s3 = inlined_call_operand.hbm [shape: bf16[128,128], index: 3, kind: input, shape index: {}]   ;;  %s4852_s4 = inlined_call_operand.vmem [shape: f32[1,128], index: 4, kind: input, shape index: {}]   ;;  %s4853_s5 = inlined_call_operand.hbm [shape: bf16[128,128], index: 5, kind: input, shape index: {}]   ;;  %s4854_s6 = inlined_call_operand.vmem [shape: f32[1,128], index: 6, kind: input, shape index: {}]   ;;  %s4855_s7 = inlined_call_operand.hbm [shape: bf16[128,128], index: 7, kind: input, shape index: {}]   ;;  %s4856_s8 = inlined_call_operand.vmem [shape: f32[1,128], index: 8, kind: input, shape index: {}]   ;;  %s4857_s9 = inlined_call_operand.hbm [shape: bf16[128,128], index: 9, kind: input, shape index: {}]   ;;  %s4858_s10 = inlined_call_operand.vmem [shape: f32[1,128], index: 10, kind: input, shape index: {}]   ;;  %s4859_s11 = inlined_call_operand.hbm [shape: bf16[128,128], index: 11, kind: input, shape index: {}]   ;;  %s4860_s12 = inlined_call_operand.vmem [shape: f32[1,128], index: 12, kind: input, shape index: {}]   ;;  %s4861_s13 = inlined_call_operand.hbm [shape: f32[500,128], index: 13, kind: output, shape index: {}]  }
   0x1   :  { %4870 = sst [smem:[#allocation25_spill]] %s4849_s1 }
   0x2   :  { %4871 = sst [smem:[#allocation26_spill]] %s4860_s12 }
   0x3   :  { %4872 = sst [smem:[#allocation27_spill]] %s4861_s13 }
   0x4   :  { %18 = vsyncpa [#allocation3], 0 }
   0x5   :  { %20 = vsyncpa [#allocation3 + $0x1], 0 }
   0x6   :  { %21 = vsyncpa [#allocation6], 0 }
   0x7   :  { %22 = vsyncpa [#allocation9], 0 }
   0x8   :  { %23 = vsyncpa [#allocation12], 0 }
   0x9   :  { %24 = vsyncpa [#allocation4], 0 }
   0xa   :  { %26 = vsyncpa [#allocation4 + $0x1], 0  ;;  %s4203_s25 = smov 0   ;;  %s4205_s26 = smov 0  }
   0xb   :  { %s4207_s27 = smov 0   ;;  %s4209_s28 = smov 0  }
   0xc LB: > { %4873 = sst [smem:[#allocation20_spill]] %s4105_s25  ;;  %s4224_s29 = sadd.s32 4294967295, %s4117_s28   ;;  %s4117_s28 = sphi %s4209_s28, %s4900_s28   ;;  %s4113_s27 = sphi %s4207_s27, %s4904_s27   ;;  %s4109_s26 = sphi %s4205_s26, %s4903_s26   ;;  %s4105_s25 = sphi %s4203_s25, %s4902_s25  }
   0xd   : > { %s2783_s30 = sadd.s32 4294967294, %s4117_s28   ;;  %s4228_s14 = sadd.s32 1, %s4117_s28  }
   0xe   : > { %4874 = sst [smem:[#allocation21_spill]] %s4228_s14  ;;  %s39_s15 = sadd.s32 1, %s4113_s27 }
   0xf   : > { %s36_s16 = ssub.s32 %s4117_s28, %s4228_s14  ;;  %p46_p0 = scmp.ne.s32.totalorder %s4113_s27, %s4109_s26 }
  0x10   : > { %p37_p1 = scmp.eq.s32.totalorder %s36_s16, 0  ;;  %p47_p2 = scmp.eq.s32.totalorder %s4117_s28, 0 }
  0x11   : > { %p52_p3 = scmp.ne.s32.totalorder %s4109_s26, %s4105_s25  ;;  %p4864_p4 = scmp.eq.s32.totalorder %s4224_s29, 0 }
  0x12   : > { %s4240_s17 = scalar_select %p37_p1, %s4113_s27, %s39_s15  }
  0x13   : > { %p4242_p5 = por %p47_p2, %p46_p0  ;;  %p4248_p6 = por %p4864_p4, %p52_p3 }
  0x14   : > { %4875 = sst [smem:[#allocation22_spill]] %s4240_s17  ;;  %p328_p7 = scmp.eq.s32.totalorder %s4224_s29, 1 }
  0x15   : > { %p334_p8 = scmp.eq.s32.totalorder %s2783_s30, 1  ;;  %p2784_p9 = scmp.ge.s32.totalorder %s4117_s28, 1 }
  0x16   : > { %p341_p10 = scmp.lt.s32.totalorder %s4117_s28, 3  ;;  %p4255_p11 = por %p328_p7, %p46_p0 }
  0x17   : > { %p4259_p12 = por %p334_p8, %p52_p3  ;;  %s4119_s23 = smov [#allocation5]  }
  0x18   : > { %s4878_s20 = scalar_select %p4255_p11, 1, 0 }
  0x19   : > { %s4880_s21 = scalar_select %p4259_p12, 1, 0 }
  0x1a   : > { %4879 = sst [smem:[#allocation23_spill]] %s4878_s20  ;;  %p4263_p13 = pnand %p2784_p9, %p341_p10 }
  0x1b   : > { %4881 = sst [smem:[#allocation24_spill]] %s4880_s21  ;;  %s353_s24 = sshll.u32 %s4119_s23, 4  ;;  %s354_s24 = int_to_ptr.vmem [resolvable:$true] %s353_s24 }
  0x1c   : > { %p3475_p1 = pneg %p4263_p13  ;;  %s4120_s15 = smov [#allocation8]  }
  0x1d   : > { %s385_s16 = sshll.u32 %s4120_s15, 4  ;;  %s3870_s14 = scalar_lea.vmem %s354_s24, 1024  ;;  %s386_s16 = int_to_ptr.vmem [resolvable:$true] %s385_s16 }
  0x1e   : > { %p4271_p2 = pnand %p3475_p1, %p4864_p4  ;;  %p3871_p3 = scmp.ne.s32.totalorder %s354_s24, %s3870_s14 }
  0x1f   : > { %p3878_p9 = scmp.lt.s32.totalorder %s354_s24, %s354_s24  ;;  %p3879_p10 = scmp.lt.s32.totalorder %s3870_s14, %s3870_s14 }
  0x20   : > { %p4277_p0 = pneg %p4271_p2 }
  0x21   : > { %p3880_p1 = por %p3879_p10, %p3878_p9 }
  0x22   : > { %p3873_p7 = pnand %p3871_p3, %p4277_p0 }
  0x24   : > { %p3874_p8 = pneg %p3873_p7 }
  0x26   : > { %p3881_p4 = pnand %p3880_p1, %p3874_p8 }
  0x28   : > { %3884 = shalt.err (!%p3881_p4)
}
  0x29   : > { %s4121_s23 = smov 64   ;;  %s4122_s15 = smov 4  }
  0x2a   : > { %s4885_s1 = sld [smem:[#allocation25_spill]]  ;;  %s3896_s13 = scalar_lea.vmem %s386_s16, 1024 }
  0x2b   : > { %p3897_p3 = scmp.ne.s32.totalorder %s386_s16, %s3896_s13  ;;  %p3904_p9 = scmp.lt.s32.totalorder %s386_s16, %s386_s16 }
  0x2c   : > { %p3905_p8 = scmp.lt.s32.totalorder %s3896_s13, %s3896_s13 }
  0x2d   : > { %p3899_p7 = pnand %p3897_p3, %p4277_p0 }
  0x2e   : > { %p3906_p4 = por %p3905_p8, %p3904_p9 }
  0x2f   : > { %p3900_p12 = pneg %p3899_p7 }
  0x30   : > { %3478 = dma.hbm_to_vmem [thread:$0]  (!%p4271_p2), %s4885_s1, 1024, %s354_s24, [#allocation6], %s4121_s23, %s4121_s23, %s4122_s15  }
  0x31   : > { %p3907_p10 = pnand %p3906_p4, %p3900_p12 }
  0x33   : > { %3910 = shalt.err (!%p3907_p10)
}
  0x34   : > { %3484 = dma.hbm_to_vmem [thread:$0]  (!%p4271_p2), %s4853_s5, 1024, %s386_s16, [#allocation9], %s4121_s23, %s4121_s23, %s4122_s15  }
  0x35   : > { %s4123_s25 = smov [#allocation11]   ;;  %s4124_s24 = smov [#allocation7]  }
  0x36   : > { %s417_s21 = sshll.u32 %s4123_s25, 4  ;;  %s369_s1 = sshll.u32 %s4124_s24, 4  ;;  %s418_s21 = int_to_ptr.vmem [resolvable:$true] %s417_s21  ;;  %s370_s1 = int_to_ptr.vmem [resolvable:$true] %s369_s1 }
  0x37   : > { %s3922_s12 = scalar_lea.vmem %s418_s21, 1024  ;;  %p3930_p7 = scmp.lt.s32.totalorder %s418_s21, %s418_s21 }
  0x38   : > { %p3923_p1 = scmp.ne.s32.totalorder %s418_s21, %s3922_s12  ;;  %p3931_p9 = scmp.lt.s32.totalorder %s3922_s12, %s3922_s12 }
  0x3a   : > { %p3925_p12 = pnand %p3923_p1, %p4277_p0  ;;  %p3932_p8 = por %p3931_p9, %p3930_p7 }
  0x3c   : > { %p3926_p3 = pneg %p3925_p12 }
  0x3e   : > { %p3933_p4 = pnand %p3932_p8, %p3926_p3 }
  0x40   : > { %3936 = shalt.err (!%p3933_p4)
}
  0x41   : > { %3490 = dma.hbm_to_vmem [thread:$0]  (!%p4271_p2), %s4857_s9, 1024, %s418_s21, [#allocation12], %s4121_s23, %s4121_s23, %s4122_s15  }
  0x42   : > { %s3948_s16 = scalar_lea.vmem %s370_s1, 1024  ;;  %p3956_p11 = scmp.lt.s32.totalorder %s370_s1, %s370_s1 }
  0x43   : > { %p3949_p10 = scmp.ne.s32.totalorder %s370_s1, %s3948_s16  ;;  %p3957_p7 = scmp.lt.s32.totalorder %s3948_s16, %s3948_s16 }
  0x45   : > { %p3951_p1 = pnand %p3949_p10, %p4277_p0  ;;  %p3958_p3 = por %p3957_p7, %p3956_p11 }
  0x47   : > { %p3952_p12 = pneg %p3951_p1 }
  0x49   : > { %p3959_p9 = pnand %p3958_p3, %p3952_p12 }
  0x4b   : > { %3962 = shalt.err (!%p3959_p9)
}
  0x4c   : > { %3481 = dma.hbm_to_vmem [thread:$0]  (!%p4271_p2), %s4851_s3, 1024, %s370_s1, [#allocation6], %s4121_s23, %s4121_s23, %s4122_s15  }
  0x4d   : > { %s4125_s25 = smov [#allocation10]   ;;  %s4126_s24 = smov [#allocation13]  }
  0x4e   : > { %s401_s21 = sshll.u32 %s4125_s25, 4  ;;  %s433_s13 = sshll.u32 %s4126_s24, 4  ;;  %s402_s21 = int_to_ptr.vmem [resolvable:$true] %s401_s21  ;;  %s434_s13 = int_to_ptr.vmem [resolvable:$true] %s433_s13 }
  0x4f   : > { %s3974_s20 = scalar_lea.vmem %s402_s21, 1024  ;;  %p3982_p10 = scmp.lt.s32.totalorder %s402_s21, %s402_s21 }
  0x50   : > { %p3975_p8 = scmp.ne.s32.totalorder %s402_s21, %s3974_s20  ;;  %p3983_p1 = scmp.lt.s32.totalorder %s3974_s20, %s3974_s20 }
  0x52   : > { %p3977_p11 = pnand %p3975_p8, %p4277_p0  ;;  %p3984_p12 = por %p3983_p1, %p3982_p10 }
  0x54   : > { %p3978_p4 = pneg %p3977_p11 }
  0x56   : > { %p3985_p7 = pnand %p3984_p12, %p3978_p4 }
  0x58   : > { %3988 = shalt.err (!%p3985_p7)
}
  0x59   : > { %3487 = dma.hbm_to_vmem [thread:$0]  (!%p4271_p2), %s4855_s7, 1024, %s402_s21, [#allocation9], %s4121_s23, %s4121_s23, %s4122_s15  }
  0x5a   : > { %s4000_s12 = scalar_lea.vmem %s434_s13, 1024  ;;  %p4008_p11 = scmp.lt.s32.totalorder %s434_s13, %s434_s13 }
  0x5b   : > { %p4001_p3 = scmp.ne.s32.totalorder %s434_s13, %s4000_s12  ;;  %p4009_p10 = scmp.lt.s32.totalorder %s4000_s12, %s4000_s12 }
  0x5d   : > { %p4003_p9 = pnand %p4001_p3, %p4277_p0  ;;  %p4010_p4 = por %p4009_p10, %p4008_p11 }
  0x5f   : > { %p4004_p8 = pneg %p4003_p9 }
  0x61   : > { %p4011_p1 = pnand %p4010_p4, %p4004_p8 }
  0x63   : > { %4014 = shalt.err (!%p4011_p1)
}
  0x64   : > { %3493 = dma.hbm_to_vmem [thread:$0]  (!%p4271_p2), %s4859_s11, 1024, %s434_s13, [#allocation12], %s4121_s23, %s4121_s23, %s4122_s15  }
  0x65   : > { %p4869_p12 = scmp.ge.s32.totalorder %s4117_s28, 2 }
  0x67   : > { %446 = sbr.rel (%p4869_p12) target bundleno = 140 (0x8c), region = 64 }
  0x6c   : > { %449 = sbr.rel (!%p4242_p5) target bundleno = 140 (0x8c), region = 68  ;;  %s450_s17 = sand.u32 (%p4242_p5), 1, %s4113_s27  }
  0x6d   : > { %s2793_s21 = sshll.u32 (%p4242_p5), %s4117_s28, 5  ;;  %s2792_s30 = sshll.u32 (%p4242_p5), %s450_s17, 8 }
  0x6e   : > { %s456_s24 = ssub.s32 (%p4242_p5), 63, %s2793_s21  ;;  %s4351_s15 = scalar_lea.sflag (%p4242_p5), [#allocation3], %s450_s17 }
  0x6f   : > { %p457_p0 = scmp.lt.s32.totalorder (%p4242_p5), %s456_s24, 32  ;;  %s454_s13 = scalar_lea.vmem (%p4242_p5), [#allocation2], %s2792_s30 }
  0x71   : > { %s4906_s24 = smov (!%p457_p0, %s456_s24), 32 }
  0x72   : > { %s4348_s20 = sshll.u32 %s4906_s24, 7 }
  0x73   : > { %s461_s23 = ssub.s32 4096, %s4348_s20 }
  0x74   : > { %462 = vsyncadd %s4351_s15, %s461_s23  ;;  %p2795_p5 = scmp.ne.s32.totalorder %s4348_s20, 0  ;;  %s2871_s18 = sshll.u32 %s4117_s28, 12 }
  0x75   : > { %s4359_s12 = scalar_lea.hbm %s4848_s0, %s2871_s18  ;;  %s467_s14 = sshll.u32 %s454_s13, 4  ;;  %s4361_s14 = int_to_ptr.vmem [resolvable:$true] %s467_s14 }
  0x76   : > { %s4015_s25 = scalar_lea.hbm %s4359_s12, %s4348_s20  ;;  %s4019_s30 = scalar_lea.hbm %s4848_s0, 8064 }
  0x77   : > { %p4016_p2 = scmp.ne.s32.totalorder %s4359_s12, %s4015_s25  ;;  %p4020_p9 = scmp.lt.s32.totalorder %s4359_s12, %s4848_s0 }
  0x78   : > { %p4021_p8 = scmp.lt.s32.totalorder %s4019_s30, %s4015_s25 }
  0x79   : > { %p4017_p7 = pnand %p4016_p2, %p2795_p5 }
  0x7a   : > { %p4022_p11 = por %p4021_p8, %p4020_p9 }
  0x7b   : > { %p4018_p3 = pneg %p4017_p7 }
  0x7d   : > { %p4023_p10 = pnand %p4022_p11, %p4018_p3 }
  0x7f   : > { %4026 = shalt.err (!%p4023_p10)
}
  0x80   : > { %s4027_s13 = scalar_lea.vmem %s4361_s14, %s4348_s20  ;;  %s4127_s18 = smov [#allocation2]  }
  0x81   : > { %p4028_p4 = scmp.ne.s32.totalorder %s4361_s14, %s4027_s13  ;;  %s4031_s1 = sshll.u32 %s4127_s18, 4  ;;  %s4032_s1 = int_to_ptr.vmem [resolvable:$false] %s4031_s1 }
  0x82   : > { %s4033_s16 = scalar_lea.vmem %s4032_s1, 8192  ;;  %p4034_p2 = scmp.lt.s32.totalorder %s4361_s14, %s4032_s1 }
  0x83   : > { %p4029_p1 = pnand %p4028_p4, %p2795_p5  ;;  %p4035_p7 = scmp.lt.s32.totalorder %s4033_s16, %s4027_s13 }
  0x85   : > { %p4030_p0 = pneg %p4029_p1  ;;  %p4036_p12 = por %p4035_p7, %p4034_p2 }
  0x87   : > { %p4037_p9 = pnand %p4036_p12, %p4030_p0 }
  0x89   : > { %4040 = shalt.err (!%p4037_p9)
}
  0x8a   : > { %s4128_s25 = smov 128   ;;  %s4129_s17 = smov 8  }
  0x8b   : > { %473 = dma.hbm_to_vmem [thread:$0]  (%p2795_p5), %s4359_s12, %s4348_s20, %s4361_s14, %s4351_s15, %s4128_s25, %s4128_s25, %s4129_s17  }
  0x8c PF: > { %479 = sbr.rel (%p4263_p13) target bundleno = 1529 (0x5f9), region = 72  ;;  %s4390_s21 = sand.u32 (!%p4263_p13), 1, %s4109_s26  }
  0x8d   : > { %s2800_s30 = sshll.u32 (!%p4263_p13), %s4390_s21, 8  ;;  %s482_s24 = scalar_lea.sflag (!%p4263_p13), [#allocation3], %s4390_s21 }
  0x8e   : > { %s4396_s23 = scalar_lea.vmem (!%p4263_p13), [#allocation2], %s2800_s30 }
  0x91   : > { %4084 = dma.done.wait (%p4248_p6), %s482_s24, 4096  }
  0x92   : > { %4086 = vsyncadd (%p4248_p6), %s482_s24, 4294963200  ;;  %p4886_p12 = scmp.eq.s32.totalorder %s4224_s29, 0 }
  0x94   : > { %4088 = dma.done.wait (%p4886_p12), [#allocation6], 2048   ;;  %p4887_p13 = pmov %p4886_p12 }
  0x95   : > { %p4888_p5 = pmov %p4886_p12 }
  0x96   : > { %4090 = vsyncadd (%p4887_p13), [#allocation6], 4294965248 }
  0x97   : > { %4092 = dma.done.wait (%p4888_p5), [#allocation9], 2048   ;;  %p4889_p3 = pmov %p4888_p5 }
  0x99   : > { %4094 = vsyncadd (%p4889_p3), [#allocation9], 4294965248  ;;  %p4890_p8 = pmov %p4889_p3 }
  0x9a   : > { %p4891_p11 = pmov %p4889_p3 }
  0x9b   : > { %4096 = dma.done.wait (%p4890_p8), [#allocation12], 2048  }
  0x9c   : > { %4098 = vsyncadd (%p4891_p11), [#allocation12], 4294965248  ;;  %v3555_v0 = vld [vmem:[#allocation5 + $0x38] sm:$0xff]   ;;  %v3556_v1 = vld [vmem:[#allocation5 + $0x30] sm:$0xff]   ;;  %s4892_s24 = sld [smem:[#allocation26_spill]] }
  0x9d   : > { %3065 = vmatprep.subr.bf16.mxu0 %v3555_v0  ;;  %3097 = vmatprep.subr.bf16.mxu1 %v3555_v0  ;;  %v3557_v2 = vld [vmem:[#allocation5 + $0x28] sm:$0xff]   ;;  %v3558_v3 = vld [vmem:[#allocation5 + $0x20] sm:$0xff]   ;;  %v3559_v10 = vld [vmem:[#allocation5 + $0x18] sm:$0xff]   ;;  %s4893_s19 = sld [smem:[#allocation23_spill]] }
  0x9e   : > { %3066 = vmatpush3.bf16.msra.mxu0 %v3555_v0  ;;  %3098 = vmatpush3.bf16.msra.mxu1 %v3555_v0  ;;  %v563_v4 = vld [vmem:[%s4396_s23] sm:$0xff]  ;;  %v564_v5 = vld [vmem:[%s4396_s23 + $0x8] sm:$0xff]  ;;  %v3560_v11 = vld [vmem:[#allocation5 + $0x10] sm:$0xff]  }
  0x9f   : > { %3067 = vmatprep.subr.bf16.mxu0 %v3556_v1  ;;  %3099 = vmatprep.subr.bf16.mxu1 %v3556_v1  ;;  %v579_v6 = vld [vmem:[%s4396_s23 + $0x80] sm:$0xff]  ;;  %v595_v7 = vpack.c.bf16 %v564_v5, %v563_v4  ;;  %v580_v8 = vld [vmem:[%s4396_s23 + $0x88] sm:$0xff]  ;;  %v565_v14 = vld [vmem:[%s4396_s23 + $0x10] sm:$0xff] }
  0xa0   : > { %v787_v9 = vpack.c.bf16 %v580_v8, %v579_v6  ;;  %v3561_v12 = vld [vmem:[#allocation5 + $0x8] sm:$0xff]   ;;  %v3562_v13 = vld [vmem:[#allocation5] sm:$0xff]   ;;  %v566_v15 = vld [vmem:[%s4396_s23 + $0x18] sm:$0xff] }
  0xa1   : > { %3081 = vmatprep.mubr.bf16.mxu0 %v595_v7  ;;  %v581_v16 = vld [vmem:[%s4396_s23 + $0x90] sm:$0xff]  ;;  %v582_v17 = vld [vmem:[%s4396_s23 + $0x98] sm:$0xff]  ;;  %v567_v18 = vld [vmem:[%s4396_s23 + $0x20] sm:$0xff]  ;;  %v596_v23 = vpack.c.bf16 %v566_v15, %v565_v14 }
  0xa2   : > { %3068 = vmatpush3.bf16.msra.mxu0 %v3556_v1  ;;  %3100 = vmatpush3.bf16.msra.mxu1 %v3556_v1  ;;  %v568_v19 = vld [vmem:[%s4396_s23 + $0x28] sm:$0xff]  ;;  %v583_v20 = vld [vmem:[%s4396_s23 + $0xa0] sm:$0xff]  ;;  %v3563_v22 = vld [vmem:[#allocation7 + $0x38] sm:$0xff]   ;;  %v788_v24 = vpack.c.bf16 %v582_v17, %v581_v16 }
  0xa3   : > { %3069 = vmatprep.subr.bf16.mxu0 %v3557_v2  ;;  %3101 = vmatprep.subr.bf16.mxu1 %v3557_v2  ;;  %v584_v21 = vld [vmem:[%s4396_s23 + $0xa8] sm:$0xff]  ;;  %v597_v25 = vpack.c.bf16 %v568_v19, %v567_v18  ;;  %v3564_v27 = vld [vmem:[#allocation7 + $0x30] sm:$0xff]   ;;  %v570_v29 = vld [vmem:[%s4396_s23 + $0x38] sm:$0xff]  ;;  %p4894_p6 = scmp.ne.s32.totalorder %s4893_s19, 0 }
  0xa4   : > { %3113 = vmatprep.mubr.bf16.mxu1 %v787_v9  ;;  %v789_v26 = vpack.c.bf16 %v584_v21, %v583_v20  ;;  %v569_v28 = vld [vmem:[%s4396_s23 + $0x30] sm:$0xff]  ;;  %v586_v31 = vld [vmem:[%s4396_s23 + $0xb8] sm:$0xff]  ;;  %v571_v32 = vld [vmem:[%s4396_s23 + $0x40] sm:$0xff]  ;;  %s2863_s22 = sshll.u32 (%p4894_p6), %s4224_s29, 5 }
  0xa5   : > { %v585_v30 = vld [vmem:[%s4396_s23 + $0xb0] sm:$0xff]  ;;  %v572_v33 = vld [vmem:[%s4396_s23 + $0x48] sm:$0xff]  ;;  %v587_v34 = vld [vmem:[%s4396_s23 + $0xc0] sm:$0xff]  ;;  %v598_v36 = vpack.c.bf16 %v570_v29, %v569_v28  ;;  %s2642_s20 = ssub.s32 (%p4894_p6), 63, %s2863_s22 }
  0xa6   : > { %3070 = vmatpush3.bf16.msra.mxu0 %v3557_v2  ;;  %3102 = vmatpush3.bf16.msra.mxu1 %v3557_v2  ;;  %v588_v35 = vld [vmem:[%s4396_s23 + $0xc8] sm:$0xff]  ;;  %v790_v37 = vpack.c.bf16 %v586_v31, %v585_v30  ;;  %v599_v38 = vpack.c.bf16 %v572_v33, %v571_v32  ;;  %v573_v40 = vld [vmem:[%s4396_s23 + $0x50] sm:$0xff]  ;;  %v574_v41 = vld [vmem:[%s4396_s23 + $0x58] sm:$0xff]  ;;  %p2643_p10 = scmp.lt.s32.totalorder (%p4894_p6), %s2642_s20, 32 }
  0xa7   : > { %3071 = vmatprep.subr.bf16.mxu0 %v3558_v3  ;;  %3103 = vmatprep.subr.bf16.mxu1 %v3558_v3  ;;  %v791_v39 = vpack.c.bf16 %v588_v35, %v587_v34  ;;  %v589_v42 = vld [vmem:[%s4396_s23 + $0xd0] sm:$0xff]  ;;  %v590_v43 = vld [vmem:[%s4396_s23 + $0xd8] sm:$0xff]  ;;  %v575_v44 = vld [vmem:[%s4396_s23 + $0x60] sm:$0xff]  ;;  %v600_v48 = vpack.c.bf16 %v574_v41, %v573_v40 }
  0xa8   : > { %v576_v45 = vld [vmem:[%s4396_s23 + $0x68] sm:$0xff]  ;;  %v591_v46 = vld [vmem:[%s4396_s23 + $0xe0] sm:$0xff]  ;;  %v792_v49 = vpack.c.bf16 %v590_v43, %v589_v42  ;;  %v577_v52 = vld [vmem:[%s4396_s23 + $0x70] sm:$0xff] }
  0xa9   : > { %v592_v47 = vld [vmem:[%s4396_s23 + $0xe8] sm:$0xff]  ;;  %v601_v50 = vpack.c.bf16 %v576_v45, %v575_v44  ;;  %v578_v53 = vld [vmem:[%s4396_s23 + $0x78] sm:$0xff]  ;;  %v593_v54 = vld [vmem:[%s4396_s23 + $0xf0] sm:$0xff] }
  0xaa   : > { %3072 = vmatpush3.bf16.msra.mxu0 %v3558_v3  ;;  %3104 = vmatpush3.bf16.msra.mxu1 %v3558_v3  ;;  %v793_v51 = vpack.c.bf16 %v592_v47, %v591_v46  ;;  %v594_v55 = vld [vmem:[%s4396_s23 + $0xf8] sm:$0xff]  ;;  %v602_v56 = vpack.c.bf16 %v578_v53, %v577_v52  ;;  %v3565_v58 = vld [vmem:[#allocation7 + $0x28] sm:$0xff]   ;;  %v3566_v59 = vld [vmem:[#allocation7 + $0x20] sm:$0xff]   ;;  %s4724_s23 = scalar_lea.vmem [#allocation14], %s2800_s30  ;;  %s2634_s30 = scalar_lea.sflag [#allocation4], %s4390_s21 }
  0xab   : > { %3073 = vmatprep.subr.bf16.mxu0 %v3559_v10  ;;  %3105 = vmatprep.subr.bf16.mxu1 %v3559_v10  ;;  %v794_v57 = vpack.c.bf16 %v594_v55, %v593_v54  ;;  %v3567_v60 = vld [vmem:[#allocation7 + $0x18] sm:$0xff]   ;;  %v3568_v61 = vld [vmem:[#allocation7 + $0x10] sm:$0xff]   ;;  %v3569_v62 = vld [vmem:[#allocation7 + $0x8] sm:$0xff]  }
  0xac   : > { %v3570_v63 = vld [vmem:[#allocation7] sm:$0xff]   ;;  %v4446_v0 = vld [vmem:[#allocation8 + $0x38] sm:$0xff]  }
  0xad   : > { %v4453_v1 = vld [vmem:[%s4850_s2] ss:$0 sm:$0xff] }
  0xae   : > { %3074 = vmatpush3.bf16.msra.mxu0 %v3559_v10  ;;  %3106 = vmatpush3.bf16.msra.mxu1 %v3559_v10 }
  0xaf   : > { %3075 = vmatprep.subr.bf16.mxu0 %v3560_v11  ;;  %3107 = vmatprep.subr.bf16.mxu1 %v3560_v11 }
  0xb2   : > { %3076 = vmatpush3.bf16.msra.mxu0 %v3560_v11  ;;  %3108 = vmatpush3.bf16.msra.mxu1 %v3560_v11 }
  0xb3   : > { %3077 = vmatprep.subr.bf16.mxu0 %v3561_v12  ;;  %3109 = vmatprep.subr.bf16.mxu1 %v3561_v12 }
  0xb6   : > { %3078 = vmatpush3.bf16.msra.mxu0 %v3561_v12  ;;  %3110 = vmatpush3.bf16.msra.mxu1 %v3561_v12 }
  0xb7   : > { %3079 = vmatprep.subr.bf16.mxu0 %v3562_v13  ;;  %3111 = vmatprep.subr.bf16.mxu1 %v3562_v13 }
  0xba   : > { %3080 = vmatpush3.bf16.msra.mxu0 %v3562_v13  ;;  %3112 = vmatpush3.bf16.msra.mxu1 %v3562_v13 }
  0xbb   : > { %3129 = vmatprep.subr.bf16.mxu0 %v3563_v22  ;;  %3161 = vmatprep.subr.bf16.mxu1 %v3563_v22 }
  0xbd   : > { %3082 = vmatmul.mubr.bf16.vlgmr.msra.gmra.mxu0 %v596_v23  ;;  %3114 = vmatmul.mubr.bf16.vlgmr.msra.gmra.mxu1 %v788_v24 }
  0xbe   : > { %3085 = vmatprep.mubr.bf16.mxu0 %v597_v25  ;;  %3117 = vmatprep.mubr.bf16.mxu1 %v789_v26 }
  0xbf   : > { %3130 = vmatpush3.bf16.msra.mxu0 %v3563_v22  ;;  %3162 = vmatpush3.bf16.msra.mxu1 %v3563_v22 }
  0xc0   : > { %3131 = vmatprep.subr.bf16.mxu0 %v3564_v27  ;;  %3163 = vmatprep.subr.bf16.mxu1 %v3564_v27 }
  0xc3   : > { %3132 = vmatpush3.bf16.msra.mxu0 %v3564_v27  ;;  %3164 = vmatpush3.bf16.msra.mxu1 %v3564_v27 }
  0xc4   : > { %3133 = vmatprep.subr.bf16.mxu0 %v3565_v58  ;;  %3165 = vmatprep.subr.bf16.mxu1 %v3565_v58 }
  0xc5   : > { %3086 = vmatmul.mubr.bf16.gmra.mxu0 %v598_v36  ;;  %3118 = vmatmul.mubr.bf16.gmra.mxu1 %v790_v37 }
  0xc6   : > { %3089 = vmatprep.mubr.bf16.mxu0 %v599_v38  ;;  %3121 = vmatprep.mubr.bf16.mxu1 %v791_v39 }
  0xc7   : > { %3134 = vmatpush3.bf16.msra.mxu0 %v3565_v58  ;;  %3166 = vmatpush3.bf16.msra.mxu1 %v3565_v58 }
  0xc8   : > { %3135 = vmatprep.subr.bf16.mxu0 %v3566_v59  ;;  %3167 = vmatprep.subr.bf16.mxu1 %v3566_v59 }
  0xcb   : > { %3136 = vmatpush3.bf16.msra.mxu0 %v3566_v59  ;;  %3168 = vmatpush3.bf16.msra.mxu1 %v3566_v59 }
  0xcc   : > { %3137 = vmatprep.subr.bf16.mxu0 %v3567_v60  ;;  %3169 = vmatprep.subr.bf16.mxu1 %v3567_v60 }
  0xcd   : > { %3090 = vmatmul.mubr.bf16.gmra.mxu0 %v600_v48  ;;  %3122 = vmatmul.mubr.bf16.gmra.mxu1 %v792_v49 }
  0xce   : > { %3093 = vmatprep.mubr.bf16.mxu0 %v601_v50  ;;  %3125 = vmatprep.mubr.bf16.mxu1 %v793_v51 }
  0xcf   : > { %3138 = vmatpush3.bf16.msra.mxu0 %v3567_v60  ;;  %3170 = vmatpush3.bf16.msra.mxu1 %v3567_v60 }
  0xd0   : > { %3139 = vmatprep.subr.bf16.mxu0 %v3568_v61  ;;  %3171 = vmatprep.subr.bf16.mxu1 %v3568_v61 }
  0xd3   : > { %3140 = vmatpush3.bf16.msra.mxu0 %v3568_v61  ;;  %3172 = vmatpush3.bf16.msra.mxu1 %v3568_v61 }
  0xd4   : > { %3141 = vmatprep.subr.bf16.mxu0 %v3569_v62  ;;  %3173 = vmatprep.subr.bf16.mxu1 %v3569_v62 }
  0xd5   : > { %3094 = vmatmul.mubr.bf16.gmra.mxu0 %v602_v56  ;;  %3126 = vmatmul.mubr.bf16.gmra.mxu1 %v794_v57 }
  0xd7   : > { %3142 = vmatpush3.bf16.msra.mxu0 %v3569_v62  ;;  %3174 = vmatpush3.bf16.msra.mxu1 %v3569_v62 }
  0xd8   : > { %3143 = vmatprep.subr.bf16.mxu0 %v3570_v63  ;;  %3175 = vmatprep.subr.bf16.mxu1 %v3570_v63 }
  0xdb   : > { %3144 = vmatpush3.bf16.msra.mxu0 %v3570_v63  ;;  %3176 = vmatpush3.bf16.msra.mxu1 %v3570_v63  ;;  %v3572_v63 = vld [vmem:[#allocation8 + $0x30] sm:$0xff]  }
  0xdc   : > { %3193 = vmatprep.subr.bf16.mxu0 %v4446_v0  ;;  %3225 = vmatprep.subr.bf16.mxu1 %v4446_v0 }
 0x17d   : > { %v3083_v2 = vpop.f32.mrf.mxu0  ;;  %v3115_v3 = vpop.f32.mrf.mxu1 }
 0x17e   : > { %v717_v4 = vadd.f32 %v3083_v2, %v4453_v1  ;;  %v838_v15 = vadd.f32 %v3115_v3, %v4453_v1 }
 0x17f   : > { %v708_v5 = vpop.f32.mrf.mxu0  ;;  %v829_v6 = vpop.f32.mrf.mxu1 }
 0x180   : > { %v709_v7 = vadd.f32 %v4453_v1, %v708_v5  ;;  %v830_v8 = vadd.f32 %v4453_v1, %v829_v6  ;;  %3603 = vtanh.f32 %v717_v4 }
 0x181   : > { %v3084_v9 = vpop.f32.mrf.mxu0  ;;  %v3116_v10 = vpop.f32.mrf.mxu1 }
 0x182   : > { %3605 = vtanh.f32 %v709_v7  ;;  %v720_v11 = vadd.f32 %v3084_v9, %v4453_v1  ;;  %v841_v12 = vadd.f32 %v3116_v10, %v4453_v1 }
 0x183   : > { %3607 = vtanh.f32 %v830_v8  ;;  %v711_v13 = vpop.f32.mrf.mxu0  ;;  %v832_v14 = vpop.f32.mrf.mxu1 }
 0x184   : > { %3609 = vtanh.f32 %v720_v11  ;;  %v712_v16 = vadd.f32 %v4453_v1, %v711_v13  ;;  %v833_v17 = vadd.f32 %v4453_v1, %v832_v14 }
 0x185   : > { %3611 = vtanh.f32 %v841_v12  ;;  %v3087_v18 = vpop.f32.mrf.mxu0  ;;  %v3119_v19 = vpop.f32.mrf.mxu1 }
 0x186   : > { %3613 = vtanh.f32 %v712_v16  ;;  %v733_v20 = vadd.f32 %v3087_v18, %v4453_v1  ;;  %v854_v31 = vadd.f32 %v3119_v19, %v4453_v1 }
 0x187   : > { %3615 = vtanh.f32 %v833_v17  ;;  %v724_v21 = vpop.f32.mrf.mxu0  ;;  %v845_v22 = vpop.f32.mrf.mxu1 }
 0x188   : > { %3617 = vtanh.f32 %v838_v15  ;;  %v725_v23 = vadd.f32 %v4453_v1, %v724_v21  ;;  %v846_v24 = vadd.f32 %v4453_v1, %v845_v22 }
 0x189   : > { %3619 = vtanh.f32 %v733_v20  ;;  %v3088_v25 = vpop.f32.mrf.mxu0  ;;  %v3120_v26 = vpop.f32.mrf.mxu1 }
 0x18a   : > { %3621 = vtanh.f32 %v725_v23  ;;  %v736_v27 = vadd.f32 %v3088_v25, %v4453_v1  ;;  %v857_v28 = vadd.f32 %v3120_v26, %v4453_v1 }
 0x18b   : > { %3623 = vtanh.f32 %v846_v24  ;;  %v727_v29 = vpop.f32.mrf.mxu0  ;;  %v848_v30 = vpop.f32.mrf.mxu1 }
 0x18c   : > { %3625 = vtanh.f32 %v736_v27  ;;  %v728_v32 = vadd.f32 %v4453_v1, %v727_v29  ;;  %v849_v33 = vadd.f32 %v4453_v1, %v848_v30 }
 0x18d   : > { %3627 = vtanh.f32 %v857_v28  ;;  %v3091_v34 = vpop.f32.mrf.mxu0  ;;  %v3123_v35 = vpop.f32.mrf.mxu1 }
 0x18e   : > { %v3604_v36 = vpop.eup %3603  ;;  %3629 = vtanh.f32 %v728_v32  ;;  %v749_v37 = vadd.f32 %v3091_v34, %v4453_v1  ;;  %v870_v51 = vadd.f32 %v3123_v35, %v4453_v1 }
 0x18f   : > { %v3606_v38 = vpop.eup %3605  ;;  %3631 = vtanh.f32 %v849_v33  ;;  %v740_v39 = vpop.f32.mrf.mxu0 }
 0x190   : > { %v861_v40 = vpop.f32.mrf.mxu1  ;;  %v3608_v41 = vpop.eup %3607  ;;  %3633 = vtanh.f32 %v854_v31  ;;  %v741_v42 = vadd.f32 %v4453_v1, %v740_v39 }
 0x191   : > { %v862_v43 = vadd.f32 %v4453_v1, %v861_v40  ;;  %v3610_v44 = vpop.eup %3609  ;;  %3635 = vtanh.f32 %v749_v37  ;;  %v3092_v45 = vpop.f32.mrf.mxu0 }
 0x192   : > { %v3124_v46 = vpop.f32.mrf.mxu1  ;;  %v3612_v47 = vpop.eup %3611  ;;  %3637 = vtanh.f32 %v741_v42  ;;  %v752_v48 = vadd.f32 %v3092_v45, %v4453_v1  ;;  %v909_v62 = vpack.c.bf16 %v3610_v44, %v3604_v36 }
 0x193   : > { %v873_v49 = vadd.f32 %v3124_v46, %v4453_v1  ;;  %v3614_v50 = vpop.eup %3613  ;;  %3639 = vtanh.f32 %v862_v43  ;;  %v743_v52 = vpop.f32.mrf.mxu0 }
 0x194   : > { %v864_v53 = vpop.f32.mrf.mxu1  ;;  %v3616_v54 = vpop.eup %3615  ;;  %3641 = vtanh.f32 %v752_v48  ;;  %v744_v55 = vadd.f32 %v4453_v1, %v743_v52  ;;  %v908_v57 = vpack.c.bf16 %v3614_v50, %v3606_v38  ;;  %v3574_v52 = vld [vmem:[#allocation8 + $0x20] sm:$0xff]  }
 0x195   : > { %v865_v56 = vadd.f32 %v4453_v1, %v864_v53  ;;  %v3618_v58 = vpop.eup %3617  ;;  %3643 = vtanh.f32 %v873_v49  ;;  %v3095_v59 = vpop.f32.mrf.mxu0  ;;  %v1100_v61 = vpack.c.bf16 %v3616_v54, %v3608_v41  ;;  %v3575_v53 = vld [vmem:[#allocation8 + $0x18] sm:$0xff]   ;;  %v3576_v54 = vld [vmem:[#allocation8 + $0x10] sm:$0xff]  }
 0x196   : > { %v3127_v60 = vpop.f32.mrf.mxu1  ;;  %v3620_v2 = vpop.eup %3619  ;;  %3645 = vtanh.f32 %v744_v55  ;;  %v765_v3 = vadd.f32 %v3095_v59, %v4453_v1  ;;  %3145 = vmatprep.mubr.bf16.mxu0 %v908_v57  ;;  %v1101_v4 = vpack.c.bf16 %v3612_v47, %v3618_v58  ;;  %v3577_v55 = vld [vmem:[#allocation8 + $0x8] sm:$0xff]   ;;  %v4489_v57 = vld [vmem:[#allocation10 + $0x38] sm:$0xff]   ;;  %v4496_v58 = vld [vmem:[%s4852_s4] ss:$0 sm:$0xff] }
 0x197   : > { %v3622_v5 = vpop.eup %3621  ;;  %3647 = vtanh.f32 %v865_v56  ;;  %3177 = vmatprep.mubr.bf16.mxu1 %v1100_v61  ;;  %v756_v6 = vpop.f32.mrf.mxu0  ;;  %3146 = vmatmul.mubr.bf16.vlgmr.msra.gmra.mxu0 %v909_v62  ;;  %v886_v18 = vadd.f32 %v3127_v60, %v4453_v1  ;;  %v3578_v56 = vld [vmem:[#allocation8] sm:$0xff]  }
 0x198   : > { %v877_v7 = vpop.f32.mrf.mxu1  ;;  %v3624_v8 = vpop.eup %3623  ;;  %3649 = vtanh.f32 %v870_v51  ;;  %v757_v9 = vadd.f32 %v4453_v1, %v756_v6  ;;  %3178 = vmatmul.mubr.bf16.vlgmr.msra.gmra.mxu1 %v1101_v4  ;;  %3194 = vmatpush3.bf16.msra.mxu0 %v4446_v0  ;;  %v3573_v51 = vld [vmem:[#allocation8 + $0x28] sm:$0xff]  }
 0x199   : > { %v878_v10 = vadd.f32 %v4453_v1, %v877_v7  ;;  %v3626_v11 = vpop.eup %3625  ;;  %3651 = vtanh.f32 %v765_v3  ;;  %v3096_v12 = vpop.f32.mrf.mxu0  ;;  %3226 = vmatpush3.bf16.msra.mxu1 %v4446_v0  ;;  %3195 = vmatprep.subr.bf16.mxu0 %v3572_v63 }
 0x19a   : > { %v3128_v13 = vpop.f32.mrf.mxu1  ;;  %v3628_v14 = vpop.eup %3627  ;;  %3653 = vtanh.f32 %v757_v9  ;;  %v768_v15 = vadd.f32 %v3096_v12, %v4453_v1  ;;  %3227 = vmatprep.subr.bf16.mxu1 %v3572_v63  ;;  %v911_v26 = vpack.c.bf16 %v3626_v11, %v3620_v2 }
 0x19b   : > { %v889_v16 = vadd.f32 %v3128_v13, %v4453_v1  ;;  %v3630_v17 = vpop.eup %3629  ;;  %3655 = vtanh.f32 %v878_v10  ;;  %v759_v19 = vpop.f32.mrf.mxu0 }
 0x19c   : > { %v880_v20 = vpop.f32.mrf.mxu1  ;;  %v3632_v21 = vpop.eup %3631  ;;  %3657 = vtanh.f32 %v768_v15  ;;  %v760_v22 = vadd.f32 %v4453_v1, %v759_v19  ;;  %v910_v23 = vpack.c.bf16 %v3630_v17, %v3622_v5  ;;  %3196 = vmatpush3.bf16.msra.mxu0 %v3572_v63 }
 0x19d   : > { %v881_v0 = vadd.f32 %v4453_v1, %v880_v20  ;;  %v3634_v24 = vpop.eup %3633  ;;  %3659 = vtanh.f32 %v889_v16  ;;  %v1102_v25 = vpack.c.bf16 %v3632_v21, %v3624_v8  ;;  %3228 = vmatpush3.bf16.msra.mxu1 %v3572_v63  ;;  %3197 = vmatprep.subr.bf16.mxu0 %v3573_v51 }
 0x19e   : > { %v3636_v27 = vpop.eup %3635  ;;  %3661 = vtanh.f32 %v760_v22  ;;  %3149 = vmatprep.mubr.bf16.mxu0 %v910_v23  ;;  %v1103_v28 = vpack.c.bf16 %v3628_v14, %v3634_v24  ;;  %3229 = vmatprep.subr.bf16.mxu1 %v3573_v51 }
 0x19f   : > { %v3638_v29 = vpop.eup %3637  ;;  %3663 = vtanh.f32 %v881_v0  ;;  %3181 = vmatprep.mubr.bf16.mxu1 %v1102_v25  ;;  %3150 = vmatmul.mubr.bf16.gmra.mxu0 %v911_v26 }
 0x1a0   : > { %v3640_v30 = vpop.eup %3639  ;;  %3665 = vtanh.f32 %v886_v18  ;;  %3182 = vmatmul.mubr.bf16.gmra.mxu1 %v1103_v28  ;;  %3198 = vmatpush3.bf16.msra.mxu0 %v3573_v51 }
 0x1a1   : > { %v3642_v31 = vpop.eup %3641  ;;  %3230 = vmatpush3.bf16.msra.mxu1 %v3573_v51  ;;  %3199 = vmatprep.subr.bf16.mxu0 %v3574_v52 }
 0x1a2   : > { %v3644_v1 = vpop.eup %3643  ;;  %v913_v37 = vpack.c.bf16 %v3642_v31, %v3636_v27  ;;  %3231 = vmatprep.subr.bf16.mxu1 %v3574_v52 }
 0x1a3   : > { %v3646_v32 = vpop.eup %3645 }
 0x1a4   : > { %v3648_v33 = vpop.eup %3647  ;;  %v912_v34 = vpack.c.bf16 %v3646_v32, %v3638_v29  ;;  %3200 = vmatpush3.bf16.msra.mxu0 %v3574_v52 }
 0x1a5   : > { %v3650_v35 = vpop.eup %3649  ;;  %v1104_v36 = vpack.c.bf16 %v3648_v33, %v3640_v30  ;;  %3232 = vmatpush3.bf16.msra.mxu1 %v3574_v52  ;;  %3201 = vmatprep.subr.bf16.mxu0 %v3575_v53 }
 0x1a6   : > { %v3652_v38 = vpop.eup %3651  ;;  %3153 = vmatprep.mubr.bf16.mxu0 %v912_v34  ;;  %v1105_v39 = vpack.c.bf16 %v3644_v1, %v3650_v35  ;;  %3233 = vmatprep.subr.bf16.mxu1 %v3575_v53 }
 0x1a7   : > { %v3654_v40 = vpop.eup %3653  ;;  %3185 = vmatprep.mubr.bf16.mxu1 %v1104_v36  ;;  %3154 = vmatmul.mubr.bf16.gmra.mxu0 %v913_v37 }
 0x1a8   : > { %v3656_v41 = vpop.eup %3655  ;;  %3186 = vmatmul.mubr.bf16.gmra.mxu1 %v1105_v39  ;;  %3202 = vmatpush3.bf16.msra.mxu0 %v3575_v53 }
 0x1a9   : > { %v3658_v42 = vpop.eup %3657  ;;  %3234 = vmatpush3.bf16.msra.mxu1 %v3575_v53  ;;  %3203 = vmatprep.subr.bf16.mxu0 %v3576_v54 }
 0x1aa   : > { %v3660_v43 = vpop.eup %3659  ;;  %v915_v49 = vpack.c.bf16 %v3658_v42, %v3652_v38  ;;  %3235 = vmatprep.subr.bf16.mxu1 %v3576_v54 }
 0x1ab   : > { %v3662_v44 = vpop.eup %3661 }
 0x1ac   : > { %v3664_v45 = vpop.eup %3663  ;;  %v914_v46 = vpack.c.bf16 %v3662_v44, %v3654_v40  ;;  %3204 = vmatpush3.bf16.msra.mxu0 %v3576_v54 }
 0x1ad   : > { %v3666_v47 = vpop.eup %3665  ;;  %v1106_v48 = vpack.c.bf16 %v3664_v45, %v3656_v41  ;;  %3236 = vmatpush3.bf16.msra.mxu1 %v3576_v54  ;;  %3205 = vmatprep.subr.bf16.mxu0 %v3577_v55 }
 0x1ae   : > { %3157 = vmatprep.mubr.bf16.mxu0 %v914_v46  ;;  %v1107_v50 = vpack.c.bf16 %v3660_v43, %v3666_v47  ;;  %3237 = vmatprep.subr.bf16.mxu1 %v3577_v55 }
 0x1af   : > { %3189 = vmatprep.mubr.bf16.mxu1 %v1106_v48  ;;  %3158 = vmatmul.mubr.bf16.gmra.mxu0 %v915_v49 }
 0x1b0   : > { %3190 = vmatmul.mubr.bf16.gmra.mxu1 %v1107_v50  ;;  %3206 = vmatpush3.bf16.msra.mxu0 %v3577_v55 }
 0x1b1   : > { %3238 = vmatpush3.bf16.msra.mxu1 %v3577_v55  ;;  %3207 = vmatprep.subr.bf16.mxu0 %v3578_v56  ;;  %v3580_v55 = vld [vmem:[#allocation10 + $0x30] sm:$0xff]  }
 0x1b2   : > { %3239 = vmatprep.subr.bf16.mxu1 %v3578_v56 }
 0x1b4   : > { %3208 = vmatpush3.bf16.msra.mxu0 %v3578_v56 }
 0x1b5   : > { %3240 = vmatpush3.bf16.msra.mxu1 %v3578_v56  ;;  %3257 = vmatprep.subr.bf16.mxu0 %v4489_v57 }
 0x1b6   : > { %3289 = vmatprep.subr.bf16.mxu1 %v4489_v57 }
 0x257   : > { %v3147_v59 = vpop.f32.mrf.mxu0 }
 0x258   : > { %v1030_v60 = vadd.f32 %v3147_v59, %v4496_v58  ;;  %v3179_v61 = vpop.f32.mrf.mxu1 }
 0x259   : > { %v1021_v62 = vpop.f32.mrf.mxu0  ;;  %v1151_v9 = vadd.f32 %v3179_v61, %v4496_v58 }
 0x25a   : > { %v1022_v63 = vadd.f32 %v4496_v58, %v1021_v62  ;;  %v1142_v2 = vpop.f32.mrf.mxu1  ;;  %3667 = vtanh.f32 %v1030_v60 }
 0x25b   : > { %v1143_v3 = vadd.f32 %v4496_v58, %v1142_v2  ;;  %v3148_v4 = vpop.f32.mrf.mxu0 }
 0x25c   : > { %3669 = vtanh.f32 %v1022_v63  ;;  %v1033_v5 = vadd.f32 %v3148_v4, %v4496_v58  ;;  %v3180_v6 = vpop.f32.mrf.mxu1 }
 0x25d   : > { %3671 = vtanh.f32 %v1143_v3  ;;  %v1154_v7 = vadd.f32 %v3180_v6, %v4496_v58  ;;  %v1024_v8 = vpop.f32.mrf.mxu0 }
 0x25e   : > { %3673 = vtanh.f32 %v1033_v5  ;;  %v1025_v10 = vadd.f32 %v4496_v58, %v1024_v8  ;;  %v1145_v11 = vpop.f32.mrf.mxu1  ;;  %v3581_v8 = vld [vmem:[#allocation10 + $0x28] sm:$0xff]  }
 0x25f   : > { %3675 = vtanh.f32 %v1154_v7  ;;  %v1146_v12 = vadd.f32 %v4496_v58, %v1145_v11  ;;  %v3151_v13 = vpop.f32.mrf.mxu0 }
 0x260   : > { %3677 = vtanh.f32 %v1025_v10  ;;  %v1046_v14 = vadd.f32 %v3151_v13, %v4496_v58  ;;  %v3183_v15 = vpop.f32.mrf.mxu1 }
 0x261   : > { %3679 = vtanh.f32 %v1146_v12  ;;  %v1037_v16 = vpop.f32.mrf.mxu0  ;;  %v1167_v24 = vadd.f32 %v3183_v15, %v4496_v58 }
 0x262   : > { %3681 = vtanh.f32 %v1151_v9  ;;  %v1038_v17 = vadd.f32 %v4496_v58, %v1037_v16  ;;  %v1158_v18 = vpop.f32.mrf.mxu1 }
 0x263   : > { %3683 = vtanh.f32 %v1046_v14  ;;  %v1159_v19 = vadd.f32 %v4496_v58, %v1158_v18  ;;  %v3152_v20 = vpop.f32.mrf.mxu0 }
 0x264   : > { %3685 = vtanh.f32 %v1038_v17  ;;  %v1049_v21 = vadd.f32 %v3152_v20, %v4496_v58  ;;  %v3184_v22 = vpop.f32.mrf.mxu1 }
 0x265   : > { %3687 = vtanh.f32 %v1159_v19  ;;  %v1170_v0 = vadd.f32 %v3184_v22, %v4496_v58  ;;  %v1040_v23 = vpop.f32.mrf.mxu0 }
 0x266   : > { %3689 = vtanh.f32 %v1049_v21  ;;  %v1041_v25 = vadd.f32 %v4496_v58, %v1040_v23  ;;  %v1161_v26 = vpop.f32.mrf.mxu1 }
 0x267   : > { %3691 = vtanh.f32 %v1170_v0  ;;  %v1162_v27 = vadd.f32 %v4496_v58, %v1161_v26  ;;  %v3155_v28 = vpop.f32.mrf.mxu0  ;;  %v3668_v29 = vpop.eup %3667  ;;  %v3582_v0 = vld [vmem:[#allocation10 + $0x20] sm:$0xff]  }
 0x268   : > { %3693 = vtanh.f32 %v1041_v25  ;;  %v1062_v30 = vadd.f32 %v3155_v28, %v4496_v58  ;;  %v3187_v31 = vpop.f32.mrf.mxu1 }
 0x269   : > { %v3670_v1 = vpop.eup %3669  ;;  %3695 = vtanh.f32 %v1162_v27  ;;  %v1053_v32 = vpop.f32.mrf.mxu0  ;;  %v1183_v46 = vadd.f32 %v3187_v31, %v4496_v58 }
 0x26a   : > { %v3672_v33 = vpop.eup %3671  ;;  %3697 = vtanh.f32 %v1167_v24  ;;  %v1054_v34 = vadd.f32 %v4496_v58, %v1053_v32  ;;  %v1174_v35 = vpop.f32.mrf.mxu1 }
 0x26b   : > { %v3674_v36 = vpop.eup %3673  ;;  %3699 = vtanh.f32 %v1062_v30  ;;  %v1175_v37 = vadd.f32 %v4496_v58, %v1174_v35  ;;  %v3156_v38 = vpop.f32.mrf.mxu0 }
 0x26c   : > { %v3676_v39 = vpop.eup %3675  ;;  %3701 = vtanh.f32 %v1054_v34  ;;  %v1065_v40 = vadd.f32 %v3156_v38, %v4496_v58  ;;  %v3188_v41 = vpop.f32.mrf.mxu1  ;;  %v1222_v54 = vpack.c.bf16 %v3674_v36, %v3668_v29 }
 0x26d   : > { %v3678_v42 = vpop.eup %3677  ;;  %3703 = vtanh.f32 %v1175_v37  ;;  %v1186_v43 = vadd.f32 %v3188_v41, %v4496_v58  ;;  %v1056_v44 = vpop.f32.mrf.mxu0 }
 0x26e   : > { %v3680_v45 = vpop.eup %3679  ;;  %3705 = vtanh.f32 %v1065_v40  ;;  %v1057_v47 = vadd.f32 %v4496_v58, %v1056_v44  ;;  %v1177_v48 = vpop.f32.mrf.mxu1  ;;  %v1221_v49 = vpack.c.bf16 %v3678_v42, %v3670_v1 }
 0x26f   : > { %v3682_v50 = vpop.eup %3681  ;;  %3707 = vtanh.f32 %v1186_v43  ;;  %v1178_v51 = vadd.f32 %v4496_v58, %v1177_v48  ;;  %v3159_v52 = vpop.f32.mrf.mxu0  ;;  %v1445_v53 = vpack.c.bf16 %v3680_v45, %v3672_v33  ;;  %v3585_v48 = vld [vmem:[#allocation10 + $0x8] sm:$0xff]  }
 0x270   : > { %v3684_v56 = vpop.eup %3683  ;;  %3709 = vtanh.f32 %v1057_v47  ;;  %v1078_v59 = vadd.f32 %v3159_v52, %v4496_v58  ;;  %v3191_v60 = vpop.f32.mrf.mxu1  ;;  %3209 = vmatprep.mubr.bf16.mxu0 %v1221_v49  ;;  %v1446_v61 = vpack.c.bf16 %v3676_v39, %v3682_v50  ;;  %v3584_v47 = vld [vmem:[#allocation10 + $0x10] sm:$0xff]   ;;  %v3586_v49 = vld [vmem:[#allocation10] sm:$0xff]   ;;  %v4532_v50 = vld [vmem:[#allocation11 + $0x38] sm:$0xff]  }
 0x271   : > { %v3686_v62 = vpop.eup %3685  ;;  %3711 = vtanh.f32 %v1178_v51  ;;  %3241 = vmatprep.mubr.bf16.mxu1 %v1445_v53  ;;  %v1069_v63 = vpop.f32.mrf.mxu0  ;;  %3210 = vmatmul.mubr.bf16.vlgmr.msra.gmra.mxu0 %v1222_v54  ;;  %v1199_v16 = vadd.f32 %v3191_v60, %v4496_v58  ;;  %v4539_v51 = vld [vmem:[%s4854_s6] ss:$0 sm:$0xff] }
 0x272   : > { %v3688_v2 = vpop.eup %3687  ;;  %3713 = vtanh.f32 %v1183_v46  ;;  %v1070_v3 = vadd.f32 %v4496_v58, %v1069_v63  ;;  %v1190_v4 = vpop.f32.mrf.mxu1  ;;  %3242 = vmatmul.mubr.bf16.vlgmr.msra.gmra.mxu1 %v1446_v61  ;;  %3258 = vmatpush3.bf16.msra.mxu0 %v4489_v57 }
 0x273   : > { %v3690_v5 = vpop.eup %3689  ;;  %3715 = vtanh.f32 %v1078_v59  ;;  %v1191_v6 = vadd.f32 %v4496_v58, %v1190_v4  ;;  %v3160_v7 = vpop.f32.mrf.mxu0  ;;  %3290 = vmatpush3.bf16.msra.mxu1 %v4489_v57  ;;  %3259 = vmatprep.subr.bf16.mxu0 %v3580_v55 }
 0x274   : > { %v3692_v9 = vpop.eup %3691  ;;  %3717 = vtanh.f32 %v1070_v3  ;;  %v1081_v10 = vadd.f32 %v3160_v7, %v4496_v58  ;;  %v3192_v11 = vpop.f32.mrf.mxu1  ;;  %3291 = vmatprep.subr.bf16.mxu1 %v3580_v55  ;;  %v1224_v22 = vpack.c.bf16 %v3690_v5, %v3684_v56 }
 0x275   : > { %v3694_v12 = vpop.eup %3693  ;;  %3719 = vtanh.f32 %v1191_v6  ;;  %v1202_v13 = vadd.f32 %v3192_v11, %v4496_v58  ;;  %v1072_v14 = vpop.f32.mrf.mxu0 }
 0x276   : > { %v3696_v15 = vpop.eup %3695  ;;  %3721 = vtanh.f32 %v1081_v10  ;;  %v1073_v17 = vadd.f32 %v4496_v58, %v1072_v14  ;;  %v1193_v57 = vpop.f32.mrf.mxu1  ;;  %v1223_v18 = vpack.c.bf16 %v3694_v12, %v3686_v62  ;;  %3260 = vmatpush3.bf16.msra.mxu0 %v3580_v55 }
 0x277   : > { %v3698_v19 = vpop.eup %3697  ;;  %3723 = vtanh.f32 %v1202_v13  ;;  %v1194_v20 = vadd.f32 %v4496_v58, %v1193_v57  ;;  %v1447_v21 = vpack.c.bf16 %v3696_v15, %v3688_v2  ;;  %3292 = vmatpush3.bf16.msra.mxu1 %v3580_v55  ;;  %3261 = vmatprep.subr.bf16.mxu0 %v3581_v8  ;;  %v3583_v58 = vld [vmem:[#allocation10 + $0x18] sm:$0xff]  }
 0x278   : > { %v3700_v23 = vpop.eup %3699  ;;  %3725 = vtanh.f32 %v1073_v17  ;;  %3213 = vmatprep.mubr.bf16.mxu0 %v1223_v18  ;;  %v1448_v24 = vpack.c.bf16 %v3692_v9, %v3698_v19  ;;  %3293 = vmatprep.subr.bf16.mxu1 %v3581_v8 }
 0x279   : > { %v3702_v25 = vpop.eup %3701  ;;  %3727 = vtanh.f32 %v1194_v20  ;;  %3245 = vmatprep.mubr.bf16.mxu1 %v1447_v21  ;;  %3214 = vmatmul.mubr.bf16.gmra.mxu0 %v1224_v22 }
 0x27a   : > { %v3704_v26 = vpop.eup %3703  ;;  %3729 = vtanh.f32 %v1199_v16  ;;  %3246 = vmatmul.mubr.bf16.gmra.mxu1 %v1448_v24  ;;  %3262 = vmatpush3.bf16.msra.mxu0 %v3581_v8 }
 0x27b   : > { %v3706_v27 = vpop.eup %3705  ;;  %3294 = vmatpush3.bf16.msra.mxu1 %v3581_v8  ;;  %3263 = vmatprep.subr.bf16.mxu0 %v3582_v0 }
 0x27c   : > { %v3708_v28 = vpop.eup %3707  ;;  %3295 = vmatprep.subr.bf16.mxu1 %v3582_v0  ;;  %v1226_v33 = vpack.c.bf16 %v3706_v27, %v3700_v23 }
 0x27d   : > { %v3710_v29 = vpop.eup %3709 }
 0x27e   : > { %v3712_v30 = vpop.eup %3711  ;;  %v1225_v31 = vpack.c.bf16 %v3710_v29, %v3702_v25  ;;  %3264 = vmatpush3.bf16.msra.mxu0 %v3582_v0 }
 0x27f   : > { %v3714_v1 = vpop.eup %3713  ;;  %v1449_v32 = vpack.c.bf16 %v3712_v30, %v3704_v26  ;;  %3296 = vmatpush3.bf16.msra.mxu1 %v3582_v0  ;;  %3265 = vmatprep.subr.bf16.mxu0 %v3583_v58 }
 0x280   : > { %v3716_v34 = vpop.eup %3715  ;;  %3217 = vmatprep.mubr.bf16.mxu0 %v1225_v31  ;;  %v1450_v35 = vpack.c.bf16 %v3708_v28, %v3714_v1  ;;  %3297 = vmatprep.subr.bf16.mxu1 %v3583_v58 }
 0x281   : > { %v3718_v36 = vpop.eup %3717  ;;  %3249 = vmatprep.mubr.bf16.mxu1 %v1449_v32  ;;  %3218 = vmatmul.mubr.bf16.gmra.mxu0 %v1226_v33 }
 0x282   : > { %v3720_v37 = vpop.eup %3719  ;;  %3250 = vmatmul.mubr.bf16.gmra.mxu1 %v1450_v35  ;;  %3266 = vmatpush3.bf16.msra.mxu0 %v3583_v58 }
 0x283   : > { %v3722_v38 = vpop.eup %3721  ;;  %3298 = vmatpush3.bf16.msra.mxu1 %v3583_v58  ;;  %3267 = vmatprep.subr.bf16.mxu0 %v3584_v47 }
 0x284   : > { %v3724_v39 = vpop.eup %3723  ;;  %v1228_v45 = vpack.c.bf16 %v3722_v38, %v3716_v34  ;;  %3299 = vmatprep.subr.bf16.mxu1 %v3584_v47  ;;  %v3588_v34 = vld [vmem:[#allocation11 + $0x30] sm:$0xff]  }
 0x285   : > { %v3726_v40 = vpop.eup %3725 }
 0x286   : > { %v3728_v41 = vpop.eup %3727  ;;  %v1227_v42 = vpack.c.bf16 %v3726_v40, %v3718_v36  ;;  %3268 = vmatpush3.bf16.msra.mxu0 %v3584_v47 }
 0x287   : > { %v3730_v43 = vpop.eup %3729  ;;  %v1451_v44 = vpack.c.bf16 %v3728_v41, %v3720_v37  ;;  %3300 = vmatpush3.bf16.msra.mxu1 %v3584_v47  ;;  %3269 = vmatprep.subr.bf16.mxu0 %v3585_v48 }
 0x288   : > { %3221 = vmatprep.mubr.bf16.mxu0 %v1227_v42  ;;  %v1452_v46 = vpack.c.bf16 %v3724_v39, %v3730_v43  ;;  %3301 = vmatprep.subr.bf16.mxu1 %v3585_v48 }
 0x289   : > { %3253 = vmatprep.mubr.bf16.mxu1 %v1451_v44  ;;  %3222 = vmatmul.mubr.bf16.gmra.mxu0 %v1228_v45 }
 0x28a   : > { %3254 = vmatmul.mubr.bf16.gmra.mxu1 %v1452_v46  ;;  %3270 = vmatpush3.bf16.msra.mxu0 %v3585_v48 }
 0x28b   : > { %3302 = vmatpush3.bf16.msra.mxu1 %v3585_v48  ;;  %3271 = vmatprep.subr.bf16.mxu0 %v3586_v49 }
 0x28c   : > { %3303 = vmatprep.subr.bf16.mxu1 %v3586_v49 }
 0x28e   : > { %3272 = vmatpush3.bf16.msra.mxu0 %v3586_v49 }
 0x28f   : > { %3304 = vmatpush3.bf16.msra.mxu1 %v3586_v49  ;;  %3321 = vmatprep.subr.bf16.mxu0 %v4532_v50 }
 0x290   : > { %3353 = vmatprep.subr.bf16.mxu1 %v4532_v50 }
 0x331   : > { %v3211_v52 = vpop.f32.mrf.mxu0 }
 0x332   : > { %v3243_v53 = vpop.f32.mrf.mxu1  ;;  %v1343_v54 = vadd.f32 %v3211_v52, %v4539_v51 }
 0x333   : > { %v1334_v55 = vpop.f32.mrf.mxu0  ;;  %v1496_v56 = vadd.f32 %v3243_v53, %v4539_v51 }
 0x334   : > { %v1335_v59 = vadd.f32 %v4539_v51, %v1334_v55  ;;  %v1487_v60 = vpop.f32.mrf.mxu1  ;;  %vm1399_vm0 = vcmp.ge.f32.partialorder %v1343_v54, 0.0  ;;  %v1415_v2 = vmul.f32 0.01, %v1343_v54 }
 0x335   : > { %v3212_v61 = vpop.f32.mrf.mxu0  ;;  %v1488_v3 = vadd.f32 %v4539_v51, %v1487_v60  ;;  %vm1552_vm1 = vcmp.ge.f32.partialorder %v1496_v56, 0.0  ;;  %v1568_v13 = vmul.f32 0.01, %v1496_v56 }
 0x336   : > { %v1346_v62 = vadd.f32 %v3212_v61, %v4539_v51  ;;  %v3244_v63 = vpop.f32.mrf.mxu1  ;;  %v1413_v6 = vmul.f32 0.01, %v1335_v59  ;;  %vm1397_vm4 = vcmp.ge.f32.partialorder %v1335_v59, 0.0  ;;  %v1431_v19 = vsel %vm1399_vm0, %v1343_v54, %v1415_v2 }
 0x337   : > { %v1499_v4 = vadd.f32 %v3244_v63, %v4539_v51  ;;  %v1337_v5 = vpop.f32.mrf.mxu0  ;;  %v1566_v16 = vmul.f32 0.01, %v1488_v3  ;;  %vm1550_vm7 = vcmp.ge.f32.partialorder %v1488_v3, 0.0  ;;  %v1584_v27 = vsel %vm1552_vm1, %v1496_v56, %v1568_v13 }
 0x338   : > { %v1416_v7 = vmul.f32 0.01, %v1346_v62  ;;  %v1338_v8 = vadd.f32 %v4539_v51, %v1337_v5  ;;  %v1490_v9 = vpop.f32.mrf.mxu1  ;;  %vm1400_vm2 = vcmp.ge.f32.partialorder %v1346_v62, 0.0  ;;  %v1429_v25 = vsel %vm1397_vm4, %v1335_v59, %v1413_v6 }
 0x339   : > { %vm1553_vm3 = vcmp.ge.f32.partialorder %v1499_v4, 0.0  ;;  %v1569_v10 = vmul.f32 0.01, %v1499_v4  ;;  %v1491_v11 = vadd.f32 %v4539_v51, %v1490_v9  ;;  %v3215_v12 = vpop.f32.mrf.mxu0  ;;  %v1582_v33 = vsel %vm1550_vm7, %v1488_v3, %v1566_v16 }
 0x33a   : > { %vm1398_vm5 = vcmp.ge.f32.partialorder %v1338_v8, 0.0  ;;  %v1414_v14 = vmul.f32 0.01, %v1338_v8  ;;  %v3247_v15 = vpop.f32.mrf.mxu1  ;;  %v4550_v57 = vadd.f32 %v3215_v12, %v4539_v51  ;;  %v1432_v20 = vsel %vm1400_vm2, %v1346_v62, %v1416_v7 }
 0x33b   : > { %vm1551_vm6 = vcmp.ge.f32.partialorder %v1491_v11, 0.0  ;;  %v1567_v17 = vmul.f32 0.01, %v1491_v11  ;;  %v1350_v18 = vpop.f32.mrf.mxu0  ;;  %v1585_v21 = vsel %vm1553_vm3, %v1499_v4, %v1569_v10  ;;  %v1599_v31 = vpack.c.bf16 %v1432_v20, %v1431_v19 }
 0x33c   : > { %v1503_v22 = vpop.f32.mrf.mxu1  ;;  %v1351_v0 = vadd.f32 %v4539_v51, %v1350_v18  ;;  %v1430_v26 = vsel %vm1398_vm5, %v1338_v8, %v1414_v14  ;;  %v1791_v1 = vpack.c.bf16 %v1585_v21, %v1584_v27  ;;  %vm1403_vm8 = vcmp.ge.f32.partialorder %v4550_v57, 0.0 }
 0x33d   : > { %v1504_v23 = vadd.f32 %v4539_v51, %v1503_v22  ;;  %v3216_v24 = vpop.f32.mrf.mxu0  ;;  %v1598_v29 = vpack.c.bf16 %v1430_v26, %v1429_v25  ;;  %v1583_v30 = vsel %vm1551_vm6, %v1491_v11, %v1567_v17  ;;  %v4565_v35 = vadd.f32 %v3247_v15, %v4539_v51 }
 0x33e   : > { %v1362_v58 = vadd.f32 %v3216_v24, %v4539_v51  ;;  %v3248_v28 = vpop.f32.mrf.mxu1  ;;  %vm1401_vm9 = vcmp.ge.f32.partialorder %v1351_v0, 0.0  ;;  %v1417_v36 = vmul.f32 0.01, %v1351_v0  ;;  %v1790_v42 = vpack.c.bf16 %v1583_v30, %v1582_v33 }
 0x33f   : > { %v1353_v32 = vpop.f32.mrf.mxu0  ;;  %3273 = vmatprep.mubr.bf16.mxu0 %v1598_v29  ;;  %v1570_v39 = vmul.f32 0.01, %v1504_v23  ;;  %v1515_v44 = vadd.f32 %v3248_v28, %v4539_v51  ;;  %v1419_v47 = vmul.f32 0.01, %v4550_v57  ;;  %vm1554_vm12 = vcmp.ge.f32.partialorder %v1504_v23, 0.0 }
 0x340   : > { %v1354_v37 = vadd.f32 %v4539_v51, %v1353_v32  ;;  %v1506_v38 = vpop.f32.mrf.mxu1  ;;  %v1420_v40 = vmul.f32 0.01, %v1362_v58  ;;  %3274 = vmatmul.mubr.bf16.vlgmr.msra.gmra.mxu0 %v1599_v31  ;;  %vm1404_vm10 = vcmp.ge.f32.partialorder %v1362_v58, 0.0  ;;  %3305 = vmatprep.mubr.bf16.mxu1 %v1790_v42  ;;  %vm1556_vm13 = vcmp.ge.f32.partialorder %v4565_v35, 0.0 }
 0x341   : > { %v1507_v41 = vadd.f32 %v4539_v51, %v1506_v38  ;;  %v3219_v43 = vpop.f32.mrf.mxu0  ;;  %3322 = vmatpush3.bf16.msra.mxu0 %v4532_v50  ;;  %3306 = vmatmul.mubr.bf16.vlgmr.msra.gmra.mxu1 %v1791_v1  ;;  %v1572_v56 = vmul.f32 0.01, %v4565_v35  ;;  %v1433_v61 = vsel %vm1401_vm9, %v1351_v0, %v1417_v36  ;;  %vm1557_vm15 = vcmp.ge.f32.partialorder %v1515_v44, 0.0 }
 0x342   : > { %vm1402_vm11 = vcmp.ge.f32.partialorder %v1354_v37, 0.0  ;;  %v1418_v45 = vmul.f32 0.01, %v1354_v37  ;;  %v3251_v46 = vpop.f32.mrf.mxu1  ;;  %v4573_v49 = vadd.f32 %v3219_v43, %v4539_v51  ;;  %3323 = vmatprep.subr.bf16.mxu0 %v3588_v34  ;;  %v1436_v62 = vsel %vm1404_vm10, %v1362_v58, %v1420_v40  ;;  %3354 = vmatpush3.bf16.msra.mxu1 %v4532_v50 }
 0x343   : > { %v1571_v48 = vmul.f32 0.01, %v1507_v41  ;;  %v1366_v52 = vpop.f32.mrf.mxu0  ;;  %vm1555_vm14 = vcmp.ge.f32.partialorder %v1507_v41, 0.0  ;;  %v4577_v53 = vadd.f32 %v3251_v46, %v4539_v51  ;;  %v1573_v63 = vmul.f32 0.01, %v1515_v44  ;;  %3355 = vmatprep.subr.bf16.mxu1 %v3588_v34 }
 0x344   : > { %v1519_v54 = vpop.f32.mrf.mxu1  ;;  %v1434_v55 = vsel %vm1402_vm11, %v1354_v37, %v1418_v45  ;;  %v1367_v59 = vadd.f32 %v4539_v51, %v1366_v52  ;;  %v1586_v4 = vsel %vm1554_vm12, %v1504_v23, %v1570_v39  ;;  %vm1407_vm0 = vcmp.ge.f32.partialorder %v4573_v49, 0.0 }
 0x345   : > { %v3220_v60 = vpop.f32.mrf.mxu0  ;;  %v4586_v2 = vadd.f32 %v4539_v51, %v1519_v54  ;;  %3324 = vmatpush3.bf16.msra.mxu0 %v3588_v34  ;;  %v1600_v6 = vpack.c.bf16 %v1434_v55, %v1433_v61  ;;  %v1587_v7 = vsel %vm1555_vm14, %v1507_v41, %v1571_v48  ;;  %v1435_v50 = vsel %vm1403_vm8, %v4550_v57, %v1419_v47 }
 0x346   : > { %v3252_v3 = vpop.f32.mrf.mxu1  ;;  %v1423_v8 = vmul.f32 0.01, %v4573_v49  ;;  %v4596_v9 = vmul.f32 0.01, %v4577_v53  ;;  %v1378_v10 = vadd.f32 %v3220_v60, %v4539_v51  ;;  %v1601_v12 = vpack.c.bf16 %v1436_v62, %v1435_v50  ;;  %3356 = vmatpush3.bf16.msra.mxu1 %v3588_v34 }
 0x347   : > { %v1369_v5 = vpop.f32.mrf.mxu0  ;;  %vm1560_vm1 = vcmp.ge.f32.partialorder %v4577_v53, 0.0  ;;  %vm1405_vm2 = vcmp.ge.f32.partialorder %v1367_v59, 0.0  ;;  %v1421_v13 = vmul.f32 0.01, %v1367_v59  ;;  %3277 = vmatprep.mubr.bf16.mxu0 %v1600_v6  ;;  %vm1558_vm3 = vcmp.ge.f32.partialorder %v4586_v2, 0.0 }
 0x348   : > { %v1522_v11 = vpop.f32.mrf.mxu1  ;;  %v1370_v14 = vadd.f32 %v4539_v51, %v1369_v5  ;;  %v1531_v17 = vadd.f32 %v3252_v3, %v4539_v51  ;;  %v1792_v57 = vpack.c.bf16 %v1587_v7, %v1586_v4  ;;  %3278 = vmatmul.mubr.bf16.gmra.mxu0 %v1601_v12  ;;  %v1589_v18 = vsel %vm1557_vm15, %v1515_v44, %v1573_v63  ;;  %v3591_v12 = vld [vmem:[#allocation11 + $0x18] sm:$0xff]  }
 0x349   : > { %v1523_v15 = vadd.f32 %v4539_v51, %v1522_v11  ;;  %v3223_v16 = vpop.f32.mrf.mxu0  ;;  %v1574_v20 = vmul.f32 0.01, %v4586_v2  ;;  %v1588_v22 = vsel %vm1556_vm13, %v4565_v35, %v1572_v56  ;;  %vm1408_vm5 = vcmp.ge.f32.partialorder %v1378_v10, 0.0  ;;  %v3590_v11 = vld [vmem:[#allocation11 + $0x20] sm:$0xff]  }
 0x34a   : > { %v3255_v19 = vpop.f32.mrf.mxu1  ;;  %vm1406_vm4 = vcmp.ge.f32.partialorder %v1370_v14, 0.0  ;;  %v1422_v21 = vmul.f32 0.01, %v1370_v14  ;;  %v1424_v23 = vmul.f32 0.01, %v1378_v10  ;;  %3309 = vmatprep.mubr.bf16.mxu1 %v1792_v57  ;;  %v1793_v25 = vpack.c.bf16 %v1589_v18, %v1588_v22 }
 0x34b   : > { %v1382_v0 = vpop.f32.mrf.mxu0  ;;  %v1575_v24 = vmul.f32 0.01, %v1523_v15  ;;  %v1437_v29 = vsel %vm1405_vm2, %v1367_v59, %v1421_v13  ;;  %vm1561_vm6 = vcmp.ge.f32.partialorder %v1531_v17, 0.0  ;;  %vm1559_vm7 = vcmp.ge.f32.partialorder %v1523_v15, 0.0  ;;  %v3592_v13 = vld [vmem:[#allocation11 + $0x10] sm:$0xff]  }
 0x34c   : > { %v1535_v26 = vpop.f32.mrf.mxu1  ;;  %v1383_v27 = vadd.f32 %v4539_v51, %v1382_v0  ;;  %v1438_v30 = vsel %vm1406_vm4, %v1370_v14, %v1422_v21  ;;  %3310 = vmatmul.mubr.bf16.gmra.mxu1 %v1793_v25  ;;  %v1577_v33 = vmul.f32 0.01, %v1531_v17  ;;  %v1391_v34 = vadd.f32 %v3223_v16, %v4539_v51  ;;  %v3593_v14 = vld [vmem:[#allocation11 + $0x8] sm:$0xff]   ;;  %v4633_v16 = vld [vmem:[#allocation13 + $0x38] sm:$0xff]  }
 0x34d   : > { %v1536_v58 = vadd.f32 %v4539_v51, %v1535_v26  ;;  %v3224_v28 = vpop.f32.mrf.mxu0  ;;  %v1602_v32 = vpack.c.bf16 %v1438_v30, %v1437_v29  ;;  %v1544_v35 = vadd.f32 %v3255_v19, %v4539_v51  ;;  %v1591_v44 = vsel %vm1559_vm7, %v1523_v15, %v1575_v24  ;;  %v3594_v15 = vld [vmem:[#allocation11] sm:$0xff]  }
 0x34e   : > { %v1394_v31 = vadd.f32 %v3224_v28, %v4539_v51  ;;  %v3256_v1 = vpop.f32.mrf.mxu1  ;;  %vm1409_vm8 = vcmp.ge.f32.partialorder %v1383_v27, 0.0  ;;  %v1425_v37 = vmul.f32 0.01, %v1383_v27  ;;  %v1590_v46 = vsel %vm1558_vm3, %v4586_v2, %v1574_v20 }
 0x34f   : > { %v1385_v36 = vpop.f32.mrf.mxu0  ;;  %vm1562_vm9 = vcmp.ge.f32.partialorder %v1536_v58, 0.0  ;;  %v1578_v38 = vmul.f32 0.01, %v1536_v58  ;;  %3281 = vmatprep.mubr.bf16.mxu0 %v1602_v32  ;;  %v1547_v42 = vadd.f32 %v3256_v1, %v4539_v51  ;;  %v1439_v47 = vsel %vm1407_vm0, %v4573_v49, %v1423_v8 }
 0x350   : > { %v1386_v39 = vadd.f32 %v4539_v51, %v1385_v36  ;;  %v1538_v40 = vpop.f32.mrf.mxu1  ;;  %v1428_v41 = vmul.f32 0.01, %v1394_v31  ;;  %v1794_v52 = vpack.c.bf16 %v1591_v44, %v1590_v46  ;;  %v1440_v54 = vsel %vm1408_vm5, %v1378_v10, %v1424_v23  ;;  %v3589_v10 = vld [vmem:[#allocation11 + $0x28] sm:$0xff]  }
 0x351   : > { %v1539_v43 = vadd.f32 %v4539_v51, %v1538_v40  ;;  %v1603_v55 = vpack.c.bf16 %v1440_v54, %v1439_v47  ;;  %v1592_v51 = vsel %vm1560_vm1, %v4577_v53, %v4596_v9  ;;  %v1593_v56 = vsel %vm1561_vm6, %v1531_v17, %v1577_v33  ;;  %3325 = vmatprep.subr.bf16.mxu0 %v3589_v10  ;;  %v4640_v17 = vld [vmem:[%s4856_s8] ss:$0 sm:$0xff] }
 0x352   : > { %vm1410_vm10 = vcmp.ge.f32.partialorder %v1386_v39, 0.0  ;;  %v1426_v45 = vmul.f32 0.01, %v1386_v39  ;;  %v1441_v59 = vsel %vm1409_vm8, %v1383_v27, %v1425_v37  ;;  %3313 = vmatprep.mubr.bf16.mxu1 %v1794_v52  ;;  %v1795_v60 = vpack.c.bf16 %v1593_v56, %v1592_v51  ;;  %3357 = vmatprep.subr.bf16.mxu1 %v3589_v10 }
 0x353   : > { %vm1563_vm11 = vcmp.ge.f32.partialorder %v1539_v43, 0.0  ;;  %v1579_v48 = vmul.f32 0.01, %v1539_v43  ;;  %v1594_v49 = vsel %vm1562_vm9, %v1536_v58, %v1578_v38  ;;  %vm1412_vm12 = vcmp.ge.f32.partialorder %v1394_v31, 0.0  ;;  %3282 = vmatmul.mubr.bf16.gmra.mxu0 %v1603_v55  ;;  %3358 = vmatpush3.bf16.msra.mxu1 %v3589_v10 }
 0x354   : > { %v1442_v61 = vsel %vm1410_vm10, %v1386_v39, %v1426_v45  ;;  %v1581_v63 = vmul.f32 0.01, %v1547_v42  ;;  %v1427_v4 = vmul.f32 0.01, %v1391_v34  ;;  %vm1565_vm13 = vcmp.ge.f32.partialorder %v1547_v42, 0.0  ;;  %3314 = vmatmul.mubr.bf16.gmra.mxu1 %v1795_v60  ;;  %3326 = vmatpush3.bf16.msra.mxu0 %v3589_v10 }
 0x355   : > { %v1595_v62 = vsel %vm1563_vm11, %v1539_v43, %v1579_v48  ;;  %v1604_v2 = vpack.c.bf16 %v1442_v61, %v1441_v59  ;;  %vm1411_vm14 = vcmp.ge.f32.partialorder %v1391_v34, 0.0  ;;  %v1580_v53 = vmul.f32 0.01, %v1544_v35  ;;  %3327 = vmatprep.subr.bf16.mxu0 %v3590_v11  ;;  %3359 = vmatprep.subr.bf16.mxu1 %v3590_v11 }
 0x356   : > { %v1796_v3 = vpack.c.bf16 %v1595_v62, %v1594_v49  ;;  %vm1564_vm15 = vcmp.ge.f32.partialorder %v1544_v35, 0.0  ;;  %v1444_v5 = vsel %vm1412_vm12, %v1394_v31, %v1428_v41  ;;  %v1597_v6 = vsel %vm1565_vm13, %v1547_v42, %v1581_v63 }
 0x357   : > { %3285 = vmatprep.mubr.bf16.mxu0 %v1604_v2  ;;  %v1443_v7 = vsel %vm1411_vm14, %v1391_v34, %v1427_v4  ;;  %v1596_v8 = vsel %vm1564_vm15, %v1544_v35, %v1580_v53  ;;  %3360 = vmatpush3.bf16.msra.mxu1 %v3590_v11  ;;  %v3596_v2 = vld [vmem:[#allocation13 + $0x30] sm:$0xff]  }
 0x358   : > { %3317 = vmatprep.mubr.bf16.mxu1 %v1796_v3  ;;  %v1605_v50 = vpack.c.bf16 %v1444_v5, %v1443_v7  ;;  %v1797_v9 = vpack.c.bf16 %v1597_v6, %v1596_v8  ;;  %3328 = vmatpush3.bf16.msra.mxu0 %v3590_v11 }
 0x359   : > { %3329 = vmatprep.subr.bf16.mxu0 %v3591_v12  ;;  %3361 = vmatprep.subr.bf16.mxu1 %v3591_v12 }
 0x35b   : > { %3286 = vmatmul.mubr.bf16.gmra.mxu0 %v1605_v50  ;;  %3362 = vmatpush3.bf16.msra.mxu1 %v3591_v12 }
 0x35c   : > { %3318 = vmatmul.mubr.bf16.gmra.mxu1 %v1797_v9  ;;  %3330 = vmatpush3.bf16.msra.mxu0 %v3591_v12 }
 0x35d   : > { %3331 = vmatprep.subr.bf16.mxu0 %v3592_v13  ;;  %3363 = vmatprep.subr.bf16.mxu1 %v3592_v13 }
 0x35f   : > { %3364 = vmatpush3.bf16.msra.mxu1 %v3592_v13 }
 0x360   : > { %3332 = vmatpush3.bf16.msra.mxu0 %v3592_v13  ;;  %3365 = vmatprep.subr.bf16.mxu1 %v3593_v14 }
 0x361   : > { %3333 = vmatprep.subr.bf16.mxu0 %v3593_v14 }
 0x363   : > { %3366 = vmatpush3.bf16.msra.mxu1 %v3593_v14 }
 0x364   : > { %3334 = vmatpush3.bf16.msra.mxu0 %v3593_v14  ;;  %3367 = vmatprep.subr.bf16.mxu1 %v3594_v15 }
 0x365   : > { %3335 = vmatprep.subr.bf16.mxu0 %v3594_v15 }
 0x367   : > { %3368 = vmatpush3.bf16.msra.mxu1 %v3594_v15 }
 0x368   : > { %3336 = vmatpush3.bf16.msra.mxu0 %v3594_v15  ;;  %3417 = vmatprep.subr.bf16.mxu1 %v4633_v16 }
 0x369   : > { %3385 = vmatprep.subr.bf16.mxu0 %v4633_v16 }
 0x400   : > { %v3275_v57 = vpop.f32.mrf.mxu0 }
 0x401   : > { %v1720_v18 = vadd.f32 %v3275_v57, %v4640_v17  ;;  %v3307_v20 = vpop.f32.mrf.mxu1 }
 0x402   : > { %v1711_v19 = vpop.f32.mrf.mxu0  ;;  %v1841_v28 = vadd.f32 %v3307_v20, %v4640_v17 }
 0x403   : > { %v1712_v21 = vadd.f32 %v4640_v17, %v1711_v19  ;;  %v1832_v0 = vpop.f32.mrf.mxu1  ;;  %3731 = vtanh.f32 %v1720_v18 }
 0x404   : > { %v3276_v22 = vpop.f32.mrf.mxu0  ;;  %v1833_v24 = vadd.f32 %v4640_v17, %v1832_v0 }
 0x405   : > { %v1723_v23 = vadd.f32 %v3276_v22, %v4640_v17  ;;  %3733 = vtanh.f32 %v1712_v21  ;;  %v3308_v26 = vpop.f32.mrf.mxu1 }
 0x406   : > { %v1714_v25 = vpop.f32.mrf.mxu0  ;;  %v1844_v58 = vadd.f32 %v3308_v26, %v4640_v17 }
 0x407   : > { %v1715_v27 = vadd.f32 %v4640_v17, %v1714_v25  ;;  %3735 = vtanh.f32 %v1723_v23  ;;  %v1835_v29 = vpop.f32.mrf.mxu1 }
 0x408   : > { %v3279_v30 = vpop.f32.mrf.mxu0  ;;  %v1836_v31 = vadd.f32 %v4640_v17, %v1835_v29 }
 0x409   : > { %3737 = vtanh.f32 %v1715_v27  ;;  %v1736_v32 = vadd.f32 %v3279_v30, %v4640_v17 }
 0x40a   : > { %3739 = vtanh.f32 %v1833_v24  ;;  %v1727_v1 = vpop.f32.mrf.mxu0 }
 0x40b   : > { %3741 = vtanh.f32 %v1844_v58  ;;  %v1728_v34 = vadd.f32 %v4640_v17, %v1727_v1 }
 0x40c   : > { %3743 = vtanh.f32 %v1836_v31  ;;  %v3311_v33 = vpop.f32.mrf.mxu1  ;;  %v3280_v35 = vpop.f32.mrf.mxu0 }
 0x40d   : > { %3745 = vtanh.f32 %v1841_v28  ;;  %v1739_v36 = vadd.f32 %v3280_v35, %v4640_v17  ;;  %v1857_v44 = vadd.f32 %v3311_v33, %v4640_v17 }
 0x40e   : > { %v1848_v37 = vpop.f32.mrf.mxu1  ;;  %v1730_v38 = vpop.f32.mrf.mxu0  ;;  %3747 = vtanh.f32 %v1736_v32 }
 0x40f   : > { %v1849_v39 = vadd.f32 %v4640_v17, %v1848_v37  ;;  %v1731_v40 = vadd.f32 %v4640_v17, %v1730_v38  ;;  %3749 = vtanh.f32 %v1728_v34 }
 0x410   : > { %v3312_v41 = vpop.f32.mrf.mxu1  ;;  %3751 = vtanh.f32 %v1739_v36  ;;  %v3732_v43 = vpop.eup %3731 }
 0x411   : > { %v1860_v42 = vadd.f32 %v3312_v41, %v4640_v17  ;;  %3753 = vtanh.f32 %v1731_v40 }
 0x412   : > { %v1851_v45 = vpop.f32.mrf.mxu1  ;;  %v3734_v46 = vpop.eup %3733  ;;  %3755 = vtanh.f32 %v1849_v39 }
 0x413   : > { %v1852_v47 = vadd.f32 %v4640_v17, %v1851_v45  ;;  %3757 = vtanh.f32 %v1860_v42  ;;  %v3283_v52 = vpop.f32.mrf.mxu0 }
 0x414   : > { %v3736_v48 = vpop.eup %3735  ;;  %v1752_v55 = vadd.f32 %v3283_v52, %v4640_v17  ;;  %v3315_v51 = vpop.f32.mrf.mxu1 }
 0x415   : > { %3759 = vtanh.f32 %v1852_v47  ;;  %v1743_v59 = vpop.f32.mrf.mxu0  ;;  %v1912_v63 = vpack.c.bf16 %v3736_v48, %v3732_v43  ;;  %v1873_v11 = vadd.f32 %v3315_v51, %v4640_v17 }
 0x416   : > { %v3738_v54 = vpop.eup %3737  ;;  %3761 = vtanh.f32 %v1857_v44  ;;  %v1744_v49 = vadd.f32 %v4640_v17, %v1743_v59  ;;  %v1864_v62 = vpop.f32.mrf.mxu1 }
 0x417   : > { %v3740_v56 = vpop.eup %3739  ;;  %v1911_v60 = vpack.c.bf16 %v3738_v54, %v3734_v46  ;;  %3763 = vtanh.f32 %v1752_v55  ;;  %v1865_v4 = vadd.f32 %v4640_v17, %v1864_v62  ;;  %v3284_v53 = vpop.f32.mrf.mxu0 }
 0x418   : > { %v3742_v61 = vpop.eup %3741  ;;  %3765 = vtanh.f32 %v1744_v49  ;;  %v1755_v6 = vadd.f32 %v3284_v53, %v4640_v17  ;;  %v3316_v7 = vpop.f32.mrf.mxu1  ;;  %v3597_v53 = vld [vmem:[#allocation13 + $0x28] sm:$0xff]  }
 0x419   : > { %v3744_v3 = vpop.eup %3743  ;;  %3337 = vmatprep.mubr.bf16.mxu0 %v1911_v60  ;;  %3767 = vtanh.f32 %v1865_v4  ;;  %v1876_v8 = vadd.f32 %v3316_v7, %v4640_v17  ;;  %v1746_v9 = vpop.f32.mrf.mxu0  ;;  %v3600_v7 = vld [vmem:[#allocation13 + $0x10] sm:$0xff]  }
 0x41a   : > { %v3746_v5 = vpop.eup %3745  ;;  %v2103_v50 = vpack.c.bf16 %v3744_v3, %v3740_v56  ;;  %3338 = vmatmul.mubr.bf16.vlgmr.msra.gmra.mxu0 %v1912_v63  ;;  %3769 = vtanh.f32 %v1755_v6  ;;  %v1747_v12 = vadd.f32 %v4640_v17, %v1746_v9  ;;  %v1867_v13 = vpop.f32.mrf.mxu1  ;;  %v3599_v6 = vld [vmem:[#allocation13 + $0x18] sm:$0xff]   ;;  %v4679_v9 = vld [vmem:[%s4858_s10] ss:$0 sm:$0xff] }
 0x41b   : > { %v2104_v10 = vpack.c.bf16 %v3742_v61, %v3746_v5  ;;  %3386 = vmatpush3.bf16.msra.mxu0 %v4633_v16  ;;  %v3748_v14 = vpop.eup %3747  ;;  %3771 = vtanh.f32 %v1876_v8  ;;  %v1868_v15 = vadd.f32 %v4640_v17, %v1867_v13  ;;  %v3287_v57 = vpop.f32.mrf.mxu0  ;;  %v3598_v5 = vld [vmem:[#allocation13 + $0x20] sm:$0xff]  }
 0x41c   : > { %3369 = vmatprep.mubr.bf16.mxu1 %v2103_v50  ;;  %3387 = vmatprep.subr.bf16.mxu0 %v3596_v2  ;;  %v3750_v18 = vpop.eup %3749  ;;  %3773 = vtanh.f32 %v1747_v12  ;;  %v1768_v19 = vadd.f32 %v3287_v57, %v4640_v17  ;;  %v3319_v20 = vpop.f32.mrf.mxu1  ;;  %v3601_v50 = vld [vmem:[#allocation13 + $0x8] sm:$0xff]   ;;  %v3602_v8 = vld [vmem:[#allocation13] sm:$0xff]  }
 0x41d   : > { %3370 = vmatmul.mubr.bf16.vlgmr.msra.gmra.mxu1 %v2104_v10  ;;  %v3752_v21 = vpop.eup %3751  ;;  %3775 = vtanh.f32 %v1868_v15  ;;  %v1759_v22 = vpop.f32.mrf.mxu0  ;;  %v1889_v34 = vadd.f32 %v3319_v20, %v4640_v17 }
 0x41e   : > { %3418 = vmatpush3.bf16.msra.mxu1 %v4633_v16  ;;  %v3754_v0 = vpop.eup %3753  ;;  %3777 = vtanh.f32 %v1873_v11  ;;  %v1760_v23 = vadd.f32 %v4640_v17, %v1759_v22  ;;  %v1880_v24 = vpop.f32.mrf.mxu1  ;;  %v1914_v30 = vpack.c.bf16 %v3752_v21, %v3748_v14 }
 0x41f   : > { %3419 = vmatprep.subr.bf16.mxu1 %v3596_v2  ;;  %3388 = vmatpush3.bf16.msra.mxu0 %v3596_v2  ;;  %v3756_v25 = vpop.eup %3755  ;;  %3779 = vtanh.f32 %v1768_v19  ;;  %v1881_v26 = vadd.f32 %v4640_v17, %v1880_v24  ;;  %v3288_v27 = vpop.f32.mrf.mxu0  ;;  %v1913_v58 = vpack.c.bf16 %v3754_v0, %v3750_v18 }
 0x420   : > { %v3758_v28 = vpop.eup %3757  ;;  %3781 = vtanh.f32 %v1760_v23  ;;  %v1771_v16 = vadd.f32 %v3288_v27, %v4640_v17  ;;  %v3320_v29 = vpop.f32.mrf.mxu1  ;;  %3389 = vmatprep.subr.bf16.mxu0 %v3597_v53 }
 0x421   : > { %3783 = vtanh.f32 %v1881_v26  ;;  %v1892_v1 = vadd.f32 %v3320_v29, %v4640_v17  ;;  %v1762_v32 = vpop.f32.mrf.mxu0  ;;  %3341 = vmatprep.mubr.bf16.mxu0 %v1913_v58 }
 0x422   : > { %3420 = vmatpush3.bf16.msra.mxu1 %v3596_v2  ;;  %v3760_v31 = vpop.eup %3759  ;;  %3785 = vtanh.f32 %v1771_v16  ;;  %v1763_v35 = vadd.f32 %v4640_v17, %v1762_v32  ;;  %v1883_v36 = vpop.f32.mrf.mxu1  ;;  %3342 = vmatmul.mubr.bf16.gmra.mxu0 %v1914_v30 }
 0x423   : > { %v3762_v33 = vpop.eup %3761  ;;  %v2105_v37 = vpack.c.bf16 %v3760_v31, %v3756_v25  ;;  %3787 = vtanh.f32 %v1892_v1  ;;  %v1884_v38 = vadd.f32 %v4640_v17, %v1883_v36  ;;  %3421 = vmatprep.subr.bf16.mxu1 %v3597_v53  ;;  %3390 = vmatpush3.bf16.msra.mxu0 %v3597_v53 }
 0x424   : > { %v2106_v39 = vpack.c.bf16 %v3758_v28, %v3762_v33  ;;  %v3764_v40 = vpop.eup %3763  ;;  %3789 = vtanh.f32 %v1763_v35  ;;  %3391 = vmatprep.subr.bf16.mxu0 %v3598_v5 }
 0x425   : > { %3373 = vmatprep.mubr.bf16.mxu1 %v2105_v37  ;;  %v3766_v41 = vpop.eup %3765  ;;  %3791 = vtanh.f32 %v1884_v38 }
 0x426   : > { %3374 = vmatmul.mubr.bf16.gmra.mxu1 %v2106_v39  ;;  %v3768_v42 = vpop.eup %3767  ;;  %3793 = vtanh.f32 %v1889_v34 }
 0x427   : > { %v3770_v43 = vpop.eup %3769  ;;  %3422 = vmatpush3.bf16.msra.mxu1 %v3597_v53  ;;  %3392 = vmatpush3.bf16.msra.mxu0 %v3598_v5 }
 0x428   : > { %v3772_v44 = vpop.eup %3771  ;;  %v1916_v54 = vpack.c.bf16 %v3770_v43, %v3764_v40  ;;  %3423 = vmatprep.subr.bf16.mxu1 %v3598_v5  ;;  %3393 = vmatprep.subr.bf16.mxu0 %v3599_v6 }
 0x429   : > { %v3774_v45 = vpop.eup %3773 }
 0x42a   : > { %v3776_v46 = vpop.eup %3775  ;;  %v1915_v47 = vpack.c.bf16 %v3774_v45, %v3766_v41 }
 0x42b   : > { %v3778_v48 = vpop.eup %3777  ;;  %v2107_v52 = vpack.c.bf16 %v3776_v46, %v3768_v42  ;;  %3424 = vmatpush3.bf16.msra.mxu1 %v3598_v5  ;;  %3394 = vmatpush3.bf16.msra.mxu0 %v3599_v6 }
 0x42c   : > { %v3780_v55 = vpop.eup %3779  ;;  %3345 = vmatprep.mubr.bf16.mxu0 %v1915_v47  ;;  %v2108_v17 = vpack.c.bf16 %v3772_v44, %v3778_v48  ;;  %3425 = vmatprep.subr.bf16.mxu1 %v3599_v6 }
 0x42d   : > { %v3782_v51 = vpop.eup %3781  ;;  %3377 = vmatprep.mubr.bf16.mxu1 %v2107_v52  ;;  %3346 = vmatmul.mubr.bf16.gmra.mxu0 %v1916_v54 }
 0x42e   : > { %v3784_v56 = vpop.eup %3783  ;;  %3378 = vmatmul.mubr.bf16.gmra.mxu1 %v2108_v17  ;;  %3395 = vmatprep.subr.bf16.mxu0 %v3600_v7 }
 0x42f   : > { %v3786_v59 = vpop.eup %3785  ;;  %3426 = vmatpush3.bf16.msra.mxu1 %v3599_v6  ;;  %3396 = vmatpush3.bf16.msra.mxu0 %v3600_v7 }
 0x430   : > { %v3788_v60 = vpop.eup %3787  ;;  %v1918_v3 = vpack.c.bf16 %v3786_v59, %v3780_v55  ;;  %3427 = vmatprep.subr.bf16.mxu1 %v3600_v7  ;;  %3397 = vmatprep.subr.bf16.mxu0 %v3601_v50 }
 0x431   : > { %v3790_v61 = vpop.eup %3789 }
 0x432   : > { %v3792_v49 = vpop.eup %3791  ;;  %v1917_v62 = vpack.c.bf16 %v3790_v61, %v3782_v51 }
 0x433   : > { %v3794_v63 = vpop.eup %3793  ;;  %v2109_v2 = vpack.c.bf16 %v3792_v49, %v3784_v56  ;;  %3428 = vmatpush3.bf16.msra.mxu1 %v3600_v7  ;;  %3398 = vmatpush3.bf16.msra.mxu0 %v3601_v50 }
 0x434   : > { %3349 = vmatprep.mubr.bf16.mxu0 %v1917_v62  ;;  %v2110_v4 = vpack.c.bf16 %v3788_v60, %v3794_v63  ;;  %3429 = vmatprep.subr.bf16.mxu1 %v3601_v50 }
 0x435   : > { %3381 = vmatprep.mubr.bf16.mxu1 %v2109_v2  ;;  %3350 = vmatmul.mubr.bf16.gmra.mxu0 %v1918_v3 }
 0x436   : > { %3382 = vmatmul.mubr.bf16.gmra.mxu1 %v2110_v4  ;;  %3399 = vmatprep.subr.bf16.mxu0 %v3602_v8 }
 0x437   : > { %3430 = vmatpush3.bf16.msra.mxu1 %v3601_v50  ;;  %3400 = vmatpush3.bf16.msra.mxu0 %v3602_v8 }
 0x438   : > { %3431 = vmatprep.subr.bf16.mxu1 %v3602_v8 }
 0x43b   : > { %3432 = vmatpush3.bf16.msra.mxu1 %v3602_v8 }
 0x4da   : > { %v3339_v10 = vpop.f32.mrf.mxu0 }
 0x4db   : > { %v2033_v11 = vadd.f32 %v3339_v10, %v4679_v9 }
 0x4dc   : > { %v2024_v12 = vpop.f32.mrf.mxu0 }
 0x4dd   : > { %v3371_v13 = vpop.f32.mrf.mxu1  ;;  %v2025_v14 = vadd.f32 %v4679_v9, %v2024_v12  ;;  %3795 = vtanh.f32 %v2033_v11 }
 0x4de   : > { %v3340_v15 = vpop.f32.mrf.mxu0  ;;  %v2154_v23 = vadd.f32 %v3371_v13, %v4679_v9 }
 0x4df   : > { %v2145_v57 = vpop.f32.mrf.mxu1  ;;  %v2036_v18 = vadd.f32 %v3340_v15, %v4679_v9  ;;  %3797 = vtanh.f32 %v2025_v14 }
 0x4e0   : > { %v2146_v19 = vadd.f32 %v4679_v9, %v2145_v57  ;;  %v2027_v20 = vpop.f32.mrf.mxu0 }
 0x4e1   : > { %v3372_v21 = vpop.f32.mrf.mxu1  ;;  %v2028_v22 = vadd.f32 %v4679_v9, %v2027_v20  ;;  %3799 = vtanh.f32 %v2036_v18 }
 0x4e2   : > { %v2157_v0 = vadd.f32 %v3372_v21, %v4679_v9  ;;  %v3343_v26 = vpop.f32.mrf.mxu0 }
 0x4e3   : > { %3801 = vtanh.f32 %v2028_v22  ;;  %v2148_v24 = vpop.f32.mrf.mxu1  ;;  %v2049_v27 = vadd.f32 %v3343_v26, %v4679_v9 }
 0x4e4   : > { %3803 = vtanh.f32 %v2146_v19  ;;  %v2149_v25 = vadd.f32 %v4679_v9, %v2148_v24  ;;  %v2040_v58 = vpop.f32.mrf.mxu0 }
 0x4e5   : > { %3805 = vtanh.f32 %v2157_v0  ;;  %v2041_v16 = vadd.f32 %v4679_v9, %v2040_v58 }
 0x4e6   : > { %3807 = vtanh.f32 %v2149_v25  ;;  %v3375_v28 = vpop.f32.mrf.mxu1  ;;  %v3344_v29 = vpop.f32.mrf.mxu0 }
 0x4e7   : > { %3809 = vtanh.f32 %v2154_v23  ;;  %v2052_v31 = vadd.f32 %v3344_v29, %v4679_v9  ;;  %v2170_v37 = vadd.f32 %v3375_v28, %v4679_v9 }
 0x4e8   : > { %v2161_v30 = vpop.f32.mrf.mxu1  ;;  %3811 = vtanh.f32 %v2049_v27  ;;  %v2043_v32 = vpop.f32.mrf.mxu0 }
 0x4e9   : > { %v2162_v1 = vadd.f32 %v4679_v9, %v2161_v30  ;;  %3813 = vtanh.f32 %v2041_v16  ;;  %v2044_v34 = vadd.f32 %v4679_v9, %v2043_v32 }
 0x4ea   : > { %v3376_v33 = vpop.f32.mrf.mxu1  ;;  %3815 = vtanh.f32 %v2052_v31  ;;  %v3796_v36 = vpop.eup %3795 }
 0x4eb   : > { %v2173_v35 = vadd.f32 %v3376_v33, %v4679_v9  ;;  %3817 = vtanh.f32 %v2044_v34 }
 0x4ec   : > { %v2164_v38 = vpop.f32.mrf.mxu1  ;;  %v3798_v39 = vpop.eup %3797  ;;  %3819 = vtanh.f32 %v2162_v1 }
 0x4ed   : > { %v2165_v40 = vadd.f32 %v4679_v9, %v2164_v38  ;;  %3821 = vtanh.f32 %v2173_v35  ;;  %v3347_v42 = vpop.f32.mrf.mxu0 }
 0x4ee   : > { %v3800_v41 = vpop.eup %3799  ;;  %v2065_v44 = vadd.f32 %v3347_v42, %v4679_v9  ;;  %v3379_v45 = vpop.f32.mrf.mxu1 }
 0x4ef   : > { %3823 = vtanh.f32 %v2165_v40  ;;  %v2056_v47 = vpop.f32.mrf.mxu0  ;;  %v2225_v17 = vpack.c.bf16 %v3800_v41, %v3796_v36  ;;  %v2186_v4 = vadd.f32 %v3379_v45, %v4679_v9 }
 0x4f0   : > { %v3802_v43 = vpop.eup %3801  ;;  %3825 = vtanh.f32 %v2170_v37  ;;  %v2057_v54 = vadd.f32 %v4679_v9, %v2056_v47  ;;  %v2177_v55 = vpop.f32.mrf.mxu1 }
 0x4f1   : > { %v3804_v46 = vpop.eup %3803  ;;  %v2224_v48 = vpack.c.bf16 %v3802_v43, %v3798_v39  ;;  %3827 = vtanh.f32 %v2065_v44  ;;  %v2178_v56 = vadd.f32 %v4679_v9, %v2177_v55  ;;  %v3348_v59 = vpop.f32.mrf.mxu0 }
 0x4f2   : > { %v3806_v52 = vpop.eup %3805  ;;  %3829 = vtanh.f32 %v2057_v54  ;;  %v2068_v61 = vadd.f32 %v3348_v59, %v4679_v9  ;;  %v3380_v49 = vpop.f32.mrf.mxu1  ;;  %v4716_v59 = vld [vmem:[%s4892_s24] ss:$0 sm:$0xff] }
 0x4f3   : > { %v3808_v51 = vpop.eup %3807  ;;  %3401 = vmatprep.mubr.bf16.mxu0 %v2224_v48  ;;  %3831 = vtanh.f32 %v2178_v56  ;;  %v2189_v63 = vadd.f32 %v3380_v49, %v4679_v9  ;;  %v2059_v2 = vpop.f32.mrf.mxu0 }
 0x4f4   : > { %v3810_v60 = vpop.eup %3809  ;;  %v2448_v62 = vpack.c.bf16 %v3808_v51, %v3804_v46  ;;  %3402 = vmatmul.mubr.bf16.vlgmr.msra.gmra.mxu0 %v2225_v17  ;;  %3833 = vtanh.f32 %v2068_v61  ;;  %v2060_v53 = vadd.f32 %v4679_v9, %v2059_v2  ;;  %v2180_v5 = vpop.f32.mrf.mxu1 }
 0x4f5   : > { %v2449_v3 = vpack.c.bf16 %v3806_v52, %v3810_v60  ;;  %v3812_v6 = vpop.eup %3811  ;;  %3835 = vtanh.f32 %v2189_v63  ;;  %v2181_v7 = vadd.f32 %v4679_v9, %v2180_v5  ;;  %v3351_v50 = vpop.f32.mrf.mxu0 }
 0x4f6   : > { %3433 = vmatprep.mubr.bf16.mxu1 %v2448_v62  ;;  %v3814_v8 = vpop.eup %3813  ;;  %3837 = vtanh.f32 %v2060_v53  ;;  %v2081_v10 = vadd.f32 %v3351_v50, %v4679_v9  ;;  %v3383_v11 = vpop.f32.mrf.mxu1 }
 0x4f7   : > { %3434 = vmatmul.mubr.bf16.vlgmr.msra.gmra.mxu1 %v2449_v3  ;;  %v3816_v12 = vpop.eup %3815  ;;  %3839 = vtanh.f32 %v2181_v7  ;;  %v2072_v13 = vpop.f32.mrf.mxu0  ;;  %v2202_v28 = vadd.f32 %v3383_v11, %v4679_v9 }
 0x4f8   : > { %v3818_v14 = vpop.eup %3817  ;;  %3841 = vtanh.f32 %v2186_v4  ;;  %v2073_v15 = vadd.f32 %v4679_v9, %v2072_v13  ;;  %v2193_v57 = vpop.f32.mrf.mxu1  ;;  %v2227_v24 = vpack.c.bf16 %v3816_v12, %v3812_v6 }
 0x4f9   : > { %v3820_v18 = vpop.eup %3819  ;;  %3843 = vtanh.f32 %v2081_v10  ;;  %v2194_v19 = vadd.f32 %v4679_v9, %v2193_v57  ;;  %v3352_v20 = vpop.f32.mrf.mxu0  ;;  %v2226_v21 = vpack.c.bf16 %v3818_v14, %v3814_v8 }
 0x4fa   : > { %v3822_v22 = vpop.eup %3821  ;;  %3845 = vtanh.f32 %v2073_v15  ;;  %v2084_v0 = vadd.f32 %v3352_v20, %v4679_v9  ;;  %v3384_v23 = vpop.f32.mrf.mxu1 }
 0x4fb   : > { %3847 = vtanh.f32 %v2194_v19  ;;  %v2205_v26 = vadd.f32 %v3384_v23, %v4679_v9  ;;  %v2075_v27 = vpop.f32.mrf.mxu0  ;;  %3405 = vmatprep.mubr.bf16.mxu0 %v2226_v21 }
 0x4fc   : > { %v3824_v25 = vpop.eup %3823  ;;  %3849 = vtanh.f32 %v2084_v0  ;;  %v2076_v16 = vadd.f32 %v4679_v9, %v2075_v27  ;;  %v2196_v29 = vpop.f32.mrf.mxu1  ;;  %3406 = vmatmul.mubr.bf16.gmra.mxu0 %v2227_v24 }
 0x4fd   : > { %v3826_v58 = vpop.eup %3825  ;;  %v2450_v30 = vpack.c.bf16 %v3824_v25, %v3820_v18  ;;  %3851 = vtanh.f32 %v2205_v26  ;;  %v2197_v31 = vadd.f32 %v4679_v9, %v2196_v29 }
 0x4fe   : > { %v2451_v1 = vpack.c.bf16 %v3822_v22, %v3826_v58  ;;  %v3828_v32 = vpop.eup %3827  ;;  %3853 = vtanh.f32 %v2076_v16 }
 0x4ff   : > { %3437 = vmatprep.mubr.bf16.mxu1 %v2450_v30  ;;  %v3830_v33 = vpop.eup %3829  ;;  %3855 = vtanh.f32 %v2197_v31 }
 0x500   : > { %3438 = vmatmul.mubr.bf16.gmra.mxu1 %v2451_v1  ;;  %v3832_v34 = vpop.eup %3831  ;;  %3857 = vtanh.f32 %v2202_v28 }
 0x501   : > { %v3834_v35 = vpop.eup %3833 }
 0x502   : > { %v3836_v36 = vpop.eup %3835  ;;  %v2229_v42 = vpack.c.bf16 %v3834_v35, %v3828_v32 }
 0x503   : > { %v3838_v37 = vpop.eup %3837 }
 0x504   : > { %v3840_v38 = vpop.eup %3839  ;;  %v2228_v39 = vpack.c.bf16 %v3838_v37, %v3830_v33 }
 0x505   : > { %v3842_v40 = vpop.eup %3841  ;;  %v2452_v41 = vpack.c.bf16 %v3840_v38, %v3832_v34 }
 0x506   : > { %v3844_v43 = vpop.eup %3843  ;;  %3409 = vmatprep.mubr.bf16.mxu0 %v2228_v39  ;;  %v2453_v9 = vpack.c.bf16 %v3836_v36, %v3842_v40 }
 0x507   : > { %v3846_v44 = vpop.eup %3845  ;;  %3441 = vmatprep.mubr.bf16.mxu1 %v2452_v41  ;;  %3410 = vmatmul.mubr.bf16.gmra.mxu0 %v2229_v42 }
 0x508   : > { %v3848_v45 = vpop.eup %3847  ;;  %3442 = vmatmul.mubr.bf16.gmra.mxu1 %v2453_v9 }
 0x509   : > { %v3850_v46 = vpop.eup %3849 }
 0x50a   : > { %v3852_v47 = vpop.eup %3851  ;;  %v2231_v51 = vpack.c.bf16 %v3850_v46, %v3844_v43 }
 0x50b   : > { %v3854_v48 = vpop.eup %3853 }
 0x50c   : > { %v3856_v52 = vpop.eup %3855  ;;  %v2230_v54 = vpack.c.bf16 %v3854_v48, %v3846_v44 }
 0x50d   : > { %v3858_v55 = vpop.eup %3857  ;;  %v2454_v17 = vpack.c.bf16 %v3856_v52, %v3848_v45 }
 0x50e   : > { %3413 = vmatprep.mubr.bf16.mxu0 %v2230_v54  ;;  %v2455_v56 = vpack.c.bf16 %v3852_v47, %v3858_v55 }
 0x50f   : > { %3445 = vmatprep.mubr.bf16.mxu1 %v2454_v17  ;;  %3414 = vmatmul.mubr.bf16.gmra.mxu0 %v2231_v51 }
 0x510   : > { %3446 = vmatmul.mubr.bf16.gmra.mxu1 %v2455_v56 }
 0x5b4   : > { %v3403_v60 = vpop.f32.mrf.mxu0 }
 0x5b5   : > { %v2346_v61 = vadd.f32 %v3403_v60, %v4716_v59 }
 0x5b6   : > { %v2337_v49 = vpop.f32.mrf.mxu0 }
 0x5b7   : > { %vm2402_vm0 = vcmp.ge.f32.partialorder %v2346_v61, 0.0  ;;  %v2418_v62 = vmul.f32 0.01, %v2346_v61  ;;  %v3435_v63 = vpop.f32.mrf.mxu1  ;;  %v2338_v2 = vadd.f32 %v4716_v59, %v2337_v49 }
 0x5b8   : > { %v2499_v3 = vadd.f32 %v3435_v63, %v4716_v59  ;;  %v3404_v4 = vpop.f32.mrf.mxu0 }
 0x5b9   : > { %v2434_v53 = vsel %vm2402_vm0, %v2346_v61, %v2418_v62  ;;  %vm2400_vm1 = vcmp.ge.f32.partialorder %v2338_v2, 0.0  ;;  %v2416_v5 = vmul.f32 0.01, %v2338_v2  ;;  %v2490_v6 = vpop.f32.mrf.mxu1  ;;  %v2349_v7 = vadd.f32 %v3404_v4, %v4716_v59 }
 0x5ba   : > { %2603 = vst [vmem:[%s4724_s23 + $0x10] sm:$0xff] %v2434_v53  ;;  %vm2555_vm2 = vcmp.ge.f32.partialorder %v2499_v3, 0.0  ;;  %v2571_v50 = vmul.f32 0.01, %v2499_v3  ;;  %v2491_v8 = vadd.f32 %v4716_v59, %v2490_v6  ;;  %v2340_v10 = vpop.f32.mrf.mxu0 }
 0x5bb   : > { %v2432_v11 = vsel %vm2400_vm1, %v2338_v2, %v2416_v5  ;;  %vm2403_vm3 = vcmp.ge.f32.partialorder %v2349_v7, 0.0  ;;  %v2419_v12 = vmul.f32 0.01, %v2349_v7  ;;  %v3436_v13 = vpop.f32.mrf.mxu1  ;;  %v2341_v14 = vadd.f32 %v4716_v59, %v2340_v10 }
 0x5bc   : > { %v2587_v15 = vsel %vm2555_vm2, %v2499_v3, %v2571_v50  ;;  %2601 = vst [vmem:[%s4724_s23] sm:$0xff] %v2432_v11  ;;  %vm2553_vm4 = vcmp.ge.f32.partialorder %v2491_v8, 0.0  ;;  %v2569_v57 = vmul.f32 0.01, %v2491_v8  ;;  %v2502_v18 = vadd.f32 %v3436_v13, %v4716_v59  ;;  %v3407_v24 = vpop.f32.mrf.mxu0 }
 0x5bd   : > { %2619 = vst [vmem:[%s4724_s23 + $0x90] sm:$0xff] %v2587_v15  ;;  %v2435_v19 = vsel %vm2403_vm3, %v2349_v7, %v2419_v12  ;;  %vm2401_vm5 = vcmp.ge.f32.partialorder %v2341_v14, 0.0  ;;  %v2417_v20 = vmul.f32 0.01, %v2341_v14  ;;  %v2493_v21 = vpop.f32.mrf.mxu1  ;;  %v2362_v26 = vadd.f32 %v3407_v24, %v4716_v59 }
 0x5be   : > { %v2585_v22 = vsel %vm2553_vm4, %v2491_v8, %v2569_v57  ;;  %2604 = vst [vmem:[%s4724_s23 + $0x18] sm:$0xff] %v2435_v19  ;;  %vm2556_vm6 = vcmp.ge.f32.partialorder %v2502_v18, 0.0  ;;  %v2572_v0 = vmul.f32 0.01, %v2502_v18  ;;  %v2494_v23 = vadd.f32 %v4716_v59, %v2493_v21  ;;  %v2353_v28 = vpop.f32.mrf.mxu0 }
 0x5bf   : > { %2617 = vst [vmem:[%s4724_s23 + $0x80] sm:$0xff] %v2585_v22  ;;  %v2433_v25 = vsel %vm2401_vm5, %v2341_v14, %v2417_v20  ;;  %vm2406_vm8 = vcmp.ge.f32.partialorder %v2362_v26, 0.0  ;;  %v2422_v16 = vmul.f32 0.01, %v2362_v26  ;;  %v2354_v30 = vadd.f32 %v4716_v59, %v2353_v28 }
 0x5c0   : > { %v2588_v27 = vsel %vm2556_vm6, %v2502_v18, %v2572_v0  ;;  %2602 = vst [vmem:[%s4724_s23 + $0x8] sm:$0xff] %v2433_v25  ;;  %vm2554_vm7 = vcmp.ge.f32.partialorder %v2494_v23, 0.0  ;;  %v2570_v58 = vmul.f32 0.01, %v2494_v23  ;;  %v3439_v29 = vpop.f32.mrf.mxu1  ;;  %v3408_v32 = vpop.f32.mrf.mxu0 }
 0x5c1   : > { %2620 = vst [vmem:[%s4724_s23 + $0x98] sm:$0xff] %v2588_v27  ;;  %v2515_v1 = vadd.f32 %v3439_v29, %v4716_v59  ;;  %v2438_v33 = vsel %vm2406_vm8, %v2362_v26, %v2422_v16  ;;  %vm2404_vm9 = vcmp.ge.f32.partialorder %v2354_v30, 0.0  ;;  %v2420_v34 = vmul.f32 0.01, %v2354_v30 }
 0x5c2   : > { %v2586_v31 = vsel %vm2554_vm7, %v2494_v23, %v2570_v58  ;;  %v2506_v35 = vpop.f32.mrf.mxu1  ;;  %v2365_v36 = vadd.f32 %v3408_v32, %v4716_v59  ;;  %2607 = vst [vmem:[%s4724_s23 + $0x30] sm:$0xff] %v2438_v33  ;;  %v2356_v39 = vpop.f32.mrf.mxu0 }
 0x5c3   : > { %2618 = vst [vmem:[%s4724_s23 + $0x88] sm:$0xff] %v2586_v31  ;;  %vm2559_vm10 = vcmp.ge.f32.partialorder %v2515_v1, 0.0  ;;  %v2575_v37 = vmul.f32 0.01, %v2515_v1  ;;  %v2507_v38 = vadd.f32 %v4716_v59, %v2506_v35  ;;  %v2436_v40 = vsel %vm2404_vm9, %v2354_v30, %v2420_v34 }
 0x5c4   : > { %vm2407_vm11 = vcmp.ge.f32.partialorder %v2365_v36, 0.0  ;;  %v2423_v41 = vmul.f32 0.01, %v2365_v36  ;;  %v3440_v42 = vpop.f32.mrf.mxu1  ;;  %v2357_v43 = vadd.f32 %v4716_v59, %v2356_v39  ;;  %2605 = vst [vmem:[%s4724_s23 + $0x20] sm:$0xff] %v2436_v40 }
 0x5c5   : > { %v2591_v9 = vsel %vm2559_vm10, %v2515_v1, %v2575_v37  ;;  %vm2557_vm12 = vcmp.ge.f32.partialorder %v2507_v38, 0.0  ;;  %v2573_v44 = vmul.f32 0.01, %v2507_v38  ;;  %v2518_v45 = vadd.f32 %v3440_v42, %v4716_v59 }
 0x5c6   : > { %2623 = vst [vmem:[%s4724_s23 + $0xb0] sm:$0xff] %v2591_v9  ;;  %v2439_v46 = vsel %vm2407_vm11, %v2365_v36, %v2423_v41  ;;  %vm2405_vm13 = vcmp.ge.f32.partialorder %v2357_v43, 0.0  ;;  %v2421_v47 = vmul.f32 0.01, %v2357_v43  ;;  %v2509_v48 = vpop.f32.mrf.mxu1 }
 0x5c7   : > { %v2589_v52 = vsel %vm2557_vm12, %v2507_v38, %v2573_v44  ;;  %2608 = vst [vmem:[%s4724_s23 + $0x38] sm:$0xff] %v2439_v46  ;;  %vm2560_vm14 = vcmp.ge.f32.partialorder %v2518_v45, 0.0  ;;  %v2576_v54 = vmul.f32 0.01, %v2518_v45  ;;  %v2510_v55 = vadd.f32 %v4716_v59, %v2509_v48  ;;  %v3411_v51 = vpop.f32.mrf.mxu0 }
 0x5c8   : > { %2621 = vst [vmem:[%s4724_s23 + $0xa0] sm:$0xff] %v2589_v52  ;;  %v2437_v17 = vsel %vm2405_vm13, %v2357_v43, %v2421_v47  ;;  %v2378_v61 = vadd.f32 %v3411_v51, %v4716_v59  ;;  %v3443_v49 = vpop.f32.mrf.mxu1 }
 0x5c9   : > { %v2592_v56 = vsel %vm2560_vm14, %v2518_v45, %v2576_v54  ;;  %2606 = vst [vmem:[%s4724_s23 + $0x28] sm:$0xff] %v2437_v17  ;;  %vm2558_vm15 = vcmp.ge.f32.partialorder %v2510_v55, 0.0  ;;  %v2574_v60 = vmul.f32 0.01, %v2510_v55  ;;  %v2531_v62 = vadd.f32 %v3443_v49, %v4716_v59  ;;  %v2369_v63 = vpop.f32.mrf.mxu0 }
 0x5ca   : > { %2624 = vst [vmem:[%s4724_s23 + $0xb8] sm:$0xff] %v2592_v56  ;;  %vm2410_vm0 = vcmp.ge.f32.partialorder %v2378_v61, 0.0  ;;  %v2426_v3 = vmul.f32 0.01, %v2378_v61  ;;  %v2370_v4 = vadd.f32 %v4716_v59, %v2369_v63  ;;  %v2522_v53 = vpop.f32.mrf.mxu1 }
 0x5cb   : > { %v2590_v2 = vsel %vm2558_vm15, %v2510_v55, %v2574_v60  ;;  %vm2563_vm1 = vcmp.ge.f32.partialorder %v2531_v62, 0.0  ;;  %v2579_v5 = vmul.f32 0.01, %v2531_v62  ;;  %v2523_v6 = vadd.f32 %v4716_v59, %v2522_v53  ;;  %v3412_v7 = vpop.f32.mrf.mxu0 }
 0x5cc   : > { %2622 = vst [vmem:[%s4724_s23 + $0xa8] sm:$0xff] %v2590_v2  ;;  %v2442_v50 = vsel %vm2410_vm0, %v2378_v61, %v2426_v3  ;;  %vm2408_vm2 = vcmp.ge.f32.partialorder %v2370_v4, 0.0  ;;  %v2424_v8 = vmul.f32 0.01, %v2370_v4  ;;  %v2381_v10 = vadd.f32 %v3412_v7, %v4716_v59  ;;  %v3444_v11 = vpop.f32.mrf.mxu1 }
 0x5cd   : > { %2611 = vst [vmem:[%s4724_s23 + $0x50] sm:$0xff] %v2442_v50  ;;  %v2595_v12 = vsel %vm2563_vm1, %v2531_v62, %v2579_v5  ;;  %vm2561_vm3 = vcmp.ge.f32.partialorder %v2523_v6, 0.0  ;;  %v2577_v13 = vmul.f32 0.01, %v2523_v6  ;;  %v2534_v14 = vadd.f32 %v3444_v11, %v4716_v59  ;;  %v2372_v15 = vpop.f32.mrf.mxu0 }
 0x5ce   : > { %2627 = vst [vmem:[%s4724_s23 + $0xd0] sm:$0xff] %v2595_v12  ;;  %v2440_v57 = vsel %vm2408_vm2, %v2370_v4, %v2424_v8  ;;  %vm2411_vm4 = vcmp.ge.f32.partialorder %v2381_v10, 0.0  ;;  %v2427_v18 = vmul.f32 0.01, %v2381_v10  ;;  %v2373_v19 = vadd.f32 %v4716_v59, %v2372_v15  ;;  %v2525_v20 = vpop.f32.mrf.mxu1 }
 0x5cf   : > { %2609 = vst [vmem:[%s4724_s23 + $0x40] sm:$0xff] %v2440_v57  ;;  %v2593_v21 = vsel %vm2561_vm3, %v2523_v6, %v2577_v13  ;;  %vm2564_vm5 = vcmp.ge.f32.partialorder %v2534_v14, 0.0  ;;  %v2580_v22 = vmul.f32 0.01, %v2534_v14  ;;  %v2526_v0 = vadd.f32 %v4716_v59, %v2525_v20  ;;  %v3415_v23 = vpop.f32.mrf.mxu0 }
 0x5d0   : > { %2625 = vst [vmem:[%s4724_s23 + $0xc0] sm:$0xff] %v2593_v21  ;;  %v2443_v24 = vsel %vm2411_vm4, %v2381_v10, %v2427_v18  ;;  %vm2409_vm6 = vcmp.ge.f32.partialorder %v2373_v19, 0.0  ;;  %v2425_v25 = vmul.f32 0.01, %v2373_v19  ;;  %v2394_v26 = vadd.f32 %v3415_v23, %v4716_v59  ;;  %v3447_v27 = vpop.f32.mrf.mxu1 }
 0x5d1   : > { %2612 = vst [vmem:[%s4724_s23 + $0x58] sm:$0xff] %v2443_v24  ;;  %v2596_v58 = vsel %vm2564_vm5, %v2534_v14, %v2580_v22  ;;  %vm2562_vm7 = vcmp.ge.f32.partialorder %v2526_v0, 0.0  ;;  %v2578_v28 = vmul.f32 0.01, %v2526_v0  ;;  %v2547_v16 = vadd.f32 %v3447_v27, %v4716_v59  ;;  %v2385_v29 = vpop.f32.mrf.mxu0 }
 0x5d2   : > { %2628 = vst [vmem:[%s4724_s23 + $0xd8] sm:$0xff] %v2596_v58  ;;  %v2441_v30 = vsel %vm2409_vm6, %v2373_v19, %v2425_v25  ;;  %vm2414_vm8 = vcmp.ge.f32.partialorder %v2394_v26, 0.0  ;;  %v2430_v31 = vmul.f32 0.01, %v2394_v26  ;;  %v2386_v1 = vadd.f32 %v4716_v59, %v2385_v29  ;;  %v2538_v32 = vpop.f32.mrf.mxu1 }
 0x5d3   : > { %2610 = vst [vmem:[%s4724_s23 + $0x48] sm:$0xff] %v2441_v30  ;;  %v2594_v33 = vsel %vm2562_vm7, %v2526_v0, %v2578_v28  ;;  %vm2567_vm9 = vcmp.ge.f32.partialorder %v2547_v16, 0.0  ;;  %v2583_v34 = vmul.f32 0.01, %v2547_v16  ;;  %v2539_v35 = vadd.f32 %v4716_v59, %v2538_v32  ;;  %v3416_v36 = vpop.f32.mrf.mxu0 }
 0x5d4   : > { %2626 = vst [vmem:[%s4724_s23 + $0xc8] sm:$0xff] %v2594_v33  ;;  %v2446_v37 = vsel %vm2414_vm8, %v2394_v26, %v2430_v31  ;;  %vm2412_vm10 = vcmp.ge.f32.partialorder %v2386_v1, 0.0  ;;  %v2428_v38 = vmul.f32 0.01, %v2386_v1  ;;  %v2397_v39 = vadd.f32 %v3416_v36, %v4716_v59  ;;  %v3448_v40 = vpop.f32.mrf.mxu1 }
 0x5d5   : > { %2615 = vst [vmem:[%s4724_s23 + $0x70] sm:$0xff] %v2446_v37  ;;  %v2599_v41 = vsel %vm2567_vm9, %v2547_v16, %v2583_v34  ;;  %vm2565_vm11 = vcmp.ge.f32.partialorder %v2539_v35, 0.0  ;;  %v2581_v42 = vmul.f32 0.01, %v2539_v35  ;;  %v2550_v43 = vadd.f32 %v3448_v40, %v4716_v59  ;;  %v2388_v9 = vpop.f32.mrf.mxu0 }
 0x5d6   : > { %2631 = vst [vmem:[%s4724_s23 + $0xf0] sm:$0xff] %v2599_v41  ;;  %v2444_v44 = vsel %vm2412_vm10, %v2386_v1, %v2428_v38  ;;  %vm2415_vm12 = vcmp.ge.f32.partialorder %v2397_v39, 0.0  ;;  %v2431_v45 = vmul.f32 0.01, %v2397_v39  ;;  %v2389_v46 = vadd.f32 %v4716_v59, %v2388_v9  ;;  %v2541_v47 = vpop.f32.mrf.mxu1 }
 0x5d7   : > { %2613 = vst [vmem:[%s4724_s23 + $0x60] sm:$0xff] %v2444_v44  ;;  %v2597_v48 = vsel %vm2565_vm11, %v2539_v35, %v2581_v42  ;;  %vm2568_vm13 = vcmp.ge.f32.partialorder %v2550_v43, 0.0  ;;  %v2584_v52 = vmul.f32 0.01, %v2550_v43  ;;  %v2542_v54 = vadd.f32 %v4716_v59, %v2541_v47 }
 0x5d8   : > { %2629 = vst [vmem:[%s4724_s23 + $0xe0] sm:$0xff] %v2597_v48  ;;  %v2447_v55 = vsel %vm2415_vm12, %v2397_v39, %v2431_v45  ;;  %vm2413_vm14 = vcmp.ge.f32.partialorder %v2389_v46, 0.0  ;;  %v2429_v17 = vmul.f32 0.01, %v2389_v46  ;;  %2640 = sbr.rel (!%p4894_p6) target bundleno = 1529 (0x5f9), region = 104 }
 0x5d9   : > { %2616 = vst [vmem:[%s4724_s23 + $0x78] sm:$0xff] %v2447_v55  ;;  %v2600_v51 = vsel %vm2568_vm13, %v2550_v43, %v2584_v52  ;;  %vm2566_vm15 = vcmp.ge.f32.partialorder %v2542_v54, 0.0  ;;  %v2582_v56 = vmul.f32 0.01, %v2542_v54 }
 0x5da   : > { %2632 = vst [vmem:[%s4724_s23 + $0xf8] sm:$0xff] %v2600_v51  ;;  %v2445_v60 = vsel %vm2413_vm14, %v2389_v46, %v2429_v17 }
 0x5db   : > { %2614 = vst [vmem:[%s4724_s23 + $0x68] sm:$0xff] %v2445_v60  ;;  %v2598_v61 = vsel %vm2566_vm15, %v2542_v54, %v2582_v56 }
 0x5dc   : > { %2630 = vst [vmem:[%s4724_s23 + $0xe8] sm:$0xff] %v2598_v61 }
 0x5dd   : > { %s4908_s20 = smov (!%p2643_p10, %s2642_s20), 32 }
 0x5de   : > { %s4790_s15 = sshll.u32 %s4908_s20, 7 }
 0x5df   : > { %s2647_s12 = ssub.s32 4096, %s4790_s15 }
 0x5e0   : > { %2648 = vsyncadd %s2634_s30, %s2647_s12  ;;  %p2865_p4 = scmp.ne.s32.totalorder %s4790_s15, 0  ;;  %s2872_s14 = sshll.u32 %s4224_s29, 12 }
 0x5e1   : > { %s4895_s1 = sld [smem:[#allocation27_spill]]  ;;  %s2653_s25 = sshll.u32 %s4724_s23, 4  ;;  %s4803_s25 = int_to_ptr.vmem [resolvable:$true] %s2653_s25 }
 0x5e2   : > { %s4041_s17 = scalar_lea.vmem %s4803_s25, %s4790_s15  ;;  %s4130_s24 = smov [#allocation14]  }
 0x5e3   : > { %p4042_p1 = scmp.ne.s32.totalorder %s4803_s25, %s4041_s17  ;;  %s4045_s19 = sshll.u32 %s4130_s24, 4  ;;  %s4046_s19 = int_to_ptr.vmem [resolvable:$false] %s4045_s19 }
 0x5e4   : > { %s4047_s29 = scalar_lea.vmem %s4046_s19, 8192  ;;  %p4048_p7 = scmp.lt.s32.totalorder %s4803_s25, %s4046_s19 }
 0x5e5   : > { %p4043_p0 = pnand %p4042_p1, %p2865_p4  ;;  %p4049_p9 = scmp.lt.s32.totalorder %s4047_s29, %s4041_s17 }
 0x5e7   : > { %s4800_s16 = scalar_lea.hbm %s4895_s1, %s2872_s14  ;;  %p4044_p2 = pneg %p4043_p0 }
 0x5e8   : > { %p4050_p12 = por %p4049_p9, %p4048_p7 }
 0x5ea   : > { %p4051_p13 = pnand %p4050_p12, %p4044_p2 }
 0x5ec   : > { %4054 = shalt.err (!%p4051_p13)
}
 0x5ed   : > { %s4055_s23 = scalar_lea.hbm %s4800_s16, %s4790_s15  ;;  %s4059_s12 = scalar_lea.hbm %s4895_s1, 8064 }
 0x5ee   : > { %p4056_p5 = scmp.ne.s32.totalorder %s4800_s16, %s4055_s23  ;;  %p4060_p11 = scmp.lt.s32.totalorder %s4800_s16, %s4895_s1 }
 0x5ef   : > { %p4061_p6 = scmp.lt.s32.totalorder %s4059_s12, %s4055_s23 }
 0x5f0   : > { %p4057_p3 = pnand %p4056_p5, %p2865_p4 }
 0x5f1   : > { %p4062_p10 = por %p4061_p6, %p4060_p11 }
 0x5f2   : > { %p4058_p8 = pneg %p4057_p3 }
 0x5f4   : > { %p4063_p1 = pnand %p4062_p10, %p4058_p8 }
 0x5f6   : > { %4066 = shalt.err (!%p4063_p1)
}
 0x5f7   : > { %s4131_s18 = smov 128   ;;  %s4132_s17 = smov 8  }
 0x5f8   : > { %2659 = dma.vmem_to_hbm [thread:$0]  (%p2865_p4), %s4803_s25, %s4790_s15, %s4800_s16, %s2634_s30, %s4131_s18, %s4131_s18, %s4132_s17  }
 0x5f9 PF: > { %s4896_s24 = sld [smem:[#allocation20_spill]]  ;;  %p4899_p2 = scmp.ge.s32.totalorder %s4117_s28, 2 }
 0x5fa   : > { %s4897_s19 = sld [smem:[#allocation24_spill]] }
 0x5ff   : > { %s2668_s29 = sand.u32 1, %s4896_s24  }
 0x600   : > { %p4898_p0 = scmp.ne.s32.totalorder %s4897_s19, 0  ;;  %s2669_s23 = scalar_lea.sflag [#allocation4], %s2668_s29 }
 0x602   : > { %p3495_p7 = pnand %p4899_p2, %p4898_p0 }
 0x604   : > { %p3496_p9 = pneg %p3495_p7 }
 0x606   : > { %4100 = dma.done.wait (%p3496_p9), %s2669_s23, 4096  }
 0x607   : > { %4102 = vsyncadd (%p3496_p9), %s2669_s23, 4294963200  ;;  %s4900_s28 = sld [smem:[#allocation21_spill]]  ;;  %s4902_s25 = smov %s4109_s26 }
 0x608   : > { %s4901_s22 = sld [smem:[#allocation22_spill]]  ;;  %s4903_s26 = smov %s4113_s27 }
 0x60d   : > { %p29_p12 = scmp.ge.s32.totalorder %s4900_s28, 4  }
 0x60e   : > { %s4904_s27 = smov %s4901_s22 }
 0x60f   :  { %31 = sbr.rel (!%p29_p12) target bundleno = 12 (0xc), region = 141 }
 0x614   :  { %2674 = vsyncpa [#allocation3], 1 }
 0x615   :  { %2676 = vsyncpa [#allocation3 + $0x1], 1 }
 0x616   :  { %2677 = vsyncpa [#allocation6], 1 }
 0x617   :  { %2678 = vsyncpa [#allocation9], 1 }
 0x618   :  { %2679 = vsyncpa [#allocation12], 1 }
 0x619   :  { %2680 = vsyncpa [#allocation4], 1 }
 0x61a   :  { %2682 = vsyncpa [#allocation4 + $0x1], 1 }

</bundles_post_ra>
